<compile_context>
chip_gen: v5e
topology: v5e:2x2
jax: 0.10.0
libtpu: 0.0.40
codegen_flags: <defaults>
</compile_context>

<pallas_src>
import jax
import jax.numpy as jnp
from jax.experimental import pallas as pl
from jax.experimental.pallas import tpu as pltpu

C_class = 10
hiddenLayer1 = 500
hiddenLayer2 = 400
hiddenLayer3 = 300
hiddenLayer4 = 200
hiddenLayer5 = 100
hiddenLayer6 = 50
input_size = 784

DIMS = [input_size, hiddenLayer1, hiddenLayer2, hiddenLayer3,
        hiddenLayer4, hiddenLayer5, hiddenLayer6, C_class]
N_LAYERS = len(DIMS) - 1


def fused_mlp_kernel(x_ref, *refs):
    """refs = (w1, b1, w2, b2, ..., w7, b7, o_ref).

    x: (TB, 784) f32; w_i: (K_i, N_i) bf16; b_i: (1, N_i) f32; o: (TB, 10) f32.
    All 7 Linear+ReLU layers computed back-to-back; intermediates never leave
    VMEM/vregs.
    """
    o_ref = refs[-1]
    wb_refs = refs[:-1]

    h = x_ref[...]                                   # f32 activations
    for li in range(N_LAYERS):                       # static unroll (7 layers)
        w_ref = wb_refs[2 * li]
        b_ref = wb_refs[2 * li + 1]
        # MXU matmul: bf16 operands, f32 accumulation.
        y = jnp.dot(h.astype(jnp.bfloat16), w_ref[...],
                    preferred_element_type=jnp.float32)
        # bias add + ReLU in f32 (v5e VPU has no bf16 elementwise).
        h = jnp.maximum(y + b_ref[...], 0.0)

    # Note: final N=10 output uses masked partial stores; negligible at these
    # sizes (pad-to-128 only if store-slot pressure shows up at large batch).
    o_ref[...] = h.astype(o_ref.dtype)


def _net_forward_impl(x, params, batch_tile):
    B, K = x.shape
    assert K == DIMS[0]
    TB = min(batch_tile, B)
    assert B % TB == 0 and TB % 8 == 0, "batch must tile into multiples of 8"

    flat_params = []
    in_specs = [pl.BlockSpec((TB, DIMS[0]), lambda i: (i, 0))]
    for (w, b) in params:
        # Full-array blocks with constant index_map -> DMA'd once, stay in VMEM
        # across all batch-tile grid steps.
        in_specs.append(pl.BlockSpec(w.shape, lambda i: (0, 0)))
        in_specs.append(pl.BlockSpec(b.shape, lambda i: (0, 0)))
        flat_params.extend([w, b])

    return pl.pallas_call(
        fused_mlp_kernel,
        out_shape=jax.ShapeDtypeStruct((B, DIMS[-1]), jnp.float32),
        grid=(B // TB,),
        in_specs=in_specs,
        out_specs=pl.BlockSpec((TB, DIMS[-1]), lambda i: (i, 0)),
        compiler_params=pltpu.CompilerParams(
            # batch axis is independent -> shard across TCs on v7x megacore
            dimension_semantics=("parallel",),
            vmem_limit_bytes=32 * 1024 * 1024,
        ),
    )(x, *flat_params)


@jax.jit
def net_forward(x, params):
    return _net_forward_impl(x, params, batch_tile=64)


def init_params(key):
    """Deterministic init (uniform, like PyTorch's default nn.Linear).

    Weights stored bf16 as (in, out); biases stored f32 pre-shaped to (1, out).
    """
    params = []
    for li in range(N_LAYERS):
        k_in, k_out = DIMS[li], DIMS[li + 1]
        key, kw, kb = jax.random.split(key, 3)
        bound = 1.0 / jnp.sqrt(jnp.float32(k_in))
        w = jax.random.uniform(kw, (k_in, k_out), jnp.float32, -bound, bound)
        b = jax.random.uniform(kb, (k_out,), jnp.float32, -bound, bound)
        params.append((w.astype(jnp.bfloat16), b.reshape(1, k_out)))
    return params


def net_forward_ref(x, params):
    """Pure-JAX reference with identical numerics (bf16 MXU feed, f32 acc)."""
    out = x
    for (w, b) in params:
        y = jnp.dot(out.astype(jnp.bfloat16), w,
                    preferred_element_type=jnp.float32)
        out = jnp.maximum(y + b, 0.0)
    return out


if __name__ == "__main__":
    key = jax.random.PRNGKey(0)
    key, kx = jax.random.split(key)

    batch = 128  # 2 x 64-row batch tiles; better MXU row occupancy than 8
    x = jax.random.normal(kx, (batch, input_size), jnp.float32)
    params = init_params(key)

    y = net_forward(x, params)
    y = jax.block_until_ready(y)

    y_ref = net_forward_ref(x, params)
    assert y.shape == (batch, C_class)
    assert jnp.allclose(y, y_ref, atol=2e-3, rtol=2e-3)

    print("KERNEL_OK")
</pallas_src>

<mosaic_0001>
module attributes {stable_mosaic.version = 11 : i64} {
  func.func @fused_mlp_kernel(%arg0: i32, %arg1: memref<64x784xf32, #tpu.memory_space<vmem>>, %arg2: memref<784x500xbf16, #tpu.memory_space<vmem>>, %arg3: memref<1x500xf32, #tpu.memory_space<vmem>>, %arg4: memref<500x400xbf16, #tpu.memory_space<vmem>>, %arg5: memref<1x400xf32, #tpu.memory_space<vmem>>, %arg6: memref<400x300xbf16, #tpu.memory_space<vmem>>, %arg7: memref<1x300xf32, #tpu.memory_space<vmem>>, %arg8: memref<300x200xbf16, #tpu.memory_space<vmem>>, %arg9: memref<1x200xf32, #tpu.memory_space<vmem>>, %arg10: memref<200x100xbf16, #tpu.memory_space<vmem>>, %arg11: memref<1x100xf32, #tpu.memory_space<vmem>>, %arg12: memref<100x50xbf16, #tpu.memory_space<vmem>>, %arg13: memref<1x50xf32, #tpu.memory_space<vmem>>, %arg14: memref<50x10xbf16, #tpu.memory_space<vmem>>, %arg15: memref<1x10xf32, #tpu.memory_space<vmem>>, %arg16: memref<64x10xf32, #tpu.memory_space<vmem>>) attributes {dimension_semantics = [#tpu.dimension_semantics<parallel>], iteration_bounds = array<i64: 2>, scalar_prefetch = 0 : i64, scratch_operands = 0 : i64, tpu.core_type = #tpu.core_type<tc>, window_params = [{transform_indices = @transform_0, window_bounds = array<i64: 64, 784>}, {pipeline_mode = #tpu.pipeline_mode<synchronous>, transform_indices = @transform_1, window_bounds = array<i64: 784, 500>}, {pipeline_mode = #tpu.pipeline_mode<synchronous>, transform_indices = @transform_2, window_bounds = array<i64: 1, 500>}, {pipeline_mode = #tpu.pipeline_mode<synchronous>, transform_indices = @transform_3, window_bounds = array<i64: 500, 400>}, {pipeline_mode = #tpu.pipeline_mode<synchronous>, transform_indices = @transform_4, window_bounds = array<i64: 1, 400>}, {pipeline_mode = #tpu.pipeline_mode<synchronous>, transform_indices = @transform_5, window_bounds = array<i64: 400, 300>}, {pipeline_mode = #tpu.pipeline_mode<synchronous>, transform_indices = @transform_6, window_bounds = array<i64: 1, 300>}, {pipeline_mode = #tpu.pipeline_mode<synchronous>, transform_indices = @transform_7, window_bounds = array<i64: 300, 200>}, {pipeline_mode = #tpu.pipeline_mode<synchronous>, transform_indices = @transform_8, window_bounds = array<i64: 1, 200>}, {pipeline_mode = #tpu.pipeline_mode<synchronous>, transform_indices = @transform_9, window_bounds = array<i64: 200, 100>}, {pipeline_mode = #tpu.pipeline_mode<synchronous>, transform_indices = @transform_10, window_bounds = array<i64: 1, 100>}, {pipeline_mode = #tpu.pipeline_mode<synchronous>, transform_indices = @transform_11, window_bounds = array<i64: 100, 50>}, {pipeline_mode = #tpu.pipeline_mode<synchronous>, transform_indices = @transform_12, window_bounds = array<i64: 1, 50>}, {pipeline_mode = #tpu.pipeline_mode<synchronous>, transform_indices = @transform_13, window_bounds = array<i64: 50, 10>}, {pipeline_mode = #tpu.pipeline_mode<synchronous>, transform_indices = @transform_14, window_bounds = array<i64: 1, 10>}, {transform_indices = @transform_15, window_bounds = array<i64: 64, 10>}]} {
    %c0 = arith.constant 0 : index
    %c0_0 = arith.constant 0 : index
    %0 = vector.load %arg1[%c0, %c0_0] : memref<64x784xf32, #tpu.memory_space<vmem>>, vector<64x784xf32>
    %1 = arith.truncf %0 : vector<64x784xf32> to vector<64x784xbf16>
    %c0_1 = arith.constant 0 : index
    %c0_2 = arith.constant 0 : index
    %2 = vector.load %arg2[%c0_1, %c0_2] : memref<784x500xbf16, #tpu.memory_space<vmem>>, vector<784x500xbf16>
    %cst = arith.constant dense<0.000000e+00> : vector<64x500xf32>
    %3 = tpu.matmul %1, %2, %cst {dimension_numbers = #tpu.dot_dimension_numbers<[1], [0], [0], [1], [0, 0, 1, 1], [], []>} : vector<64x784xbf16>, vector<784x500xbf16>, vector<64x500xf32> -> vector<64x500xf32>
    %c0_3 = arith.constant 0 : index
    %c0_4 = arith.constant 0 : index
    %4 = vector.load %arg3[%c0_3, %c0_4] : memref<1x500xf32, #tpu.memory_space<vmem>>, vector<1x500xf32>
    %5 = vector.broadcast %4 : vector<1x500xf32> to vector<64x500xf32>
    %6 = arith.addf %3, %5 : vector<64x500xf32>
    %cst_5 = arith.constant 0.000000e+00 : f32
    %7 = vector.broadcast %cst_5 : f32 to vector<64x500xf32>
    %8 = arith.maximumf %6, %7 : vector<64x500xf32>
    %9 = arith.truncf %8 : vector<64x500xf32> to vector<64x500xbf16>
    %c0_6 = arith.constant 0 : index
    %c0_7 = arith.constant 0 : index
    %10 = vector.load %arg4[%c0_6, %c0_7] : memref<500x400xbf16, #tpu.memory_space<vmem>>, vector<500x400xbf16>
    %cst_8 = arith.constant dense<0.000000e+00> : vector<64x400xf32>
    %11 = tpu.matmul %9, %10, %cst_8 {dimension_numbers = #tpu.dot_dimension_numbers<[1], [0], [0], [1], [0, 0, 1, 1], [], []>} : vector<64x500xbf16>, vector<500x400xbf16>, vector<64x400xf32> -> vector<64x400xf32>
    %c0_9 = arith.constant 0 : index
    %c0_10 = arith.constant 0 : index
    %12 = vector.load %arg5[%c0_9, %c0_10] : memref<1x400xf32, #tpu.memory_space<vmem>>, vector<1x400xf32>
    %13 = vector.broadcast %12 : vector<1x400xf32> to vector<64x400xf32>
    %14 = arith.addf %11, %13 : vector<64x400xf32>
    %cst_11 = arith.constant 0.000000e+00 : f32
    %15 = vector.broadcast %cst_11 : f32 to vector<64x400xf32>
    %16 = arith.maximumf %14, %15 : vector<64x400xf32>
    %17 = arith.truncf %16 : vector<64x400xf32> to vector<64x400xbf16>
    %c0_12 = arith.constant 0 : index
    %c0_13 = arith.constant 0 : index
    %18 = vector.load %arg6[%c0_12, %c0_13] : memref<400x300xbf16, #tpu.memory_space<vmem>>, vector<400x300xbf16>
    %cst_14 = arith.constant dense<0.000000e+00> : vector<64x300xf32>
    %19 = tpu.matmul %17, %18, %cst_14 {dimension_numbers = #tpu.dot_dimension_numbers<[1], [0], [0], [1], [0, 0, 1, 1], [], []>} : vector<64x400xbf16>, vector<400x300xbf16>, vector<64x300xf32> -> vector<64x300xf32>
    %c0_15 = arith.constant 0 : index
    %c0_16 = arith.constant 0 : index
    %20 = vector.load %arg7[%c0_15, %c0_16] : memref<1x300xf32, #tpu.memory_space<vmem>>, vector<1x300xf32>
    %21 = vector.broadcast %20 : vector<1x300xf32> to vector<64x300xf32>
    %22 = arith.addf %19, %21 : vector<64x300xf32>
    %cst_17 = arith.constant 0.000000e+00 : f32
    %23 = vector.broadcast %cst_17 : f32 to vector<64x300xf32>
    %24 = arith.maximumf %22, %23 : vector<64x300xf32>
    %25 = arith.truncf %24 : vector<64x300xf32> to vector<64x300xbf16>
    %c0_18 = arith.constant 0 : index
    %c0_19 = arith.constant 0 : index
    %26 = vector.load %arg8[%c0_18, %c0_19] : memref<300x200xbf16, #tpu.memory_space<vmem>>, vector<300x200xbf16>
    %cst_20 = arith.constant dense<0.000000e+00> : vector<64x200xf32>
    %27 = tpu.matmul %25, %26, %cst_20 {dimension_numbers = #tpu.dot_dimension_numbers<[1], [0], [0], [1], [0, 0, 1, 1], [], []>} : vector<64x300xbf16>, vector<300x200xbf16>, vector<64x200xf32> -> vector<64x200xf32>
    %c0_21 = arith.constant 0 : index
    %c0_22 = arith.constant 0 : index
    %28 = vector.load %arg9[%c0_21, %c0_22] : memref<1x200xf32, #tpu.memory_space<vmem>>, vector<1x200xf32>
    %29 = vector.broadcast %28 : vector<1x200xf32> to vector<64x200xf32>
    %30 = arith.addf %27, %29 : vector<64x200xf32>
    %cst_23 = arith.constant 0.000000e+00 : f32
    %31 = vector.broadcast %cst_23 : f32 to vector<64x200xf32>
    %32 = arith.maximumf %30, %31 : vector<64x200xf32>
    %33 = arith.truncf %32 : vector<64x200xf32> to vector<64x200xbf16>
    %c0_24 = arith.constant 0 : index
    %c0_25 = arith.constant 0 : index
    %34 = vector.load %arg10[%c0_24, %c0_25] : memref<200x100xbf16, #tpu.memory_space<vmem>>, vector<200x100xbf16>
    %cst_26 = arith.constant dense<0.000000e+00> : vector<64x100xf32>
    %35 = tpu.matmul %33, %34, %cst_26 {dimension_numbers = #tpu.dot_dimension_numbers<[1], [0], [0], [1], [0, 0, 1, 1], [], []>} : vector<64x200xbf16>, vector<200x100xbf16>, vector<64x100xf32> -> vector<64x100xf32>
    %c0_27 = arith.constant 0 : index
    %c0_28 = arith.constant 0 : index
    %36 = vector.load %arg11[%c0_27, %c0_28] : memref<1x100xf32, #tpu.memory_space<vmem>>, vector<1x100xf32>
    %37 = vector.broadcast %36 : vector<1x100xf32> to vector<64x100xf32>
    %38 = arith.addf %35, %37 : vector<64x100xf32>
    %cst_29 = arith.constant 0.000000e+00 : f32
    %39 = vector.broadcast %cst_29 : f32 to vector<64x100xf32>
    %40 = arith.maximumf %38, %39 : vector<64x100xf32>
    %41 = arith.truncf %40 : vector<64x100xf32> to vector<64x100xbf16>
    %c0_30 = arith.constant 0 : index
    %c0_31 = arith.constant 0 : index
    %42 = vector.load %arg12[%c0_30, %c0_31] : memref<100x50xbf16, #tpu.memory_space<vmem>>, vector<100x50xbf16>
    %cst_32 = arith.constant dense<0.000000e+00> : vector<64x50xf32>
    %43 = tpu.matmul %41, %42, %cst_32 {dimension_numbers = #tpu.dot_dimension_numbers<[1], [0], [0], [1], [0, 0, 1, 1], [], []>} : vector<64x100xbf16>, vector<100x50xbf16>, vector<64x50xf32> -> vector<64x50xf32>
    %c0_33 = arith.constant 0 : index
    %c0_34 = arith.constant 0 : index
    %44 = vector.load %arg13[%c0_33, %c0_34] : memref<1x50xf32, #tpu.memory_space<vmem>>, vector<1x50xf32>
    %45 = vector.broadcast %44 : vector<1x50xf32> to vector<64x50xf32>
    %46 = arith.addf %43, %45 : vector<64x50xf32>
    %cst_35 = arith.constant 0.000000e+00 : f32
    %47 = vector.broadcast %cst_35 : f32 to vector<64x50xf32>
    %48 = arith.maximumf %46, %47 : vector<64x50xf32>
    %49 = arith.truncf %48 : vector<64x50xf32> to vector<64x50xbf16>
    %c0_36 = arith.constant 0 : index
    %c0_37 = arith.constant 0 : index
    %50 = vector.load %arg14[%c0_36, %c0_37] : memref<50x10xbf16, #tpu.memory_space<vmem>>, vector<50x10xbf16>
    %cst_38 = arith.constant dense<0.000000e+00> : vector<64x10xf32>
    %51 = tpu.matmul %49, %50, %cst_38 {dimension_numbers = #tpu.dot_dimension_numbers<[1], [0], [0], [1], [0, 0, 1, 1], [], []>} : vector<64x50xbf16>, vector<50x10xbf16>, vector<64x10xf32> -> vector<64x10xf32>
    %c0_39 = arith.constant 0 : index
    %c0_40 = arith.constant 0 : index
    %52 = vector.load %arg15[%c0_39, %c0_40] : memref<1x10xf32, #tpu.memory_space<vmem>>, vector<1x10xf32>
    %53 = vector.broadcast %52 : vector<1x10xf32> to vector<64x10xf32>
    %54 = arith.addf %51, %53 : vector<64x10xf32>
    %cst_41 = arith.constant 0.000000e+00 : f32
    %55 = vector.broadcast %cst_41 : f32 to vector<64x10xf32>
    %56 = arith.maximumf %54, %55 : vector<64x10xf32>
    %c0_42 = arith.constant 0 : index
    %c0_43 = arith.constant 0 : index
    %57 = vector.load %arg16[%c0_42, %c0_43] : memref<64x10xf32, #tpu.memory_space<vmem>>, vector<64x10xf32>
    tpu.vector_store %arg16[%c0_42, %c0_43], %56 {strides = array<i32>} : memref<64x10xf32, #tpu.memory_space<vmem>>, vector<64x10xf32>,
    return
  }
  func.func @transform_0(%arg0: i32) -> (i32, i32) {
    %c0_i32 = arith.constant 0 : i32
    %c0_i32_0 = arith.constant 0 : i32
    return %arg0, %c0_i32 : i32, i32
  }
  func.func @transform_1(%arg0: i32) -> (i32, i32) {
    %c0_i32 = arith.constant 0 : i32
    %c0_i32_0 = arith.constant 0 : i32
    %c0_i32_1 = arith.constant 0 : i32
    return %c0_i32, %c0_i32_0 : i32, i32
  }
  func.func @transform_2(%arg0: i32) -> (i32, i32) {
    %c0_i32 = arith.constant 0 : i32
    %c0_i32_0 = arith.constant 0 : i32
    %c0_i32_1 = arith.constant 0 : i32
    return %c0_i32, %c0_i32_0 : i32, i32
  }
  func.func @transform_3(%arg0: i32) -> (i32, i32) {
    %c0_i32 = arith.constant 0 : i32
    %c0_i32_0 = arith.constant 0 : i32
    %c0_i32_1 = arith.constant 0 : i32
    return %c0_i32, %c0_i32_0 : i32, i32
  }
  func.func @transform_4(%arg0: i32) -> (i32, i32) {
    %c0_i32 = arith.constant 0 : i32
    %c0_i32_0 = arith.constant 0 : i32
    %c0_i32_1 = arith.constant 0 : i32
    return %c0_i32, %c0_i32_0 : i32, i32
  }
  func.func @transform_5(%arg0: i32) -> (i32, i32) {
    %c0_i32 = arith.constant 0 : i32
    %c0_i32_0 = arith.constant 0 : i32
    %c0_i32_1 = arith.constant 0 : i32
    return %c0_i32, %c0_i32_0 : i32, i32
  }
  func.func @transform_6(%arg0: i32) -> (i32, i32) {
    %c0_i32 = arith.constant 0 : i32
    %c0_i32_0 = arith.constant 0 : i32
    %c0_i32_1 = arith.constant 0 : i32
    return %c0_i32, %c0_i32_0 : i32, i32
  }
  func.func @transform_7(%arg0: i32) -> (i32, i32) {
    %c0_i32 = arith.constant 0 : i32
    %c0_i32_0 = arith.constant 0 : i32
    %c0_i32_1 = arith.constant 0 : i32
    return %c0_i32, %c0_i32_0 : i32, i32
  }
  func.func @transform_8(%arg0: i32) -> (i32, i32) {
    %c0_i32 = arith.constant 0 : i32
    %c0_i32_0 = arith.constant 0 : i32
    %c0_i32_1 = arith.constant 0 : i32
    return %c0_i32, %c0_i32_0 : i32, i32
  }
  func.func @transform_9(%arg0: i32) -> (i32, i32) {
    %c0_i32 = arith.constant 0 : i32
    %c0_i32_0 = arith.constant 0 : i32
    %c0_i32_1 = arith.constant 0 : i32
    return %c0_i32, %c0_i32_0 : i32, i32
  }
  func.func @transform_10(%arg0: i32) -> (i32, i32) {
    %c0_i32 = arith.constant 0 : i32
    %c0_i32_0 = arith.constant 0 : i32
    %c0_i32_1 = arith.constant 0 : i32
    return %c0_i32, %c0_i32_0 : i32, i32
  }
  func.func @transform_11(%arg0: i32) -> (i32, i32) {
    %c0_i32 = arith.constant 0 : i32
    %c0_i32_0 = arith.constant 0 : i32
    %c0_i32_1 = arith.constant 0 : i32
    return %c0_i32, %c0_i32_0 : i32, i32
  }
  func.func @transform_12(%arg0: i32) -> (i32, i32) {
    %c0_i32 = arith.constant 0 : i32
    %c0_i32_0 = arith.constant 0 : i32
    %c0_i32_1 = arith.constant 0 : i32
    return %c0_i32, %c0_i32_0 : i32, i32
  }
  func.func @transform_13(%arg0: i32) -> (i32, i32) {
    %c0_i32 = arith.constant 0 : i32
    %c0_i32_0 = arith.constant 0 : i32
    %c0_i32_1 = arith.constant 0 : i32
    return %c0_i32, %c0_i32_0 : i32, i32
  }
  func.func @transform_14(%arg0: i32) -> (i32, i32) {
    %c0_i32 = arith.constant 0 : i32
    %c0_i32_0 = arith.constant 0 : i32
    %c0_i32_1 = arith.constant 0 : i32
    return %c0_i32, %c0_i32_0 : i32, i32
  }
  func.func @transform_15(%arg0: i32) -> (i32, i32) {
    %c0_i32 = arith.constant 0 : i32
    %c0_i32_0 = arith.constant 0 : i32
    return %arg0, %c0_i32 : i32, i32
  }
}

</mosaic_0001>

<bundles_post_ra>
// kernel: net_forward.1
= control target key start
LH: loop header
LB: loop body
LE: loop exit
PB: predicated region body
PF: predicated region fallthrough
CT: control target
= control target key end

     0   :  { %s8221_s18 = smov 0   ;;  %s12167_s0 = inlined_call_operand.vmem [shape: f32[128,784], index: 0, kind: input, shape index: {}]   ;;  %s12168_s1 = inlined_call_operand.vmem [shape: bf16[784,500], index: 1, kind: input, shape index: {}]   ;;  %s12169_s2 = inlined_call_operand.vmem [shape: f32[1,500], index: 2, kind: input, shape index: {}]   ;;  %s12170_s3 = inlined_call_operand.vmem [shape: bf16[500,400], index: 3, kind: input, shape index: {}]   ;;  %s12171_s4 = inlined_call_operand.vmem [shape: f32[1,400], index: 4, kind: input, shape index: {}]   ;;  %s12172_s5 = inlined_call_operand.vmem [shape: bf16[400,300], index: 5, kind: input, shape index: {}]   ;;  %s12173_s6 = inlined_call_operand.vmem [shape: f32[1,300], index: 6, kind: input, shape index: {}]   ;;  %s12174_s7 = inlined_call_operand.vmem [shape: bf16[300,200], index: 7, kind: input, shape index: {}]   ;;  %s12175_s8 = inlined_call_operand.vmem [shape: f32[1,200], index: 8, kind: input, shape index: {}]   ;;  %s12176_s9 = inlined_call_operand.vmem [shape: bf16[200,100], index: 9, kind: input, shape index: {}]   ;;  %s12177_s10 = inlined_call_operand.vmem [shape: f32[1,100], index: 10, kind: input, shape index: {}]   ;;  %s12178_s11 = inlined_call_operand.vmem [shape: bf16[100,50], index: 11, kind: input, shape index: {}]   ;;  %s12179_s12 = inlined_call_operand.vmem [shape: f32[1,50], index: 12, kind: input, shape index: {}]   ;;  %s12180_s13 = inlined_call_operand.vmem [shape: bf16[50,10], index: 13, kind: input, shape index: {}]   ;;  %s12181_s14 = inlined_call_operand.vmem [shape: f32[1,10], index: 14, kind: input, shape index: {}]   ;;  %s12182_s15 = inlined_call_operand.vmem [shape: f32[128,10], index: 15, kind: output, shape index: {}]  }
   0x1 LB: > { %s5758_s19 = sadd.s32 4294967295, %s8139_s18   ;;  %p5762_p0 = scmp.ge.s32.totalorder %s8139_s18, 1  ;;  %s8139_s18 = sphi %s8221_s18, %s25_s18  }
   0x2   : > { %p439_p1 = scmp.lt.s32.totalorder %s8139_s18, 3 }
   0x4   : > { %p440_p2 = pnand %p5762_p0, %p439_p1 }
   0x5   : > { %s5763_s26 = sshll.u32 (!%p440_p2), %s5758_s19, 3 }
   0x6   : > { %443 = sbr.rel (%p440_p2) target bundleno = 1843 (0x733), region = 80  ;;  %p489_p3 = scmp.lt.s32.totalorder (!%p440_p2), %s5763_s26, 15 }
   0xb   : > { %v5881_v0 = vld [vmem:[%s12168_s1 + $0xe0] sm:$0xf]  ;;  %v7679_v1 = vld [vmem:[%s12168_s1 + $0xec] sm:$0xf0]  ;;  %s12184_s26 = smov (!%p489_p3, %s5763_s26), 15  ;;  %vm1772_vm0 = vcmask 130048  }
   0xc   : > { %v6009_v2 = vld [vmem:[%s12168_s1 + $0x1e0] sm:$0xf]  ;;  %v5882_v3 = vor.u32 %v7679_v1, %v5881_v0  ;;  %v7711_v4 = vld [vmem:[%s12168_s1 + $0x1ec] sm:$0xf0]  ;;  %s8119_s30 = smul.u32 56, %s12184_s26  ;;  %vm3424_vm1 = vcmask 1041408  }
   0xd   : > { %v5865_v5 = vld [vmem:[%s12168_s1 + $0xc0] sm:$0xf]  ;;  %v7675_v6 = vld [vmem:[%s12168_s1 + $0xcc] sm:$0xf0]  ;;  %v6010_v7 = vor.u32 %v7711_v4, %v6009_v2  ;;  %vm3411_vm2 = vcmask 949248   ;;  %vm5098_vm3 = vcmask 1045504  }
   0xe   : > { %v5993_v8 = vld [vmem:[%s12168_s1 + $0x1c0] sm:$0xf]  ;;  %v7707_v9 = vld [vmem:[%s12168_s1 + $0x1cc] sm:$0xf0]  ;;  %1785 = vmatpush.bf16.msra.mxu0 %v5882_v3  ;;  %8103 = vmatpush.bf16.msra.mxu2 %v5882_v3  ;;  %v5866_v10 = vor.u32 %v7675_v6, %v5865_v5  ;;  %s8324_s16 = scalar_lea.vmem %s12167_s0, %s8119_s30  ;;  %vm5085_vm4 = vcmask 359424   ;;  %vm5420_vm5 = vcmask 1043456  }
   0xf   : > { %1814 = vmatpush.bf16.msra.mxu1 %v6010_v7  ;;  %8111 = vmatpush.bf16.msra.mxu3 %v6010_v7  ;;  %v5994_v11 = vor.u32 %v7707_v9, %v5993_v8  ;;  %v5849_v12 = vld [vmem:[%s12168_s1 + $0xa0] sm:$0xf]  ;;  %v7671_v13 = vld [vmem:[%s12168_s1 + $0xac] sm:$0xf0]  ;;  %v509_v50 = vld [vmem:[%s8324_s16 + $0x38] sm:$0xff]  ;;  %vm5407_vm6 = vcmask 588800  }
  0x10   : > { %v5977_v14 = vld [vmem:[%s12168_s1 + $0x1a0] sm:$0xf]  ;;  %v7703_v15 = vld [vmem:[%s12168_s1 + $0x1ac] sm:$0xf0]  ;;  %v5850_v16 = vor.u32 %v7671_v13, %v5849_v12  ;;  %v537_v54 = vld [vmem:[%s8324_s16 + $0x118] sm:$0xff]  ;;  %vm5550_vm7 = vcmask 818176  }
  0x11   : > { %v5978_v17 = vor.u32 %v7703_v15, %v5977_v14  ;;  %v5833_v18 = vld [vmem:[%s12168_s1 + $0x80] sm:$0xf]  ;;  %v7667_v19 = vld [vmem:[%s12168_s1 + $0x8c] sm:$0xf0]  ;;  %v503_v55 = vld [vmem:[%s8324_s16 + $0x8] sm:$0xff]  ;;  %vm5652_vm8 = vcmask 1040384  }
  0x12   : > { %1786 = vmatpush.bf16.msra.mxu0 %v5866_v10  ;;  %8104 = vmatpush.bf16.msra.mxu2 %v5866_v10  ;;  %v5961_v20 = vld [vmem:[%s12168_s1 + $0x180] sm:$0xf]  ;;  %v7699_v21 = vld [vmem:[%s12168_s1 + $0x18c] sm:$0xf0]  ;;  %v5834_v22 = vor.u32 %v7667_v19, %v5833_v18  ;;  %v531_v60 = vld [vmem:[%s8324_s16 + $0xe8] sm:$0xff]  ;;  %vm5639_vm9 = vcmask 408576  }
  0x13   : > { %1815 = vmatpush.bf16.msra.mxu1 %v5994_v11  ;;  %8112 = vmatpush.bf16.msra.mxu3 %v5994_v11  ;;  %v5962_v23 = vor.u32 %v7699_v21, %v5961_v20  ;;  %v5817_v24 = vld [vmem:[%s12168_s1 + $0x60] sm:$0xf]  ;;  %v7663_v25 = vld [vmem:[%s12168_s1 + $0x6c] sm:$0xf0]  ;;  %s5766_s22 = sshll.u32 %s12184_s26, 3  ;;  %vm5693_vm10 = vcmask 80896  }
  0x14   : > { %v5945_v26 = vld [vmem:[%s12168_s1 + $0x160] sm:$0xf]  ;;  %v7695_v27 = vld [vmem:[%s12168_s1 + $0x16c] sm:$0xf0]  ;;  %v5818_v28 = vor.u32 %v7663_v25, %v5817_v24  ;;  %s12146_s24 = scalar_lea.vmem %s12182_s15, %s5766_s22 }
  0x15   : > { %v5946_v29 = vor.u32 %v7695_v27, %v5945_v26  ;;  %v5801_v30 = vld [vmem:[%s12168_s1 + $0x40] sm:$0xf]  ;;  %v7659_v31 = vld [vmem:[%s12168_s1 + $0x4c] sm:$0xf0] }
  0x16   : > { %1787 = vmatpush.bf16.msra.mxu0 %v5850_v16  ;;  %8105 = vmatpush.bf16.msra.mxu2 %v5850_v16  ;;  %v5929_v32 = vld [vmem:[%s12168_s1 + $0x140] sm:$0xf]  ;;  %v7691_v33 = vld [vmem:[%s12168_s1 + $0x14c] sm:$0xf0]  ;;  %v5802_v34 = vor.u32 %v7659_v31, %v5801_v30 }
  0x17   : > { %1816 = vmatpush.bf16.msra.mxu1 %v5978_v17  ;;  %8113 = vmatpush.bf16.msra.mxu3 %v5978_v17  ;;  %v5930_v35 = vor.u32 %v7691_v33, %v5929_v32  ;;  %v5785_v36 = vld [vmem:[%s12168_s1 + $0x20] sm:$0xf]  ;;  %v7655_v37 = vld [vmem:[%s12168_s1 + $0x2c] sm:$0xf0] }
  0x18   : > { %v5913_v38 = vld [vmem:[%s12168_s1 + $0x120] sm:$0xf]  ;;  %v7687_v39 = vld [vmem:[%s12168_s1 + $0x12c] sm:$0xf0]  ;;  %v5786_v40 = vor.u32 %v7655_v37, %v5785_v36 }
  0x19   : > { %v5769_v41 = vld [vmem:[%s12168_s1] sm:$0xf]  ;;  %v5914_v42 = vor.u32 %v7687_v39, %v5913_v38  ;;  %v7651_v43 = vld [vmem:[%s12168_s1 + $0xc] sm:$0xf0] }
  0x1a   : > { %1788 = vmatpush.bf16.msra.mxu0 %v5834_v22  ;;  %8106 = vmatpush.bf16.msra.mxu2 %v5834_v22  ;;  %v5897_v44 = vld [vmem:[%s12168_s1 + $0x100] sm:$0xf]  ;;  %v7683_v45 = vld [vmem:[%s12168_s1 + $0x10c] sm:$0xf0]  ;;  %v5770_v52 = vor.u32 %v7651_v43, %v5769_v41  ;;  %v523_v43 = vld [vmem:[%s8324_s16 + $0xa8] sm:$0xff] }
  0x1b   : > { %1817 = vmatpush.bf16.msra.mxu1 %v5962_v23  ;;  %8114 = vmatpush.bf16.msra.mxu3 %v5962_v23  ;;  %v6137_v46 = vld [vmem:[%s12168_s1 + $0x2e0] sm:$0xf]  ;;  %v7743_v47 = vld [vmem:[%s12168_s1 + $0x2ec] sm:$0xf0]  ;;  %v5898_v58 = vor.u32 %v7683_v45, %v5897_v44  ;;  %v551_v45 = vld [vmem:[%s8324_s16 + $0x188] sm:$0xff] }
  0x1c   : > { %v6265_v48 = vld [vmem:[%s12168_s1 + $0x3e0] sm:$0xf]  ;;  %v7775_v51 = vld [vmem:[%s12168_s1 + $0x3ec] sm:$0xf0]  ;;  %v6138_v62 = vor.u32 %v7743_v47, %v6137_v46  ;;  %v517_v47 = vld [vmem:[%s8324_s16 + $0x78] sm:$0xff] }
  0x1d   : > { %v502_v49 = vld [vmem:[%s8324_s16] sm:$0xff]  ;;  %v7807_v57 = vld [vmem:[%s12168_s1 + $0x4ec] sm:$0xf0]  ;;  %v6266_v63 = vor.u32 %v7775_v51, %v6265_v48 }
  0x1e   : > { %1789 = vmatpush.bf16.msra.mxu0 %v5818_v28  ;;  %8107 = vmatpush.bf16.msra.mxu2 %v5818_v28  ;;  %v530_v53 = vld [vmem:[%s8324_s16 + $0xe0] sm:$0xff]  ;;  %v7839_v1 = vld [vmem:[%s12168_s1 + $0x5ec] sm:$0xf0]  ;;  %v8370_v3 = vpack.c.bf16 %v509_v50, %v502_v49  ;;  %v545_v49 = vld [vmem:[%s8324_s16 + $0x158] sm:$0xff] }
  0x1f   : > { %1818 = vmatpush.bf16.msra.mxu1 %v5946_v29  ;;  %8115 = vmatpush.bf16.msra.mxu3 %v5946_v29  ;;  %v6393_v56 = vld [vmem:[%s12168_s1 + $0x4e0] sm:$0xf]  ;;  %v8372_v4 = vpack.c.bf16 %v537_v54, %v530_v53  ;;  %v7739_v5 = vld [vmem:[%s12168_s1 + $0x2cc] sm:$0xf0] }
  0x20   : > { %v510_v59 = vld [vmem:[%s8324_s16 + $0x40] sm:$0xff]  ;;  %v7771_v7 = vld [vmem:[%s12168_s1 + $0x3cc] sm:$0xf0]  ;;  %v6394_v10 = vor.u32 %v7807_v57, %v6393_v56 }
  0x21   : > { %v538_v61 = vld [vmem:[%s8324_s16 + $0x120] sm:$0xff]  ;;  %v8383_v8 = vpack.c.bf16 %v510_v59, %v503_v55  ;;  %v7803_v13 = vld [vmem:[%s12168_s1 + $0x4cc] sm:$0xf0] }
  0x22   : > { %1790 = vmatpush.bf16.msra.mxu0 %v5802_v34  ;;  %8108 = vmatpush.bf16.msra.mxu2 %v5802_v34  ;;  %v6521_v0 = vld [vmem:[%s12168_s1 + $0x5e0] sm:$0xf]  ;;  %v8385_v9 = vpack.c.bf16 %v538_v61, %v531_v60  ;;  %v7835_v17 = vld [vmem:[%s12168_s1 + $0x5cc] sm:$0xf0] }
  0x23   : > { %1819 = vmatpush.bf16.msra.mxu1 %v5930_v35  ;;  %8116 = vmatpush.bf16.msra.mxu3 %v5930_v35  ;;  %v6121_v2 = vld [vmem:[%s12168_s1 + $0x2c0] sm:$0xf]  ;;  %v6522_v11 = vor.u32 %v7839_v1, %v6521_v0  ;;  %v7735_v19 = vld [vmem:[%s12168_s1 + $0x2ac] sm:$0xf0] }
  0x24   : > { %v6249_v6 = vld [vmem:[%s12168_s1 + $0x3c0] sm:$0xf]  ;;  %v6122_v14 = vor.u32 %v7739_v5, %v6121_v2  ;;  %v7767_v21 = vld [vmem:[%s12168_s1 + $0x3ac] sm:$0xf0] }
  0x25   : > { %v6377_v12 = vld [vmem:[%s12168_s1 + $0x4c0] sm:$0xf]  ;;  %v6250_v15 = vor.u32 %v7771_v7, %v6249_v6  ;;  %v7799_v25 = vld [vmem:[%s12168_s1 + $0x4ac] sm:$0xf0] }
  0x26   : > { %1791 = vmatpush.bf16.msra.mxu0 %v5786_v40  ;;  %8109 = vmatpush.bf16.msra.mxu2 %v5786_v40  ;;  %v6505_v16 = vld [vmem:[%s12168_s1 + $0x5c0] sm:$0xf]  ;;  %v6378_v22 = vor.u32 %v7803_v13, %v6377_v12  ;;  %v7831_v29 = vld [vmem:[%s12168_s1 + $0x5ac] sm:$0xf0] }
  0x27   : > { %1820 = vmatpush.bf16.msra.mxu1 %v5914_v42  ;;  %8117 = vmatpush.bf16.msra.mxu3 %v5914_v42  ;;  %v6105_v18 = vld [vmem:[%s12168_s1 + $0x2a0] sm:$0xf]  ;;  %v6506_v23 = vor.u32 %v7835_v17, %v6505_v16  ;;  %v7731_v31 = vld [vmem:[%s12168_s1 + $0x28c] sm:$0xf0] }
  0x28   : > { %v6233_v20 = vld [vmem:[%s12168_s1 + $0x3a0] sm:$0xf]  ;;  %v6106_v26 = vor.u32 %v7735_v19, %v6105_v18  ;;  %v7763_v33 = vld [vmem:[%s12168_s1 + $0x38c] sm:$0xf0] }
  0x29   : > { %v6361_v24 = vld [vmem:[%s12168_s1 + $0x4a0] sm:$0xf]  ;;  %v6234_v27 = vor.u32 %v7767_v21, %v6233_v20  ;;  %v7795_v37 = vld [vmem:[%s12168_s1 + $0x48c] sm:$0xf0] }
  0x2a   : > { %1792 = vmatpush.bf16.msra.mxu0 %v5770_v52  ;;  %8110 = vmatpush.bf16.msra.mxu2 %v5770_v52  ;;  %v6489_v28 = vld [vmem:[%s12168_s1 + $0x5a0] sm:$0xf]  ;;  %v6362_v35 = vor.u32 %v7799_v25, %v6361_v24  ;;  %v7827_v39 = vld [vmem:[%s12168_s1 + $0x58c] sm:$0xf0] }
  0x2b   : > { %1821 = vmatpush.bf16.msra.mxu1 %v5898_v58  ;;  %8118 = vmatpush.bf16.msra.mxu3 %v5898_v58  ;;  %v6089_v30 = vld [vmem:[%s12168_s1 + $0x280] sm:$0xf]  ;;  %v6490_v36 = vor.u32 %v7831_v29, %v6489_v28  ;;  %v516_v42 = vld [vmem:[%s8324_s16 + $0x70] sm:$0xff] }
  0x2c   : > { %v6217_v32 = vld [vmem:[%s12168_s1 + $0x380] sm:$0xf]  ;;  %v6090_v40 = vor.u32 %v7731_v31, %v6089_v30  ;;  %v544_v44 = vld [vmem:[%s8324_s16 + $0x150] sm:$0xff] }
  0x2d   : > { %1793 = vmatmul.bf16.vlgmr.msra.gmra.mxu0 %v8370_v3  ;;  %1803 = vmatmul.bf16.vlgmr.msra.gmra.mxu2 %v8372_v4  ;;  %v6345_v34 = vld [vmem:[%s12168_s1 + $0x480] sm:$0xf]  ;;  %v6218_v41 = vor.u32 %v7763_v33, %v6217_v32  ;;  %v524_v48 = vld [vmem:[%s8324_s16 + $0xb0] sm:$0xff]  ;;  %v8488_v0 = vpack.c.bf16 %v551_v45, %v544_v44 }
  0x2e   : > { %1843 = vmatpush.bf16.msrb.mxu2 %v6138_v62  ;;  %1822 = vmatmul.bf16.vlgmr.msra.gmra.mxu1 %v8383_v8  ;;  %v6473_v38 = vld [vmem:[%s12168_s1 + $0x580] sm:$0xf]  ;;  %v7727_v50 = vld [vmem:[%s12168_s1 + $0x26c] sm:$0xf0]  ;;  %v6346_v56 = vor.u32 %v7795_v37, %v6345_v34  ;;  %v8499_v6 = vpack.c.bf16 %v524_v48, %v517_v47  ;;  %v5883_v37 = vld [vmem:[%s12168_s1 + $0xf0] sm:$0xf0] }
  0x2f   : > { %1872 = vmatpush.bf16.msrb.mxu3 %v6266_v63  ;;  %1901 = vmatpush.bf16.msrb.mxu0 %v6394_v10  ;;  %v6073_v46 = vld [vmem:[%s12168_s1 + $0x260] sm:$0xf]  ;;  %v7759_v52 = vld [vmem:[%s12168_s1 + $0x36c] sm:$0xf0]  ;;  %v6474_v57 = vor.u32 %v7827_v39, %v6473_v38  ;;  %v8486_v63 = vpack.c.bf16 %v523_v43, %v516_v42  ;;  %v511_v47 = vld [vmem:[%s8324_s16 + $0x48] sm:$0xff] }
  0x30   : > { %1832 = vmatmul.bf16.vlgmr.msra.gmra.mxu3 %v8385_v9  ;;  %1930 = vmatpush.bf16.msrb.mxu1 %v6522_v11  ;;  %v6201_v51 = vld [vmem:[%s12168_s1 + $0x360] sm:$0xf]  ;;  %v552_v53 = vld [vmem:[%s8324_s16 + $0x190] sm:$0xff]  ;;  %v6074_v58 = vor.u32 %v7727_v50, %v6073_v46  ;;  %v505_v50 = vld [vmem:[%s8324_s16 + $0x18] sm:$0xff] }
  0x31   : > { %v6329_v54 = vld [vmem:[%s12168_s1 + $0x460] sm:$0xf]  ;;  %v7791_v55 = vld [vmem:[%s12168_s1 + $0x46c] sm:$0xf0]  ;;  %v6202_v59 = vor.u32 %v7759_v52, %v6201_v51  ;;  %v8501_v7 = vpack.c.bf16 %v552_v53, %v545_v49  ;;  %v7673_v51 = vld [vmem:[%s12168_s1 + $0xc4] sm:$0xf] }
  0x32   : > { %1844 = vmatpush.bf16.msrb.mxu2 %v6122_v14  ;;  %v6457_v60 = vld [vmem:[%s12168_s1 + $0x560] sm:$0xf]  ;;  %v7823_v61 = vld [vmem:[%s12168_s1 + $0x56c] sm:$0xf0]  ;;  %v6330_v10 = vor.u32 %v7791_v55, %v6329_v54  ;;  %v5867_v52 = vld [vmem:[%s12168_s1 + $0xd0] sm:$0xf0] }
  0x33   : > { %1873 = vmatpush.bf16.msrb.mxu3 %v6250_v15  ;;  %1902 = vmatpush.bf16.msrb.mxu0 %v6378_v22  ;;  %v6057_v62 = vld [vmem:[%s12168_s1 + $0x240] sm:$0xf]  ;;  %v7723_v1 = vld [vmem:[%s12168_s1 + $0x24c] sm:$0xf0]  ;;  %v6458_v11 = vor.u32 %v7823_v61, %v6457_v60  ;;  %v5870_v61 = vor.u32 %v7673_v51, %v5867_v52  ;;  %v6091_v51 = vld [vmem:[%s12168_s1 + $0x290] sm:$0xf0] }
  0x34   : > { %1931 = vmatpush.bf16.msrb.mxu1 %v6506_v23  ;;  %v6185_v2 = vld [vmem:[%s12168_s1 + $0x340] sm:$0xf]  ;;  %v7755_v5 = vld [vmem:[%s12168_s1 + $0x34c] sm:$0xf0]  ;;  %v6058_v14 = vor.u32 %v7723_v1, %v6057_v62 }
  0x35   : > { %v6313_v12 = vld [vmem:[%s12168_s1 + $0x440] sm:$0xf]  ;;  %v7787_v13 = vld [vmem:[%s12168_s1 + $0x44c] sm:$0xf0]  ;;  %v6186_v15 = vor.u32 %v7755_v5, %v6185_v2  ;;  %v7669_v2 = vld [vmem:[%s12168_s1 + $0xa4] sm:$0xf] }
  0x36   : > { %1845 = vmatpush.bf16.msrb.mxu2 %v6106_v26  ;;  %v6441_v16 = vld [vmem:[%s12168_s1 + $0x540] sm:$0xf]  ;;  %v7819_v17 = vld [vmem:[%s12168_s1 + $0x54c] sm:$0xf0]  ;;  %v6314_v22 = vor.u32 %v7787_v13, %v6313_v12  ;;  %v5851_v5 = vld [vmem:[%s12168_s1 + $0xb0] sm:$0xf0] }
  0x37   : > { %1874 = vmatpush.bf16.msrb.mxu3 %v6234_v27  ;;  %1903 = vmatpush.bf16.msrb.mxu0 %v6362_v35  ;;  %v6041_v18 = vld [vmem:[%s12168_s1 + $0x220] sm:$0xf]  ;;  %v7719_v19 = vld [vmem:[%s12168_s1 + $0x22c] sm:$0xf0]  ;;  %v6442_v23 = vor.u32 %v7819_v17, %v6441_v16  ;;  %v7665_v12 = vld [vmem:[%s12168_s1 + $0x84] sm:$0xf] }
  0x38   : > { %1932 = vmatpush.bf16.msrb.mxu1 %v6490_v36  ;;  %v6169_v20 = vld [vmem:[%s12168_s1 + $0x320] sm:$0xf]  ;;  %v7751_v21 = vld [vmem:[%s12168_s1 + $0x32c] sm:$0xf0]  ;;  %v6042_v27 = vor.u32 %v7719_v19, %v6041_v18  ;;  %v7677_v36 = vld [vmem:[%s12168_s1 + $0xe4] sm:$0xf] }
  0x39   : > { %v6297_v24 = vld [vmem:[%s12168_s1 + $0x420] sm:$0xf]  ;;  %v7783_v25 = vld [vmem:[%s12168_s1 + $0x42c] sm:$0xf0]  ;;  %v6170_v28 = vor.u32 %v7751_v21, %v6169_v20  ;;  %v5886_v49 = vor.u32 %v7677_v36, %v5883_v37  ;;  %v5835_v13 = vld [vmem:[%s12168_s1 + $0x90] sm:$0xf0] }
  0x3a   : > { %1846 = vmatpush.bf16.msrb.mxu2 %v6090_v40  ;;  %v6425_v26 = vld [vmem:[%s12168_s1 + $0x520] sm:$0xf]  ;;  %v7815_v29 = vld [vmem:[%s12168_s1 + $0x52c] sm:$0xf0]  ;;  %v6298_v38 = vor.u32 %v7783_v25, %v6297_v24  ;;  %v7741_v16 = vld [vmem:[%s12168_s1 + $0x2e4] sm:$0xf] }
  0x3b   : > { %1875 = vmatpush.bf16.msrb.mxu3 %v6218_v41  ;;  %1904 = vmatpush.bf16.msrb.mxu0 %v6346_v56  ;;  %v6025_v30 = vld [vmem:[%s12168_s1 + $0x200] sm:$0xf]  ;;  %v7715_v31 = vld [vmem:[%s12168_s1 + $0x20c] sm:$0xf0]  ;;  %v6426_v39 = vor.u32 %v7815_v29, %v6425_v26  ;;  %v6139_v18 = vld [vmem:[%s12168_s1 + $0x2f0] sm:$0xf0] }
  0x3c   : > { %1933 = vmatpush.bf16.msrb.mxu1 %v6474_v57  ;;  %v6153_v32 = vld [vmem:[%s12168_s1 + $0x300] sm:$0xf]  ;;  %v7747_v33 = vld [vmem:[%s12168_s1 + $0x30c] sm:$0xf0]  ;;  %v6026_v41 = vor.u32 %v7715_v31, %v6025_v30  ;;  %v513_v57 = vld [vmem:[%s8324_s16 + $0x58] sm:$0xff]  ;;  %v6142_v19 = vor.u32 %v7741_v16, %v6139_v18 }
  0x3d   : > { %1798 = vmatmul.bf16.gmra.mxu0 %v8486_v63  ;;  %1808 = vmatmul.bf16.gmra.mxu2 %v8488_v0  ;;  %v6537_v34 = vld [vmem:[%s12168_s1 + $0x600] sm:$0xf]  ;;  %v7843_v35 = vld [vmem:[%s12168_s1 + $0x60c] sm:$0xf0]  ;;  %v6154_v42 = vor.u32 %v7747_v33, %v6153_v32  ;;  %v7705_v20 = vld [vmem:[%s12168_s1 + $0x1c4] sm:$0xf] }
  0x3e   : > { %1847 = vmatpush.bf16.msrb.mxu2 %v6074_v58  ;;  %1827 = vmatmul.bf16.gmra.mxu1 %v8499_v6  ;;  %v6281_v40 = vld [vmem:[%s12168_s1 + $0x400] sm:$0xf]  ;;  %v7779_v43 = vld [vmem:[%s12168_s1 + $0x40c] sm:$0xf0]  ;;  %v6538_v48 = vor.u32 %v7843_v35, %v6537_v34  ;;  %v507_v58 = vld [vmem:[%s8324_s16 + $0x28] sm:$0xff] }
  0x3f   : > { %1876 = vmatpush.bf16.msrb.mxu3 %v6202_v59  ;;  %1905 = vmatpush.bf16.msrb.mxu0 %v6330_v10  ;;  %v6409_v44 = vld [vmem:[%s12168_s1 + $0x500] sm:$0xf]  ;;  %v7811_v45 = vld [vmem:[%s12168_s1 + $0x50c] sm:$0xf0]  ;;  %v6282_v53 = vor.u32 %v7779_v43, %v6281_v40  ;;  %v5995_v21 = vld [vmem:[%s12168_s1 + $0x1d0] sm:$0xf0] }
  0x40   : > { %1837 = vmatmul.bf16.gmra.mxu3 %v8501_v7  ;;  %1934 = vmatpush.bf16.msrb.mxu1 %v6458_v11  ;;  %v504_v46 = vld [vmem:[%s8324_s16 + $0x10] sm:$0xff]  ;;  %v6410_v54 = vor.u32 %v7811_v45, %v6409_v44  ;;  %v506_v56 = vld [vmem:[%s8324_s16 + $0x20] sm:$0xff]  ;;  %v5854_v11 = vor.u32 %v7669_v2, %v5851_v5  ;;  %v5998_v25 = vor.u32 %v7705_v20, %v5995_v21  ;;  %v525_v34 = vld [vmem:[%s8324_s16 + $0xb8] sm:$0xff] }
  0x41   : > { %v512_v55 = vld [vmem:[%s8324_s16 + $0x50] sm:$0xff]  ;;  %v514_v59 = vld [vmem:[%s8324_s16 + $0x60] sm:$0xff]  ;;  %v8593_v60 = vpack.c.bf16 %v511_v47, %v504_v46  ;;  %v8597_v1 = vpack.c.bf16 %v513_v57, %v506_v56  ;;  %v519_v35 = vld [vmem:[%s8324_s16 + $0x88] sm:$0xff] }
  0x42   : > { %1848 = vmatpush.bf16.msrb.mxu2 %v6058_v14  ;;  %v8595_v62 = vpack.c.bf16 %v512_v55, %v505_v50  ;;  %v8605_v10 = vpack.c.bf16 %v514_v59, %v507_v58  ;;  %v7709_v14 = vld [vmem:[%s12168_s1 + $0x1e4] sm:$0xf]  ;;  %v6123_v26 = vld [vmem:[%s12168_s1 + $0x2d0] sm:$0xf0]  ;;  %v527_v43 = vld [vmem:[%s8324_s16 + $0xc8] sm:$0xff] }
  0x43   : > { %1877 = vmatpush.bf16.msrb.mxu3 %v6186_v15  ;;  %1906 = vmatpush.bf16.msrb.mxu0 %v6314_v22  ;;  %v6011_v15 = vld [vmem:[%s12168_s1 + $0x1f0] sm:$0xf0]  ;;  %v7737_v22 = vld [vmem:[%s12168_s1 + $0x2c4] sm:$0xf]  ;;  %v521_v44 = vld [vmem:[%s8324_s16 + $0x98] sm:$0xff] }
  0x44   : > { %1935 = vmatpush.bf16.msrb.mxu1 %v6442_v23  ;;  %v6014_v17 = vor.u32 %v7709_v14, %v6011_v15  ;;  %v5838_v23 = vor.u32 %v7665_v12, %v5835_v13  ;;  %v7661_v24 = vld [vmem:[%s12168_s1 + $0x64] sm:$0xf]  ;;  %v5979_v30 = vld [vmem:[%s12168_s1 + $0x1b0] sm:$0xf0] }
  0x45   : > { %v7701_v29 = vld [vmem:[%s12168_s1 + $0x1a4] sm:$0xf]  ;;  %v6107_v32 = vld [vmem:[%s12168_s1 + $0x2b0] sm:$0xf0] }
  0x46   : > { %1849 = vmatpush.bf16.msrb.mxu2 %v6042_v27  ;;  %v5819_v27 = vld [vmem:[%s12168_s1 + $0x70] sm:$0xf0]  ;;  %v7733_v31 = vld [vmem:[%s12168_s1 + $0x2a4] sm:$0xf]  ;;  %v5982_v37 = vor.u32 %v7701_v29, %v5979_v30  ;;  %v533_v29 = vld [vmem:[%s8324_s16 + $0xf8] sm:$0xff] }
  0x47   : > { %1878 = vmatpush.bf16.msrb.mxu3 %v6170_v28  ;;  %1907 = vmatpush.bf16.msrb.mxu0 %v6298_v38  ;;  %v6126_v28 = vor.u32 %v7737_v22, %v6123_v26  ;;  %v518_v33 = vld [vmem:[%s8324_s16 + $0x80] sm:$0xff]  ;;  %v5822_v36 = vor.u32 %v7661_v24, %v5819_v27  ;;  %v528_v45 = vld [vmem:[%s8324_s16 + $0xd0] sm:$0xff] }
  0x48   : > { %1936 = vmatpush.bf16.msrb.mxu1 %v6426_v39  ;;  %v526_v38 = vld [vmem:[%s8324_s16 + $0xc0] sm:$0xff]  ;;  %v6110_v39 = vor.u32 %v7733_v31, %v6107_v32  ;;  %v5963_v47 = vld [vmem:[%s12168_s1 + $0x190] sm:$0xf0]  ;;  %v541_v32 = vld [vmem:[%s8324_s16 + $0x138] sm:$0xff] }
  0x49   : > { %v7657_v40 = vld [vmem:[%s12168_s1 + $0x44] sm:$0xf]  ;;  %v8687_v52 = vpack.c.bf16 %v526_v38, %v519_v35  ;;  %v5947_v58 = vld [vmem:[%s12168_s1 + $0x170] sm:$0xf0] }
  0x4a   : > { %1850 = vmatpush.bf16.msrb.mxu2 %v6026_v41  ;;  %v5803_v41 = vld [vmem:[%s12168_s1 + $0x50] sm:$0xf0]  ;;  %v7697_v46 = vld [vmem:[%s12168_s1 + $0x184] sm:$0xf] }
  0x4b   : > { %1879 = vmatpush.bf16.msrb.mxu3 %v6154_v42  ;;  %1908 = vmatpush.bf16.msrb.mxu0 %v6282_v53  ;;  %v520_v42 = vld [vmem:[%s8324_s16 + $0x90] sm:$0xff]  ;;  %v7729_v50 = vld [vmem:[%s12168_s1 + $0x284] sm:$0xf]  ;;  %v5966_v55 = vor.u32 %v7697_v46, %v5963_v47 }
  0x4c   : > { %1937 = vmatpush.bf16.msrb.mxu1 %v6410_v54  ;;  %v8689_v53 = vpack.c.bf16 %v527_v43, %v520_v42  ;;  %v8691_v54 = vpack.c.bf16 %v528_v45, %v521_v44  ;;  %v6094_v56 = vor.u32 %v7729_v50, %v6091_v51  ;;  %v7693_v57 = vld [vmem:[%s12168_s1 + $0x164] sm:$0xf]  ;;  %v6075_v2 = vld [vmem:[%s12168_s1 + $0x270] sm:$0xf0] }
  0x4d   : > { %1851 = vmatmul.bf16.vlgmr.msrb.gmra.mxu2 %v8593_v60  ;;  %v7725_v59 = vld [vmem:[%s12168_s1 + $0x264] sm:$0xf]  ;;  %v5931_v15 = vld [vmem:[%s12168_s1 + $0x150] sm:$0xf0] }
  0x4e   : > { %1966 = vmatpush.bf16.msra.mxu2 %v6538_v48  ;;  %1909 = vmatmul.bf16.vlgmr.msrb.gmra.mxu0 %v8597_v1  ;;  %v8679_v48 = vpack.c.bf16 %v525_v34, %v518_v33  ;;  %v7653_v5 = vld [vmem:[%s12168_s1 + $0x24] sm:$0xf]  ;;  %v6078_v12 = vor.u32 %v7725_v59, %v6075_v2  ;;  %v5771_v20 = vld [vmem:[%s12168_s1 + $0x10] sm:$0xf0]  ;;  %v535_v33 = vld [vmem:[%s8324_s16 + $0x108] sm:$0xff] }
  0x4f   : > { %1988 = vmatpush.bf16.msra.mxu3 %v5886_v49  ;;  %1938 = vmatmul.bf16.vlgmr.msrb.gmra.mxu1 %v8605_v10  ;;  %v5806_v49 = vor.u32 %v7657_v40, %v5803_v41  ;;  %v7689_v14 = vld [vmem:[%s12168_s1 + $0x144] sm:$0xf]  ;;  %v6043_v27 = vld [vmem:[%s12168_s1 + $0x230] sm:$0xf0] }
  0x50   : > { %1880 = vmatmul.bf16.vlgmr.msrb.gmra.mxu3 %v8595_v62  ;;  %2017 = vmatpush.bf16.msra.mxu0 %v6014_v17  ;;  %v7721_v16 = vld [vmem:[%s12168_s1 + $0x244] sm:$0xf]  ;;  %v6059_v17 = vld [vmem:[%s12168_s1 + $0x250] sm:$0xf0] }
  0x51   : > { %2046 = vmatpush.bf16.msra.mxu1 %v6142_v19  ;;  %v7649_v18 = vld [vmem:[%s12168_s1 + $0x4] sm:$0xf]  ;;  %v5934_v19 = vor.u32 %v7689_v14, %v5931_v15  ;;  %v6062_v21 = vor.u32 %v7721_v16, %v6059_v17  ;;  %v540_v30 = vld [vmem:[%s8324_s16 + $0x130] sm:$0xff]  ;;  %v555_v16 = vld [vmem:[%s8324_s16 + $0x1a8] sm:$0xff] }
  0x52   : > { %v7685_v22 = vld [vmem:[%s12168_s1 + $0x124] sm:$0xf]  ;;  %v5774_v24 = vor.u32 %v7649_v18, %v5771_v20  ;;  %v5899_v38 = vld [vmem:[%s12168_s1 + $0x110] sm:$0xf0]  ;;  %v8767_v42 = vpack.c.bf16 %v540_v30, %v533_v29  ;;  %v549_v17 = vld [vmem:[%s8324_s16 + $0x178] sm:$0xff] }
  0x53   : > { %1989 = vmatpush.bf16.msra.mxu3 %v5870_v61  ;;  %v5950_v61 = vor.u32 %v7693_v57, %v5947_v58  ;;  %v7717_v26 = vld [vmem:[%s12168_s1 + $0x224] sm:$0xf]  ;;  %v6027_v41 = vld [vmem:[%s12168_s1 + $0x210] sm:$0xf0] }
  0x54   : > { %2018 = vmatpush.bf16.msra.mxu0 %v5998_v25  ;;  %v532_v25 = vld [vmem:[%s8324_s16 + $0xf0] sm:$0xff]  ;;  %v534_v31 = vld [vmem:[%s8324_s16 + $0x100] sm:$0xff] }
  0x55   : > { %2047 = vmatpush.bf16.msra.mxu1 %v6126_v28  ;;  %v539_v28 = vld [vmem:[%s8324_s16 + $0x128] sm:$0xff]  ;;  %v542_v35 = vld [vmem:[%s8324_s16 + $0x140] sm:$0xff]  ;;  %v8769_v43 = vpack.c.bf16 %v541_v32, %v534_v31  ;;  %v6251_v57 = vld [vmem:[%s12168_s1 + $0x3d0] sm:$0xf0] }
  0x56   : > { %v7713_v40 = vld [vmem:[%s12168_s1 + $0x204] sm:$0xf]  ;;  %v8771_v44 = vpack.c.bf16 %v542_v35, %v535_v33  ;;  %v548_v15 = vld [vmem:[%s8324_s16 + $0x170] sm:$0xff] }
  0x57   : > { %1990 = vmatpush.bf16.msra.mxu3 %v5854_v11  ;;  %v5787_v11 = vld [vmem:[%s12168_s1 + $0x30] sm:$0xf0]  ;;  %v6030_v46 = vor.u32 %v7713_v40, %v6027_v41  ;;  %v7773_v47 = vld [vmem:[%s12168_s1 + $0x3e4] sm:$0xf] }
  0x58   : > { %2019 = vmatpush.bf16.msra.mxu0 %v5982_v37  ;;  %v5790_v13 = vor.u32 %v7653_v5, %v5787_v11  ;;  %v7681_v37 = vld [vmem:[%s12168_s1 + $0x104] sm:$0xf]  ;;  %v556_v18 = vld [vmem:[%s8324_s16 + $0x1b0] sm:$0xff] }
  0x59   : > { %2048 = vmatpush.bf16.msra.mxu1 %v6110_v39  ;;  %v8759_v39 = vpack.c.bf16 %v539_v28, %v532_v25  ;;  %v5902_v45 = vor.u32 %v7681_v37, %v5899_v38  ;;  %v7805_v50 = vld [vmem:[%s12168_s1 + $0x4e4] sm:$0xf]  ;;  %v6219_v29 = vld [vmem:[%s12168_s1 + $0x390] sm:$0xf0] }
  0x5a   : > { %v7801_v59 = vld [vmem:[%s12168_s1 + $0x4c4] sm:$0xf]  ;;  %v6347_v32 = vld [vmem:[%s12168_s1 + $0x490] sm:$0xf0] }
  0x5b   : > { %1991 = vmatpush.bf16.msra.mxu3 %v5838_v23  ;;  %v5915_v23 = vld [vmem:[%s12168_s1 + $0x130] sm:$0xf0]  ;;  %v546_v11 = vld [vmem:[%s8324_s16 + $0x160] sm:$0xff] }
  0x5c   : > { %2020 = vmatpush.bf16.msra.mxu0 %v5966_v55  ;;  %v5918_v34 = vor.u32 %v7685_v22, %v5915_v23  ;;  %v6395_v55 = vld [vmem:[%s12168_s1 + $0x4f0] sm:$0xf0]  ;;  %v554_v14 = vld [vmem:[%s8324_s16 + $0x1a0] sm:$0xff]  ;;  %v8815_v22 = vpack.c.bf16 %v556_v18, %v549_v17 }
  0x5d   : > { %1856 = vmatmul.bf16.gmra.mxu2 %v8679_v48  ;;  %2049 = vmatpush.bf16.msra.mxu1 %v6094_v56  ;;  %v7769_v56 = vld [vmem:[%s12168_s1 + $0x3c4] sm:$0xf]  ;;  %v6398_v58 = vor.u32 %v7805_v50, %v6395_v55  ;;  %v508_v35 = vld [vmem:[%s8324_s16 + $0x30] sm:$0xff] }
  0x5e   : > { %1914 = vmatmul.bf16.gmra.mxu0 %v8689_v53  ;;  %v6254_v2 = vor.u32 %v7769_v56, %v6251_v57  ;;  %v7765_v23 = vld [vmem:[%s12168_s1 + $0x3a4] sm:$0xf]  ;;  %v6523_v40 = vld [vmem:[%s12168_s1 + $0x5f0] sm:$0xf0] }
  0x5f   : > { %1992 = vmatpush.bf16.msra.mxu3 %v5822_v36  ;;  %1943 = vmatmul.bf16.gmra.mxu1 %v8691_v54  ;;  %v6046_v36 = vor.u32 %v7717_v26, %v6043_v27  ;;  %v7797_v25 = vld [vmem:[%s12168_s1 + $0x4a4] sm:$0xf]  ;;  %v6363_v27 = vld [vmem:[%s12168_s1 + $0x4b0] sm:$0xf0] }
  0x60   : > { %1885 = vmatmul.bf16.gmra.mxu3 %v8687_v52  ;;  %2021 = vmatpush.bf16.msra.mxu0 %v5950_v61  ;;  %v6379_v61 = vld [vmem:[%s12168_s1 + $0x4d0] sm:$0xf0]  ;;  %v7761_v28 = vld [vmem:[%s12168_s1 + $0x384] sm:$0xf]  ;;  %v6366_v30 = vor.u32 %v7797_v25, %v6363_v27 }
  0x61   : > { %2050 = vmatpush.bf16.msra.mxu1 %v6078_v12  ;;  %v6382_v5 = vor.u32 %v7801_v59, %v6379_v61  ;;  %v553_v12 = vld [vmem:[%s8324_s16 + $0x198] sm:$0xff]  ;;  %v7793_v31 = vld [vmem:[%s12168_s1 + $0x484] sm:$0xf]  ;;  %v6222_v33 = vor.u32 %v7761_v28, %v6219_v29  ;;  %v6331_v50 = vld [vmem:[%s12168_s1 + $0x470] sm:$0xf0] }
  0x62   : > { %v7837_v38 = vld [vmem:[%s12168_s1 + $0x5e4] sm:$0xf]  ;;  %v6507_v56 = vld [vmem:[%s12168_s1 + $0x5d0] sm:$0xf0]  ;;  %v529_v59 = vld [vmem:[%s8324_s16 + $0xd8] sm:$0xff] }
  0x63   : > { %1993 = vmatpush.bf16.msra.mxu3 %v5806_v49  ;;  %v6267_v49 = vld [vmem:[%s12168_s1 + $0x3f0] sm:$0xf0]  ;;  %v6526_v41 = vor.u32 %v7837_v38, %v6523_v40  ;;  %v7833_v55 = vld [vmem:[%s12168_s1 + $0x5c4] sm:$0xf]  ;;  %v8938_v38 = vld [vmem:[%s12169_s2] sm:$0xf] }
  0x64   : > { %2022 = vmatpush.bf16.msra.mxu0 %v5934_v19  ;;  %v6270_v51 = vor.u32 %v7773_v47, %v6267_v49  ;;  %v8809_v19 = vpack.c.bf16 %v553_v12, %v546_v11  ;;  %v7789_v47 = vld [vmem:[%s12168_s1 + $0x464] sm:$0xf]  ;;  %v6510_v57 = vor.u32 %v7833_v55, %v6507_v56  ;;  %v6491_v12 = vld [vmem:[%s12168_s1 + $0x5b0] sm:$0xf0] }
  0x65   : > { %2051 = vmatpush.bf16.msra.mxu1 %v6062_v21  ;;  %v8813_v21 = vpack.c.bf16 %v555_v16, %v548_v15  ;;  %v7753_v61 = vld [vmem:[%s12168_s1 + $0x344] sm:$0xf]  ;;  %v6171_v29 = vld [vmem:[%s12168_s1 + $0x330] sm:$0xf0] }
  0x66   : > { %2075 = vmatpush.bf16.msrb.mxu2 %v6270_v51  ;;  %v6334_v51 = vor.u32 %v7789_v47, %v6331_v50  ;;  %v7825_v18 = vld [vmem:[%s12168_s1 + $0x584] sm:$0xf]  ;;  %v536_v40 = vld [vmem:[%s8324_s16 + $0x110] sm:$0xff] }
  0x67   : > { %1994 = vmatpush.bf16.msra.mxu3 %v5790_v13  ;;  %v547_v13 = vld [vmem:[%s8324_s16 + $0x168] sm:$0xff]  ;;  %v7821_v25 = vld [vmem:[%s12168_s1 + $0x564] sm:$0xf]  ;;  %v6427_v50 = vld [vmem:[%s12168_s1 + $0x530] sm:$0xf0] }
  0x68   : > { %2023 = vmatpush.bf16.msra.mxu0 %v5918_v34  ;;  %v8811_v20 = vpack.c.bf16 %v554_v14, %v547_v13  ;;  %v6350_v34 = vor.u32 %v7793_v31, %v6347_v32  ;;  %v7785_v13 = vld [vmem:[%s12168_s1 + $0x444] sm:$0xf]  ;;  %v6315_v14 = vld [vmem:[%s12168_s1 + $0x450] sm:$0xf0] }
  0x69   : > { %2052 = vmatpush.bf16.msra.mxu1 %v6046_v36  ;;  %v515_v36 = vld [vmem:[%s8324_s16 + $0x68] sm:$0xff]  ;;  %v6318_v16 = vor.u32 %v7785_v13, %v6315_v14  ;;  %v7749_v28 = vld [vmem:[%s12168_s1 + $0x324] sm:$0xf]  ;;  %v6299_v32 = vld [vmem:[%s12168_s1 + $0x430] sm:$0xf0] }
  0x6a   : > { %2076 = vmatpush.bf16.msrb.mxu2 %v6254_v2  ;;  %v8847_v37 = vpack.c.bf16 %v515_v36, %v508_v35  ;;  %v6187_v2 = vld [vmem:[%s12168_s1 + $0x350] sm:$0xf0]  ;;  %v6174_v31 = vor.u32 %v7749_v28, %v6171_v29  ;;  %v7813_v47 = vld [vmem:[%s12168_s1 + $0x524] sm:$0xf]  ;;  %v7712_v28 = vld [vmem:[%s12168_s1 + $0x1f4] sm:$0xf0] }
  0x6b   : > { %1995 = vmatpush.bf16.msra.mxu3 %v5774_v24  ;;  %v6235_v24 = vld [vmem:[%s12168_s1 + $0x3b0] sm:$0xf0]  ;;  %v6190_v11 = vor.u32 %v7753_v61, %v6187_v2  ;;  %v6430_v56 = vor.u32 %v7813_v47, %v6427_v50  ;;  %v7809_v61 = vld [vmem:[%s12168_s1 + $0x504] sm:$0xf]  ;;  %v557_v47 = vld [vmem:[%s8324_s16 + $0x1b8] sm:$0xff] }
  0x6c   : > { %2024 = vmatpush.bf16.msra.mxu0 %v5902_v45  ;;  %v6238_v26 = vor.u32 %v7765_v23, %v6235_v24  ;;  %v7757_v45 = vld [vmem:[%s12168_s1 + $0x364] sm:$0xf]  ;;  %v6475_v23 = vld [vmem:[%s12168_s1 + $0x590] sm:$0xf0]  ;;  %v7708_v50 = vld [vmem:[%s12168_s1 + $0x1d4] sm:$0xf0] }
  0x6d   : > { %1861 = vmatmul.bf16.gmra.mxu2 %v8759_v39  ;;  %2053 = vmatpush.bf16.msra.mxu1 %v6030_v46  ;;  %v6203_v46 = vld [vmem:[%s12168_s1 + $0x370] sm:$0xf0]  ;;  %v6478_v24 = vor.u32 %v7825_v18, %v6475_v23  ;;  %v5889_v23 = vld [vmem:[%s12168_s1 + $0xe8] sm:$0xf] }
  0x6e   : > { %1919 = vmatmul.bf16.gmra.mxu0 %v8769_v43  ;;  %2077 = vmatpush.bf16.msrb.mxu2 %v6238_v26  ;;  %v6206_v49 = vor.u32 %v7757_v45, %v6203_v46  ;;  %v6459_v26 = vld [vmem:[%s12168_s1 + $0x570] sm:$0xf0]  ;;  %v7745_v45 = vld [vmem:[%s12168_s1 + $0x304] sm:$0xf] }
  0x6f   : > { %1948 = vmatmul.bf16.gmra.mxu1 %v8771_v44  ;;  %2104 = vmatpush.bf16.msrb.mxu3 %v6398_v58  ;;  %v522_v58 = vld [vmem:[%s8324_s16 + $0xa0] sm:$0xff]  ;;  %v6462_v27 = vor.u32 %v7821_v25, %v6459_v26  ;;  %v6443_v35 = vld [vmem:[%s12168_s1 + $0x550] sm:$0xf0]  ;;  %v6017_v25 = vld [vmem:[%s12168_s1 + $0x1e8] sm:$0xf] }
  0x70   : > { %1890 = vmatmul.bf16.gmra.mxu3 %v8767_v42  ;;  %2133 = vmatpush.bf16.msrb.mxu0 %v6526_v41  ;;  %v8898_v17 = vpack.c.bf16 %v529_v59, %v522_v58  ;;  %v543_v41 = vld [vmem:[%s8324_s16 + $0x148] sm:$0xff]  ;;  %v6155_v46 = vld [vmem:[%s12168_s1 + $0x310] sm:$0xf0]  ;;  %v8961_v58 = vperm.slane %v8938_v38, 0 }
  0x71   : > { %v6283_v55 = vld [vmem:[%s12168_s1 + $0x410] sm:$0xf0]  ;;  %v8963_v59 = vpack.c.bf16 %v543_v41, %v536_v40  ;;  %v5873_v40 = vld [vmem:[%s12168_s1 + $0xc8] sm:$0xf]  ;;  %v7676_v41 = vld [vmem:[%s12168_s1 + $0xd4] sm:$0xf0] }
  0x72   : > { %2078 = vmatpush.bf16.msrb.mxu2 %v6222_v33  ;;  %v6411_v2 = vld [vmem:[%s12168_s1 + $0x510] sm:$0xf0] }
  0x73   : > { %2105 = vmatpush.bf16.msrb.mxu3 %v6382_v5  ;;  %v7829_v5 = vld [vmem:[%s12168_s1 + $0x5a4] sm:$0xf]  ;;  %v6539_v13 = vld [vmem:[%s12168_s1 + $0x610] sm:$0xf0] }
  0x74   : > { %2134 = vmatpush.bf16.msrb.mxu0 %v6510_v57  ;;  %v6494_v15 = vor.u32 %v7829_v5, %v6491_v12  ;;  %v7841_v5 = vld [vmem:[%s12168_s1 + $0x604] sm:$0xf]  ;;  %v6414_v12 = vor.u32 %v7809_v61, %v6411_v2 }
  0x76   : > { %2079 = vmatpush.bf16.msrb.mxu2 %v6206_v49  ;;  %v6158_v49 = vor.u32 %v7745_v45, %v6155_v46  ;;  %v6001_v45 = vld [vmem:[%s12168_s1 + $0x1c8] sm:$0xf]  ;;  %v550_v46 = vld [vmem:[%s8324_s16 + $0x180] sm:$0xff] }
  0x77   : > { %2106 = vmatpush.bf16.msrb.mxu3 %v6366_v30  ;;  %v7781_v30 = vld [vmem:[%s12168_s1 + $0x424] sm:$0xf]  ;;  %v9018_v61 = vpack.c.bf16 %v557_v47, %v550_v46  ;;  %v7700_v46 = vld [vmem:[%s12168_s1 + $0x194] sm:$0xf0] }
  0x78   : > { %2135 = vmatpush.bf16.msrb.mxu0 %v6494_v15  ;;  %v6302_v33 = vor.u32 %v7781_v30, %v6299_v32 }
  0x7a   : > { %2080 = vmatpush.bf16.msrb.mxu2 %v6190_v11 }
  0x7b   : > { %2107 = vmatpush.bf16.msrb.mxu3 %v6350_v34  ;;  %v7817_v34 = vld [vmem:[%s12168_s1 + $0x544] sm:$0xf] }
  0x7c   : > { %2136 = vmatpush.bf16.msrb.mxu0 %v6478_v24  ;;  %v6446_v36 = vor.u32 %v7817_v34, %v6443_v35  ;;  %v7680_v24 = vld [vmem:[%s12168_s1 + $0xf4] sm:$0xf0] }
  0x7d   : > { %1866 = vmatmul.bf16.gmra.mxu2 %v8809_v19 }
  0x7e   : > { %1924 = vmatmul.bf16.gmra.mxu0 %v8813_v21  ;;  %2081 = vmatpush.bf16.msrb.mxu2 %v6174_v31  ;;  %v6018_v31 = vor.u32 %v7712_v28, %v6017_v25  ;;  %v7704_v25 = vld [vmem:[%s12168_s1 + $0x1b4] sm:$0xf0] }
  0x7f   : > { %1953 = vmatmul.bf16.gmra.mxu1 %v8815_v22  ;;  %2108 = vmatpush.bf16.msrb.mxu3 %v6334_v51  ;;  %v7777_v51 = vld [vmem:[%s12168_s1 + $0x404] sm:$0xf] }
  0x80   : > { %1895 = vmatmul.bf16.gmra.mxu3 %v8811_v20  ;;  %2137 = vmatpush.bf16.msrb.mxu0 %v6462_v27  ;;  %v6286_v57 = vor.u32 %v7777_v51, %v6283_v55  ;;  %v5890_v27 = vor.u32 %v7680_v24, %v5889_v23  ;;  %v6002_v51 = vor.u32 %v7708_v50, %v6001_v45 }
  0x82   : > { %2082 = vmatpush.bf16.msrb.mxu2 %v6158_v49  ;;  %v5874_v49 = vor.u32 %v7676_v41, %v5873_v40  ;;  %v7668_v40 = vld [vmem:[%s12168_s1 + $0x94] sm:$0xf0]  ;;  %v5969_v41 = vld [vmem:[%s12168_s1 + $0x188] sm:$0xf] }
  0x83   : > { %2109 = vmatpush.bf16.msrb.mxu3 %v6318_v16  ;;  %v6542_v16 = vor.u32 %v7841_v5, %v6539_v13  ;;  %v5970_v47 = vor.u32 %v7700_v46, %v5969_v41 }
  0x84   : > { %2138 = vmatpush.bf16.msrb.mxu0 %v6446_v36 }
  0x85   : > { %2169 = vmatpush.bf16.msrb.mxu1 %v6542_v16  ;;  %v5985_v16 = vld [vmem:[%s12168_s1 + $0x1a8] sm:$0xf] }
  0x86   : > { %v5986_v28 = vor.u32 %v7704_v25, %v5985_v16  ;;  %v7664_v16 = vld [vmem:[%s12168_s1 + $0x74] sm:$0xf0] }
  0x87   : > { %2110 = vmatpush.bf16.msrb.mxu3 %v6302_v33 }
  0x88   : > { %2139 = vmatpush.bf16.msrb.mxu0 %v6430_v56 }
  0x8b   : > { %2111 = vmatpush.bf16.msrb.mxu3 %v6286_v57 }
  0x8c   : > { %2140 = vmatpush.bf16.msrb.mxu0 %v6414_v12 }
  0x8d   : > { %6551 = vmatmul.msk.bf16.vlgmr.msra.gmra.mxu2 %vm1772_vm0, %v8847_v37 }
  0x8e   : > { %2025 = vmatmul.bf16.vlgmr.msra.gmra.mxu0 %v8383_v8  ;;  %2191 = vmatpush.bf16.msra.mxu2 %v5890_v27 }
  0x8f   : > { %2054 = vmatmul.bf16.vlgmr.msra.gmra.mxu1 %v8593_v60 }
  0x90   : > { %1996 = vmatmul.bf16.vlgmr.msra.gmra.mxu3 %v8370_v3 }
  0x91   : > { %2220 = vmatpush.bf16.msra.mxu3 %v6018_v31 }
  0x92   : > { %2192 = vmatpush.bf16.msra.mxu2 %v5874_v49 }
  0x95   : > { %2221 = vmatpush.bf16.msra.mxu3 %v6002_v51 }
  0x99   : > { %2222 = vmatpush.bf16.msra.mxu3 %v5986_v28 }
  0x9d   : > { %6552 = vmatmul.msk.bf16.gmra.mxu2 %vm1772_vm0, %v8898_v17  ;;  %2223 = vmatpush.bf16.msra.mxu3 %v5970_v47 }
  0x9e   : > { %2030 = vmatmul.bf16.gmra.mxu0 %v8499_v6 }
  0x9f   : > { %2059 = vmatmul.bf16.gmra.mxu1 %v8679_v48 }
  0xa0   : > { %2001 = vmatmul.bf16.gmra.mxu3 %v8486_v63 }
  0xaa   : > { %v1794_v11 = vpop.f32.mrf.mxu0 }
  0xab   : > { %v1795_v14 = vadd.f32 %v1794_v11, %v8961_v58  ;;  %v1823_v15 = vpop.f32.mrf.mxu1 }
  0xad   : > { %v8978_v18 = vadd.f32 %v1823_v15, %v1795_v14  ;;  %6553 = vmatmul.msk.bf16.gmra.mxu2 %vm1772_vm0, %v8963_v59  ;;  %v5857_v14 = vld [vmem:[%s12168_s1 + $0xa8] sm:$0xf]  ;;  %v7672_v15 = vld [vmem:[%s12168_s1 + $0xb4] sm:$0xf0] }
  0xae   : > { %2035 = vmatmul.bf16.gmra.mxu0 %v8385_v9  ;;  %v5858_v24 = vor.u32 %v7672_v15, %v5857_v14  ;;  %v7776_v14 = vld [vmem:[%s12168_s1 + $0x3f4] sm:$0xf0]  ;;  %v5825_v15 = vld [vmem:[%s12168_s1 + $0x68] sm:$0xf] }
  0xaf   : > { %2064 = vmatmul.bf16.gmra.mxu1 %v8759_v39 }
  0xb0   : > { %2006 = vmatmul.bf16.gmra.mxu3 %v8372_v4  ;;  %v1804_v26 = vpop.f32.mrf.mxu2  ;;  %2193 = vmatpush.bf16.msra.mxu2 %v5858_v24  ;;  %v5953_v24 = vld [vmem:[%s12168_s1 + $0x168] sm:$0xf] }
  0xb1   : > { %v1805_v29 = vadd.f32 %v1804_v26, %v8961_v58 }
  0xb2   : > { %v1796_v32 = vpop.f32.mrf.mxu0 }
  0xb3   : > { %v1833_v30 = vpop.f32.mrf.mxu3  ;;  %v1797_v34 = vadd.f32 %v1796_v32, %v8961_v58  ;;  %v1825_v35 = vpop.f32.mrf.mxu1 }
  0xb4   : > { %v8998_v33 = vadd.f32 %v1833_v30, %v1805_v29 }
  0xb5   : > { %v9001_v36 = vadd.f32 %v1825_v35, %v1797_v34  ;;  %v5841_v35 = vld [vmem:[%s12168_s1 + $0x88] sm:$0xf] }
  0xb6   : > { %v5842_v45 = vor.u32 %v7668_v40, %v5841_v35  ;;  %v7740_v35 = vld [vmem:[%s12168_s1 + $0x2d4] sm:$0xf0]  ;;  %v6257_v40 = vld [vmem:[%s12168_s1 + $0x3c8] sm:$0xf] }
  0xb8   : > { %v1806_v55 = vpop.f32.mrf.mxu2  ;;  %2194 = vmatpush.bf16.msra.mxu2 %v5842_v45 }
  0xb9   : > { %v1807_v56 = vadd.f32 %v1806_v55, %v8961_v58 }
  0xba   : > { %v1799_v2 = vpop.f32.mrf.mxu0 }
  0xbb   : > { %v1835_v57 = vpop.f32.mrf.mxu3  ;;  %v1800_v11 = vadd.f32 %v1799_v2, %v8961_v58  ;;  %v1828_v12 = vpop.f32.mrf.mxu1  ;;  %v6145_v2 = vld [vmem:[%s12168_s1 + $0x2e8] sm:$0xf] }
  0xbc   : > { %v9020_v5 = vadd.f32 %v1835_v57, %v1807_v56 }
  0xbd   : > { %v9023_v13 = vadd.f32 %v1828_v12, %v1800_v11  ;;  %6554 = vmatmul.msk.bf16.gmra.mxu2 %vm1772_vm0, %v9018_v61  ;;  %v7744_v11 = vld [vmem:[%s12168_s1 + $0x2f4] sm:$0xf0] }
  0xbe   : > { %2040 = vmatmul.bf16.gmra.mxu0 %v8501_v7  ;;  %v6146_v12 = vor.u32 %v7744_v11, %v6145_v2  ;;  %v7660_v2 = vld [vmem:[%s12168_s1 + $0x54] sm:$0xf0]  ;;  %v6113_v11 = vld [vmem:[%s12168_s1 + $0x2a8] sm:$0xf] }
  0xbf   : > { %2069 = vmatmul.bf16.gmra.mxu1 %v8809_v19 }
  0xc0   : > { %2011 = vmatmul.bf16.gmra.mxu3 %v8488_v0  ;;  %v1809_v23 = vpop.f32.mrf.mxu2  ;;  %2249 = vmatpush.bf16.msra.mxu0 %v6146_v12  ;;  %v7736_v12 = vld [vmem:[%s12168_s1 + $0x2b4] sm:$0xf0] }
  0xc1   : > { %v1810_v26 = vadd.f32 %v1809_v23, %v8961_v58 }
  0xc2   : > { %v1801_v29 = vpop.f32.mrf.mxu0 }
  0xc3   : > { %v1838_v27 = vpop.f32.mrf.mxu3  ;;  %v1802_v31 = vadd.f32 %v1801_v29, %v8961_v58  ;;  %v1830_v32 = vpop.f32.mrf.mxu1 }
  0xc4   : > { %v9043_v30 = vadd.f32 %v1838_v27, %v1810_v26  ;;  %v5826_v26 = vor.u32 %v7664_v16, %v5825_v15  ;;  %v7696_v27 = vld [vmem:[%s12168_s1 + $0x174] sm:$0xf0]  ;;  %v6114_v15 = vor.u32 %v7736_v12, %v6113_v11 }
  0xc5   : > { %v9046_v34 = vadd.f32 %v1830_v32, %v1802_v31  ;;  %v5954_v31 = vor.u32 %v7696_v27, %v5953_v24  ;;  %v6129_v32 = vld [vmem:[%s12168_s1 + $0x2c8] sm:$0xf]  ;;  %v7692_v24 = vld [vmem:[%s12168_s1 + $0x154] sm:$0xf0] }
  0xc6   : > { %2195 = vmatpush.bf16.msra.mxu2 %v5826_v26  ;;  %v6130_v41 = vor.u32 %v7740_v35, %v6129_v32  ;;  %v7732_v32 = vld [vmem:[%s12168_s1 + $0x294] sm:$0xf0] }
  0xc7   : > { %2224 = vmatpush.bf16.msra.mxu3 %v5954_v31  ;;  %v6097_v31 = vld [vmem:[%s12168_s1 + $0x288] sm:$0xf]  ;;  %v7760_v11 = vld [vmem:[%s12168_s1 + $0x374] sm:$0xf0] }
  0xc8   : > { %v1811_v49 = vpop.f32.mrf.mxu2  ;;  %2250 = vmatpush.bf16.msra.mxu0 %v6130_v41  ;;  %v6098_v35 = vor.u32 %v7732_v32, %v6097_v31  ;;  %v7656_v12 = vld [vmem:[%s12168_s1 + $0x34] sm:$0xf0]  ;;  %v6193_v31 = vld [vmem:[%s12168_s1 + $0x348] sm:$0xf] }
  0xc9   : > { %v1812_v50 = vadd.f32 %v1811_v49, %v8961_v58  ;;  %v6273_v58 = vld [vmem:[%s12168_s1 + $0x3e8] sm:$0xf] }
  0xca   : > { %v6274_v23 = vor.u32 %v7776_v14, %v6273_v58  ;;  %v7768_v14 = vld [vmem:[%s12168_s1 + $0x3b4] sm:$0xf0] }
  0xcb   : > { %v1840_v51 = vpop.f32.mrf.mxu3  ;;  %v1910_v56 = vpop.f32.mrf.mxu0 }
  0xcc   : > { %v9061_v55 = vadd.f32 %v1840_v51, %v1812_v50  ;;  %v1939_v57 = vpop.f32.mrf.mxu1  ;;  %2278 = vmatpush.bf16.msra.mxu1 %v6274_v23  ;;  %v5809_v51 = vld [vmem:[%s12168_s1 + $0x48] sm:$0xf]  ;;  %2251 = vmatpush.bf16.msra.mxu0 %v6114_v15 }
  0xcd   : > { %2083 = vmatmul.bf16.vlgmr.msrb.gmra.mxu2 %v8595_v62  ;;  %v5810_v58 = vor.u32 %v7660_v2, %v5809_v51  ;;  %v5937_v23 = vld [vmem:[%s12168_s1 + $0x148] sm:$0xf]  ;;  %v7728_v51 = vld [vmem:[%s12168_s1 + $0x274] sm:$0xf0] }
  0xce   : > { %2141 = vmatmul.bf16.vlgmr.msrb.gmra.mxu0 %v8605_v10  ;;  %v5938_v27 = vor.u32 %v7692_v24, %v5937_v23  ;;  %v6209_v2 = vld [vmem:[%s12168_s1 + $0x368] sm:$0xf]  ;;  %v7688_v24 = vld [vmem:[%s12168_s1 + $0x134] sm:$0xf0] }
  0xcf   : > { %6555 = vmatmul.msk.bf16.vlgmr.msrb.gmra.mxu1 %vm1772_vm0, %v8847_v37  ;;  %2196 = vmatpush.bf16.msra.mxu2 %v5810_v58  ;;  %v5793_v58 = vld [vmem:[%s12168_s1 + $0x28] sm:$0xf]  ;;  %v6210_v23 = vor.u32 %v7760_v11, %v6209_v2  ;;  %v7752_v11 = vld [vmem:[%s12168_s1 + $0x334] sm:$0xf0] }
  0xd0   : > { %2112 = vmatmul.bf16.vlgmr.msrb.gmra.mxu3 %v8597_v1  ;;  %v1852_v25 = vpop.f32.mrf.mxu2  ;;  %2252 = vmatpush.bf16.msra.mxu0 %v6098_v35 }
  0xd1   : > { %v1853_v28 = vadd.f32 %v1852_v25, %v8978_v18  ;;  %v7772_v18 = vld [vmem:[%s12168_s1 + $0x3d4] sm:$0xf0]  ;;  %2225 = vmatpush.bf16.msra.mxu3 %v5938_v27 }
  0xd2   : > { %v6258_v47 = vor.u32 %v7772_v18, %v6257_v40 }
  0xd3   : > { %v1881_v29 = vpop.f32.mrf.mxu3  ;;  %v1912_v46 = vpop.f32.mrf.mxu0 }
  0xd4   : > { %v1882_v45 = vadd.f32 %v1881_v29, %v1853_v28  ;;  %v1941_v49 = vpop.f32.mrf.mxu1  ;;  %2279 = vmatpush.bf16.msra.mxu1 %v6258_v47 }
  0xd6   : > { %v1911_v50 = vadd.f32 %v1910_v56, %v1882_v45  ;;  %v6241_v56 = vld [vmem:[%s12168_s1 + $0x3a8] sm:$0xf] }
  0xd7   : > { %v6242_v16 = vor.u32 %v7768_v14, %v6241_v56  ;;  %v5921_v56 = vld [vmem:[%s12168_s1 + $0x128] sm:$0xf] }
  0xd8   : > { %v9129_v25 = vadd.f32 %v1939_v57, %v1911_v50  ;;  %v1854_v26 = vpop.f32.mrf.mxu2  ;;  %v6225_v57 = vld [vmem:[%s12168_s1 + $0x388] sm:$0xf] }
  0xd9   : > { %v1855_v28 = vadd.f32 %v1854_v26, %v9001_v36  ;;  %2280 = vmatpush.bf16.msra.mxu1 %v6242_v16  ;;  %v7764_v36 = vld [vmem:[%s12168_s1 + $0x394] sm:$0xf0]  ;;  %v6081_v50 = vld [vmem:[%s12168_s1 + $0x268] sm:$0xf]  ;;  %v5794_v16 = vor.u32 %v7656_v12, %v5793_v58 }
  0xda   : > { %v6226_v45 = vor.u32 %v7764_v36, %v6225_v57  ;;  %v5905_v12 = vld [vmem:[%s12168_s1 + $0x108] sm:$0xf] }
  0xdb   : > { %v1883_v29 = vpop.f32.mrf.mxu3  ;;  %v1915_v41 = vpop.f32.mrf.mxu0  ;;  %2197 = vmatpush.bf16.msra.mxu2 %v5794_v16 }
  0xdc   : > { %v1884_v40 = vadd.f32 %v1883_v29, %v1855_v28  ;;  %v1944_v18 = vpop.f32.mrf.mxu1  ;;  %v5922_v28 = vor.u32 %v7688_v24, %v5921_v56  ;;  %v6065_v29 = vld [vmem:[%s12168_s1 + $0x248] sm:$0xf]  ;;  %v7684_v56 = vld [vmem:[%s12168_s1 + $0x114] sm:$0xf0] }
  0xdd   : > { %2088 = vmatmul.bf16.gmra.mxu2 %v8687_v52  ;;  %2281 = vmatpush.bf16.msra.mxu1 %v6226_v45  ;;  %v5906_v24 = vor.u32 %v7684_v56, %v5905_v12 }
  0xde   : > { %v1913_v47 = vadd.f32 %v1912_v46, %v1884_v40  ;;  %2146 = vmatmul.bf16.gmra.mxu0 %v8691_v54  ;;  %v6082_v46 = vor.u32 %v7728_v51, %v6081_v50  ;;  %2226 = vmatpush.bf16.msra.mxu3 %v5922_v28  ;;  %v7652_v50 = vld [vmem:[%s12168_s1 + $0x14] sm:$0xf0]  ;;  %v6049_v51 = vld [vmem:[%s12168_s1 + $0x228] sm:$0xf] }
  0xdf   : > { %6556 = vmatmul.msk.bf16.gmra.mxu1 %vm1772_vm0, %v8898_v17  ;;  %v6033_v28 = vld [vmem:[%s12168_s1 + $0x208] sm:$0xf] }
  0xe0   : > { %2117 = vmatmul.bf16.gmra.mxu3 %v8689_v53  ;;  %v9170_v14 = vadd.f32 %v1941_v49, %v1913_v47  ;;  %v1857_v15 = vpop.f32.mrf.mxu2  ;;  %2253 = vmatpush.bf16.msra.mxu0 %v6082_v46  ;;  %v7724_v49 = vld [vmem:[%s12168_s1 + $0x254] sm:$0xf0]  ;;  %v5777_v47 = vld [vmem:[%s12168_s1 + $0x8] sm:$0xf] }
  0xe1   : > { %v1858_v26 = vadd.f32 %v1857_v15, %v9023_v13  ;;  %v6066_v32 = vor.u32 %v7724_v49, %v6065_v29  ;;  %v7756_v13 = vld [vmem:[%s12168_s1 + $0x354] sm:$0xf0]  ;;  %2282 = vmatpush.bf16.msra.mxu1 %v6210_v23  ;;  %v5778_v2 = vor.u32 %v7652_v50, %v5777_v47 }
  0xe2   : > { %v6194_v40 = vor.u32 %v7756_v13, %v6193_v31  ;;  %v7720_v46 = vld [vmem:[%s12168_s1 + $0x234] sm:$0xf0]  ;;  %2227 = vmatpush.bf16.msra.mxu3 %v5906_v24  ;;  %v6513_v24 = vld [vmem:[%s12168_s1 + $0x5c8] sm:$0xf] }
  0xe3   : > { %v1886_v27 = vpop.f32.mrf.mxu3  ;;  %v1917_v35 = vpop.f32.mrf.mxu0  ;;  %v6050_v58 = vor.u32 %v7720_v46, %v6049_v51  ;;  %2198 = vmatpush.bf16.msra.mxu2 %v5778_v2  ;;  %v7716_v29 = vld [vmem:[%s12168_s1 + $0x214] sm:$0xf0] }
  0xe4   : > { %v1887_v57 = vadd.f32 %v1886_v27, %v1858_v26  ;;  %v1946_v36 = vpop.f32.mrf.mxu1  ;;  %2254 = vmatpush.bf16.msra.mxu0 %v6066_v32  ;;  %v6034_v49 = vor.u32 %v7716_v29, %v6033_v28  ;;  %v7808_v47 = vld [vmem:[%s12168_s1 + $0x4f4] sm:$0xf0] }
  0xe5   : > { %2283 = vmatpush.bf16.msra.mxu1 %v6194_v40  ;;  %v7840_v46 = vld [vmem:[%s12168_s1 + $0x5f4] sm:$0xf0] }
  0xe6   : > { %v1916_v45 = vadd.f32 %v1915_v41, %v1887_v57  ;;  %v6177_v41 = vld [vmem:[%s12168_s1 + $0x328] sm:$0xf] }
  0xe7   : > { %v6178_v23 = vor.u32 %v7752_v11, %v6177_v41 }
  0xe8   : > { %v9212_v15 = vadd.f32 %v1944_v18, %v1916_v45  ;;  %v1859_v16 = vpop.f32.mrf.mxu2  ;;  %2255 = vmatpush.bf16.msra.mxu0 %v6050_v58  ;;  %v6161_v18 = vld [vmem:[%s12168_s1 + $0x308] sm:$0xf] }
  0xe9   : > { %v1860_v26 = vadd.f32 %v1859_v16, %v9046_v34  ;;  %v7748_v34 = vld [vmem:[%s12168_s1 + $0x314] sm:$0xf0]  ;;  %2284 = vmatpush.bf16.msra.mxu1 %v6178_v23  ;;  %v6401_v45 = vld [vmem:[%s12168_s1 + $0x4e8] sm:$0xf] }
  0xea   : > { %v6162_v57 = vor.u32 %v7748_v34, %v6161_v18  ;;  %v6402_v2 = vor.u32 %v7808_v47, %v6401_v45  ;;  %v7804_v23 = vld [vmem:[%s12168_s1 + $0x4d4] sm:$0xf0] }
  0xeb   : > { %v1888_v27 = vpop.f32.mrf.mxu3  ;;  %v1920_v32 = vpop.f32.mrf.mxu0 }
  0xec   : > { %v1889_v31 = vadd.f32 %v1888_v27, %v1860_v26  ;;  %v1949_v13 = vpop.f32.mrf.mxu1  ;;  %2256 = vmatpush.bf16.msra.mxu0 %v6034_v49  ;;  %2307 = vmatpush.bf16.msrb.mxu2 %v6402_v2  ;;  %v7836_v27 = vld [vmem:[%s12168_s1 + $0x5d4] sm:$0xf0] }
  0xed   : > { %2093 = vmatmul.bf16.gmra.mxu2 %v8767_v42  ;;  %2285 = vmatpush.bf16.msra.mxu1 %v6162_v57  ;;  %v6514_v28 = vor.u32 %v7836_v27, %v6513_v24  ;;  %v7832_v2 = vld [vmem:[%s12168_s1 + $0x5b4] sm:$0xf0] }
  0xee   : > { %v1918_v40 = vadd.f32 %v1917_v35, %v1889_v31  ;;  %2151 = vmatmul.bf16.gmra.mxu0 %v8771_v44  ;;  %v6529_v35 = vld [vmem:[%s12168_s1 + $0x5e8] sm:$0xf] }
  0xef   : > { %6557 = vmatmul.msk.bf16.gmra.mxu1 %vm1772_vm0, %v8963_v59  ;;  %v6530_v58 = vor.u32 %v7840_v46, %v6529_v35 }
  0xf0   : > { %2122 = vmatmul.bf16.gmra.mxu3 %v8769_v43  ;;  %v9241_v50 = vadd.f32 %v1946_v36, %v1918_v40  ;;  %v1862_v51 = vpop.f32.mrf.mxu2  ;;  %v6385_v36 = vld [vmem:[%s12168_s1 + $0x4c8] sm:$0xf] }
  0xf1   : > { %v1863_v41 = vadd.f32 %v1862_v51, %v8998_v33  ;;  %2336 = vmatpush.bf16.msrb.mxu3 %v6530_v58  ;;  %v6386_v26 = vor.u32 %v7804_v23, %v6385_v36  ;;  %v7796_v36 = vld [vmem:[%s12168_s1 + $0x494] sm:$0xf0]  ;;  %v6481_v23 = vld [vmem:[%s12168_s1 + $0x588] sm:$0xf] }
  0xf3   : > { %v1891_v11 = vpop.f32.mrf.mxu3  ;;  %v1922_v56 = vpop.f32.mrf.mxu0  ;;  %2308 = vmatpush.bf16.msrb.mxu2 %v6386_v26 }
  0xf4   : > { %v1892_v12 = vadd.f32 %v1891_v11, %v1863_v41  ;;  %v1951_v16 = vpop.f32.mrf.mxu1 }
  0xf5   : > { %2337 = vmatpush.bf16.msrb.mxu3 %v6514_v28 }
  0xf6   : > { %v1921_v33 = vadd.f32 %v1920_v32, %v1892_v12  ;;  %v6369_v32 = vld [vmem:[%s12168_s1 + $0x4a8] sm:$0xf] }
  0xf8   : > { %v9259_v29 = vadd.f32 %v1949_v13, %v1921_v33  ;;  %v1864_v18 = vpop.f32.mrf.mxu2  ;;  %v6497_v13 = vld [vmem:[%s12168_s1 + $0x5a8] sm:$0xf]  ;;  %v7828_v33 = vld [vmem:[%s12168_s1 + $0x594] sm:$0xf0] }
  0xf9   : > { %v1865_v49 = vadd.f32 %v1864_v18, %v9020_v5  ;;  %v7800_v5 = vld [vmem:[%s12168_s1 + $0x4b4] sm:$0xf0]  ;;  %v6498_v11 = vor.u32 %v7832_v2, %v6497_v13  ;;  %v6482_v26 = vor.u32 %v7828_v33, %v6481_v23  ;;  %v6337_v13 = vld [vmem:[%s12168_s1 + $0x468] sm:$0xf] }
  0xfa   : > { %v6370_v51 = vor.u32 %v7800_v5, %v6369_v32 }
  0xfb   : > { %v1893_v34 = vpop.f32.mrf.mxu3  ;;  %v1925_v57 = vpop.f32.mrf.mxu0  ;;  %2338 = vmatpush.bf16.msrb.mxu3 %v6498_v11 }
  0xfc   : > { %v1894_v31 = vadd.f32 %v1893_v34, %v1865_v49  ;;  %v1954_v40 = vpop.f32.mrf.mxu1  ;;  %2309 = vmatpush.bf16.msrb.mxu2 %v6370_v51  ;;  %v6465_v51 = vld [vmem:[%s12168_s1 + $0x568] sm:$0xf] }
  0xfd   : > { %2098 = vmatmul.bf16.gmra.mxu2 %v8811_v20 }
  0xfe   : > { %v1923_v45 = vadd.f32 %v1922_v56, %v1894_v31  ;;  %2156 = vmatmul.bf16.gmra.mxu0 %v8815_v22 }
  0xff   : > { %6558 = vmatmul.msk.bf16.gmra.mxu1 %vm1772_vm0, %v9018_v61  ;;  %2339 = vmatpush.bf16.msrb.mxu3 %v6482_v26  ;;  %v7788_v26 = vld [vmem:[%s12168_s1 + $0x454] sm:$0xf0] }
 0x100   : > { %2127 = vmatmul.bf16.gmra.mxu3 %v8813_v21  ;;  %v9276_v47 = vadd.f32 %v1951_v16, %v1923_v45  ;;  %v1867_v35 = vpop.f32.mrf.mxu2  ;;  %v6353_v16 = vld [vmem:[%s12168_s1 + $0x488] sm:$0xf] }
 0x101   : > { %v1868_v46 = vadd.f32 %v1867_v35, %v9043_v30  ;;  %v6354_v24 = vor.u32 %v7796_v36, %v6353_v16  ;;  %v7792_v35 = vld [vmem:[%s12168_s1 + $0x474] sm:$0xf0]  ;;  %v7674_v16 = vld [vmem:[%s12168_s1 + $0xcc] sm:$0xf] }
 0x103   : > { %v1896_v41 = vpop.f32.mrf.mxu3  ;;  %v1927_v12 = vpop.f32.mrf.mxu0  ;;  %2310 = vmatpush.bf16.msrb.mxu2 %v6354_v24 }
 0x104   : > { %v1897_v58 = vadd.f32 %v1896_v41, %v1868_v46  ;;  %v1956_v56 = vpop.f32.mrf.mxu1  ;;  %v7824_v41 = vld [vmem:[%s12168_s1 + $0x574] sm:$0xf0] }
 0x106   : > { %v1926_v30 = vadd.f32 %v1925_v57, %v1897_v58  ;;  %v7678_v57 = vld [vmem:[%s12168_s1 + $0xec] sm:$0xf] }
 0x108   : > { %v9294_v27 = vadd.f32 %v1954_v40, %v1926_v30  ;;  %v1869_v28 = vpop.f32.mrf.mxu2  ;;  %v5891_v40 = vld [vmem:[%s12168_s1 + $0xf8] sm:$0xf0] }
 0x109   : > { %v1870_v18 = vadd.f32 %v1869_v28, %v9061_v55  ;;  %v9307_v55 = vperm.slane %v8938_v38, 1  ;;  %v5894_v5 = vor.u32 %v7678_v57, %v5891_v40  ;;  %v6338_v38 = vor.u32 %v7792_v35, %v6337_v13  ;;  %v7670_v28 = vld [vmem:[%s12168_s1 + $0xac] sm:$0xf] }
 0x10b   : > { %v1898_v49 = vpop.f32.mrf.mxu3  ;;  %v2026_v31 = vpop.f32.mrf.mxu0  ;;  %2394 = vmatpush.bf16.msrb.mxu1 %v5894_v5  ;;  %2311 = vmatpush.bf16.msrb.mxu2 %v6338_v38 }
 0x10c   : > { %v1899_v34 = vadd.f32 %v1898_v49, %v1870_v18  ;;  %v2055_v45 = vpop.f32.mrf.mxu1  ;;  %v5859_v49 = vld [vmem:[%s12168_s1 + $0xb8] sm:$0xf0] }
 0x10d   : > { %2199 = vmatmul.bf16.vlgmr.msra.gmra.mxu2 %v8370_v3 }
 0x10e   : > { %v1928_v32 = vadd.f32 %v1927_v12, %v1899_v34  ;;  %2257 = vmatmul.bf16.vlgmr.msra.gmra.mxu0 %v8593_v60  ;;  %v6466_v12 = vor.u32 %v7824_v41, %v6465_v51  ;;  %v6449_v34 = vld [vmem:[%s12168_s1 + $0x548] sm:$0xf]  ;;  %v7666_v51 = vld [vmem:[%s12168_s1 + $0x8c] sm:$0xf] }
 0x10f   : > { %2286 = vmatmul.bf16.vlgmr.msra.gmra.mxu1 %v8595_v62 }
 0x110   : > { %2228 = vmatmul.bf16.vlgmr.msra.gmra.mxu3 %v8383_v8  ;;  %v9319_v2 = vadd.f32 %v1956_v56, %v1928_v32  ;;  %v1968_v46 = vpop.f32.mrf.mxu2  ;;  %v5875_v56 = vld [vmem:[%s12168_s1 + $0xd8] sm:$0xf0]  ;;  %v5862_v32 = vor.u32 %v7670_v28, %v5859_v49 }
 0x111   : > { %v1969_v11 = vadd.f32 %v1968_v46, %v9129_v25  ;;  %v5878_v23 = vor.u32 %v7674_v16, %v5875_v56  ;;  %2340 = vmatpush.bf16.msrb.mxu3 %v6466_v12  ;;  %v6321_v25 = vld [vmem:[%s12168_s1 + $0x448] sm:$0xf]  ;;  %v5843_v46 = vld [vmem:[%s12168_s1 + $0x98] sm:$0xf0] }
 0x112   : > { %v6322_v18 = vor.u32 %v7788_v26, %v6321_v25  ;;  %v5846_v41 = vor.u32 %v7666_v51, %v5843_v46  ;;  %v7784_v25 = vld [vmem:[%s12168_s1 + $0x434] sm:$0xf0]  ;;  %v6433_v26 = vld [vmem:[%s12168_s1 + $0x528] sm:$0xf] }
 0x113   : > { %v1997_v58 = vpop.f32.mrf.mxu3  ;;  %v2028_v30 = vpop.f32.mrf.mxu0  ;;  %2395 = vmatpush.bf16.msrb.mxu1 %v5878_v23  ;;  %v5827_v23 = vld [vmem:[%s12168_s1 + $0x78] sm:$0xf0] }
 0x114   : > { %v1998_v36 = vadd.f32 %v1997_v58, %v9307_v55  ;;  %v2057_v33 = vpop.f32.mrf.mxu1  ;;  %2312 = vmatpush.bf16.msrb.mxu2 %v6322_v18 }
 0x116   : > { %v2027_v24 = vadd.f32 %v2026_v31, %v1998_v36  ;;  %v7820_v31 = vld [vmem:[%s12168_s1 + $0x554] sm:$0xf0] }
 0x117   : > { %v6450_v57 = vor.u32 %v7820_v31, %v6449_v34  ;;  %2396 = vmatpush.bf16.msrb.mxu1 %v5862_v32  ;;  %v7658_v32 = vld [vmem:[%s12168_s1 + $0x4c] sm:$0xf] }
 0x118   : > { %v9350_v40 = vadd.f32 %v2055_v45, %v2027_v24  ;;  %v1970_v5 = vpop.f32.mrf.mxu2  ;;  %v2597_v45 = vmax.f32 %v1969_v11, 0.0  ;;  %v6305_v24 = vld [vmem:[%s12168_s1 + $0x428] sm:$0xf] }
 0x119   : > { %2341 = vmatpush.bf16.msrb.mxu3 %v6450_v57  ;;  %v1971_v13 = vadd.f32 %v1970_v5, %v9170_v14  ;;  %v7662_v14 = vld [vmem:[%s12168_s1 + $0x6c] sm:$0xf]  ;;  %v6306_v18 = vor.u32 %v7784_v25, %v6305_v24  ;;  %v5811_v57 = vld [vmem:[%s12168_s1 + $0x58] sm:$0xf0] }
 0x11a   : > { %v5830_v11 = vor.u32 %v7662_v14, %v5827_v23 }
 0x11b   : > { %v1999_v35 = vpop.f32.mrf.mxu3  ;;  %v2601_v58 = vmax.f32 %v1971_v13, 0.0  ;;  %v2031_v12 = vpop.f32.mrf.mxu0  ;;  %2397 = vmatpush.bf16.msrb.mxu1 %v5846_v41  ;;  %2313 = vmatpush.bf16.msrb.mxu2 %v6306_v18  ;;  %v5814_v13 = vor.u32 %v7658_v32, %v5811_v57  ;;  %v7654_v41 = vld [vmem:[%s12168_s1 + $0x2c] sm:$0xf]  ;;  %v7844_v18 = vld [vmem:[%s12168_s1 + $0x614] sm:$0xf0] }
 0x11c   : > { %v2000_v38 = vadd.f32 %v1999_v35, %v9307_v55  ;;  %v2060_v56 = vpop.f32.mrf.mxu1 }
 0x11d   : > { %v9360_v36 = vpack.c.bf16 %v2601_v58, %v2597_v45  ;;  %2204 = vmatmul.bf16.gmra.mxu2 %v8486_v63  ;;  %v5795_v58 = vld [vmem:[%s12168_s1 + $0x38] sm:$0xf0] }
 0x11e   : > { %v2029_v16 = vadd.f32 %v2028_v30, %v2000_v38  ;;  %2262 = vmatmul.bf16.gmra.mxu0 %v8679_v48  ;;  %v7780_v38 = vld [vmem:[%s12168_s1 + $0x414] sm:$0xf0]  ;;  %v5798_v14 = vor.u32 %v7654_v41, %v5795_v58  ;;  %v7742_v41 = vld [vmem:[%s12168_s1 + $0x2ec] sm:$0xf] }
 0x11f   : > { %2291 = vmatmul.bf16.gmra.mxu1 %v8687_v52 }
 0x120   : > { %2233 = vmatmul.bf16.gmra.mxu3 %v8499_v6  ;;  %v9371_v30 = vadd.f32 %v2057_v33, %v2029_v16  ;;  %v1973_v28 = vpop.f32.mrf.mxu2  ;;  %2398 = vmatpush.bf16.msrb.mxu1 %v5830_v11  ;;  %v7816_v33 = vld [vmem:[%s12168_s1 + $0x534] sm:$0xf0] }
 0x121   : > { %v1974_v49 = vadd.f32 %v1973_v28, %v9212_v15  ;;  %v6434_v31 = vor.u32 %v7816_v33, %v6433_v26  ;;  %v6289_v15 = vld [vmem:[%s12168_s1 + $0x408] sm:$0xf]  ;;  %v7812_v16 = vld [vmem:[%s12168_s1 + $0x514] sm:$0xf0] }
 0x122   : > { %v6290_v45 = vor.u32 %v7780_v38, %v6289_v15  ;;  %v6545_v28 = vld [vmem:[%s12168_s1 + $0x608] sm:$0xf] }
 0x123   : > { %v2002_v34 = vpop.f32.mrf.mxu3  ;;  %v2033_v35 = vpop.f32.mrf.mxu0  ;;  %2342 = vmatpush.bf16.msrb.mxu3 %v6434_v31  ;;  %v2605_v31 = vmax.f32 %v1974_v49, 0.0  ;;  %v7710_v49 = vld [vmem:[%s12168_s1 + $0x1ec] sm:$0xf] }
 0x124   : > { %v2003_v5 = vadd.f32 %v2002_v34, %v9307_v55  ;;  %v2062_v46 = vpop.f32.mrf.mxu1  ;;  %2399 = vmatpush.bf16.msrb.mxu1 %v5814_v13  ;;  %2314 = vmatpush.bf16.msrb.mxu2 %v6290_v45  ;;  %v6546_v34 = vor.u32 %v7844_v18, %v6545_v28 }
 0x126   : > { %v2032_v51 = vadd.f32 %v2031_v12, %v2003_v5  ;;  %v6417_v12 = vld [vmem:[%s12168_s1 + $0x508] sm:$0xf]  ;;  %2372 = vmatpush.bf16.msrb.mxu0 %v6546_v34  ;;  %v7706_v34 = vld [vmem:[%s12168_s1 + $0x1cc] sm:$0xf] }
 0x127   : > { %v6418_v23 = vor.u32 %v7812_v16, %v6417_v12 }
 0x128   : > { %v9412_v11 = vadd.f32 %v2060_v56, %v2032_v51  ;;  %v1975_v24 = vpop.f32.mrf.mxu2  ;;  %2400 = vmatpush.bf16.msrb.mxu1 %v5798_v14  ;;  %v7650_v56 = vld [vmem:[%s12168_s1 + $0xc] sm:$0xf] }
 0x129   : > { %2343 = vmatpush.bf16.msrb.mxu3 %v6418_v23  ;;  %v1976_v25 = vadd.f32 %v1975_v24, %v9241_v50  ;;  %v5779_v50 = vld [vmem:[%s12168_s1 + $0x18] sm:$0xf0] }
 0x12a   : > { %v5782_v5 = vor.u32 %v7650_v56, %v5779_v50  ;;  %v7738_v50 = vld [vmem:[%s12168_s1 + $0x2cc] sm:$0xf] }
 0x12b   : > { %v2004_v26 = vpop.f32.mrf.mxu3  ;;  %v2609_v32 = vmax.f32 %v1976_v25, 0.0  ;;  %v2036_v57 = vpop.f32.mrf.mxu0 }
 0x12c   : > { %v2005_v33 = vadd.f32 %v2004_v26, %v9307_v55  ;;  %v2065_v51 = vpop.f32.mrf.mxu1  ;;  %2401 = vmatpush.bf16.msrb.mxu1 %v5782_v5 }
 0x12d   : > { %v9428_v15 = vpack.c.bf16 %v2609_v32, %v2605_v31  ;;  %2209 = vmatmul.bf16.gmra.mxu2 %v8372_v4 }
 0x12e   : > { %v2034_v13 = vadd.f32 %v2033_v35, %v2005_v33  ;;  %2267 = vmatmul.bf16.gmra.mxu0 %v8759_v39  ;;  %v6019_v35 = vld [vmem:[%s12168_s1 + $0x1f8] sm:$0xf0] }
 0x12f   : > { %2296 = vmatmul.bf16.gmra.mxu1 %v8767_v42  ;;  %v6022_v58 = vor.u32 %v7710_v49, %v6019_v35 }
 0x130   : > { %2238 = vmatmul.bf16.gmra.mxu3 %v8385_v9  ;;  %v9433_v38 = vadd.f32 %v2062_v46, %v2034_v13  ;;  %v1978_v45 = vpop.f32.mrf.mxu2  ;;  %v6147_v46 = vld [vmem:[%s12168_s1 + $0x2f8] sm:$0xf0] }
 0x131   : > { %v1979_v12 = vadd.f32 %v1978_v45, %v9259_v29  ;;  %v6150_v14 = vor.u32 %v7742_v41, %v6147_v46  ;;  %2423 = vmatpush.bf16.msra.mxu2 %v6022_v58  ;;  %v6003_v29 = vld [vmem:[%s12168_s1 + $0x1d8] sm:$0xf0] }
 0x132   : > { %v6006_v32 = vor.u32 %v7706_v34, %v6003_v29 }
 0x133   : > { %v2007_v16 = vpop.f32.mrf.mxu3  ;;  %v2038_v24 = vpop.f32.mrf.mxu0  ;;  %2452 = vmatpush.bf16.msra.mxu3 %v6150_v14 }
 0x134   : > { %v2008_v23 = vadd.f32 %v2007_v16, %v9307_v55  ;;  %v2067_v26 = vpop.f32.mrf.mxu1 }
 0x135   : > { %2424 = vmatpush.bf16.msra.mxu2 %v6006_v32  ;;  %v7698_v32 = vld [vmem:[%s12168_s1 + $0x18c] sm:$0xf] }
 0x136   : > { %v2037_v25 = vadd.f32 %v2036_v57, %v2008_v23  ;;  %v2613_v57 = vmax.f32 %v1979_v12, 0.0  ;;  %v7702_v23 = vld [vmem:[%s12168_s1 + $0x1ac] sm:$0xf] }
 0x138   : > { %v9450_v28 = vadd.f32 %v2065_v51, %v2037_v25  ;;  %v1980_v18 = vpop.f32.mrf.mxu2 }
 0x139   : > { %v1981_v56 = vadd.f32 %v1980_v18, %v9276_v47  ;;  %v6131_v47 = vld [vmem:[%s12168_s1 + $0x2d8] sm:$0xf0] }
 0x13a   : > { %v6134_v51 = vor.u32 %v7738_v50, %v6131_v47  ;;  %v5971_v47 = vld [vmem:[%s12168_s1 + $0x198] sm:$0xf0] }
 0x13b   : > { %v2009_v33 = vpop.f32.mrf.mxu3  ;;  %v2617_v5 = vmax.f32 %v1981_v56, 0.0  ;;  %v2041_v13 = vpop.f32.mrf.mxu0  ;;  %v7734_v56 = vld [vmem:[%s12168_s1 + $0x2ac] sm:$0xf] }
 0x13c   : > { %v2010_v31 = vadd.f32 %v2009_v33, %v9307_v55  ;;  %v2070_v35 = vpop.f32.mrf.mxu1  ;;  %2453 = vmatpush.bf16.msra.mxu3 %v6134_v51 }
 0x13d   : > { %v9466_v41 = vpack.c.bf16 %v2617_v5, %v2613_v57  ;;  %2214 = vmatmul.bf16.gmra.mxu2 %v8488_v0  ;;  %v7730_v57 = vld [vmem:[%s12168_s1 + $0x28c] sm:$0xf] }
 0x13e   : > { %v2039_v49 = vadd.f32 %v2038_v24, %v2010_v31  ;;  %2272 = vmatmul.bf16.gmra.mxu0 %v8809_v19  ;;  %v5987_v24 = vld [vmem:[%s12168_s1 + $0x1b8] sm:$0xf0] }
 0x13f   : > { %2301 = vmatmul.bf16.gmra.mxu1 %v8811_v20  ;;  %v5990_v18 = vor.u32 %v7702_v23, %v5987_v24  ;;  %v6275_v24 = vld [vmem:[%s12168_s1 + $0x3f8] sm:$0xf0] }
 0x140   : > { %2243 = vmatmul.bf16.gmra.mxu3 %v8501_v7  ;;  %v9471_v45 = vadd.f32 %v2067_v26, %v2039_v49  ;;  %v1983_v58 = vpop.f32.mrf.mxu2 }
 0x141   : > { %v1984_v46 = vadd.f32 %v1983_v58, %v9294_v27  ;;  %v6115_v27 = vld [vmem:[%s12168_s1 + $0x2b8] sm:$0xf0]  ;;  %2425 = vmatpush.bf16.msra.mxu2 %v5990_v18 }
 0x142   : > { %v6118_v33 = vor.u32 %v7734_v56, %v6115_v27 }
 0x143   : > { %v2012_v12 = vpop.f32.mrf.mxu3  ;;  %v2043_v14 = vpop.f32.mrf.mxu0  ;;  %v2621_v51 = vmax.f32 %v1984_v46, 0.0  ;;  %v7806_v46 = vld [vmem:[%s12168_s1 + $0x4ec] sm:$0xf] }
 0x144   : > { %v2013_v16 = vadd.f32 %v2012_v12, %v9307_v55  ;;  %v2072_v26 = vpop.f32.mrf.mxu1  ;;  %2454 = vmatpush.bf16.msra.mxu3 %v6118_v33 }
 0x146   : > { %v2042_v25 = vadd.f32 %v2041_v13, %v2013_v16  ;;  %v5974_v13 = vor.u32 %v7698_v32, %v5971_v47  ;;  %v6083_v32 = vld [vmem:[%s12168_s1 + $0x278] sm:$0xf0] }
 0x147   : > { %v6259_v47 = vld [vmem:[%s12168_s1 + $0x3d8] sm:$0xf0] }
 0x148   : > { %v9488_v34 = vadd.f32 %v2070_v35, %v2042_v25  ;;  %v1985_v29 = vpop.f32.mrf.mxu2  ;;  %2426 = vmatpush.bf16.msra.mxu2 %v5974_v13  ;;  %v6403_v25 = vld [vmem:[%s12168_s1 + $0x4f8] sm:$0xf0] }
 0x149   : > { %v1986_v50 = vadd.f32 %v1985_v29, %v9319_v2  ;;  %v6099_v2 = vld [vmem:[%s12168_s1 + $0x298] sm:$0xf0]  ;;  %v6406_v56 = vor.u32 %v7806_v46, %v6403_v25 }
 0x14a   : > { %v6102_v58 = vor.u32 %v7730_v57, %v6099_v2  ;;  %v6243_v46 = vld [vmem:[%s12168_s1 + $0x3b8] sm:$0xf0] }
 0x14b   : > { %v2014_v31 = vpop.f32.mrf.mxu3  ;;  %v2625_v49 = vmax.f32 %v1986_v50, 0.0  ;;  %v2142_v35 = vpop.f32.mrf.mxu0  ;;  %v7694_v50 = vld [vmem:[%s12168_s1 + $0x16c] sm:$0xf]  ;;  %2510 = vmatpush.bf16.msra.mxu1 %v6406_v56 }
 0x14c   : > { %v2015_v5 = vadd.f32 %v2014_v31, %v9307_v55  ;;  %v2171_v16 = vpop.f32.mrf.mxu1  ;;  %2455 = vmatpush.bf16.msra.mxu3 %v6102_v58  ;;  %v7774_v55 = vld [vmem:[%s12168_s1 + $0x3ec] sm:$0xf]  ;;  %v5955_v31 = vld [vmem:[%s12168_s1 + $0x178] sm:$0xf0] }
 0x14d   : > { %v9504_v23 = vpack.c.bf16 %v2625_v49, %v2621_v51  ;;  %2315 = vmatmul.bf16.vlgmr.msrb.gmra.mxu2 %v8597_v1  ;;  %v7802_v51 = vld [vmem:[%s12168_s1 + $0x4cc] sm:$0xf]  ;;  %v6387_v49 = vld [vmem:[%s12168_s1 + $0x4d8] sm:$0xf0] }
 0x14e   : > { %v2044_v12 = vadd.f32 %v2043_v14, %v2015_v5  ;;  %6559 = vmatmul.msk.bf16.vlgmr.msrb.gmra.mxu0 %vm1772_vm0, %v8847_v37  ;;  %v6278_v14 = vor.u32 %v7774_v55, %v6275_v24  ;;  %v7766_v24 = vld [vmem:[%s12168_s1 + $0x3ac] sm:$0xf] }
 0x14f   : > { %2402 = vmatmul.bf16.vlgmr.msrb.gmra.mxu1 %v8370_v3  ;;  %v5958_v3 = vor.u32 %v7694_v50, %v5955_v31  ;;  %v6246_v25 = vor.u32 %v7766_v24, %v6243_v46  ;;  %v7690_v31 = vld [vmem:[%s12168_s1 + $0x14c] sm:$0xf] }
 0x150   : > { %2344 = vmatmul.bf16.vlgmr.msrb.gmra.mxu3 %v8605_v10  ;;  %v9522_v18 = vadd.f32 %v2072_v26, %v2044_v12  ;;  %v2084_v27 = vpop.f32.mrf.mxu2  ;;  %2481 = vmatpush.bf16.msra.mxu0 %v6278_v14  ;;  %v7726_v26 = vld [vmem:[%s12168_s1 + $0x26c] sm:$0xf]  ;;  %v6390_v12 = vor.u32 %v7802_v51, %v6387_v49  ;;  %v6355_v51 = vld [vmem:[%s12168_s1 + $0x498] sm:$0xf0] }
 0x151   : > { %v2085_v33 = vadd.f32 %v2084_v27, %v9350_v40  ;;  %v7770_v40 = vld [vmem:[%s12168_s1 + $0x3cc] sm:$0xf]  ;;  %v6086_v13 = vor.u32 %v7726_v26, %v6083_v32  ;;  %2427 = vmatpush.bf16.msra.mxu2 %v5958_v3  ;;  %v5939_v26 = vld [vmem:[%s12168_s1 + $0x158] sm:$0xf0] }
 0x152   : > { %v6262_v2 = vor.u32 %v7770_v40, %v6259_v47  ;;  %v7798_v14 = vld [vmem:[%s12168_s1 + $0x4ac] sm:$0xf]  ;;  %2511 = vmatpush.bf16.msra.mxu1 %v6390_v12  ;;  %v5942_v3 = vor.u32 %v7690_v31, %v5939_v26 }
 0x153   : > { %v2113_v29 = vpop.f32.mrf.mxu3  ;;  %v2144_v5 = vpop.f32.mrf.mxu0  ;;  %2456 = vmatpush.bf16.msra.mxu3 %v6086_v13  ;;  %v7762_v32 = vld [vmem:[%s12168_s1 + $0x38c] sm:$0xf]  ;;  %v6227_v13 = vld [vmem:[%s12168_s1 + $0x398] sm:$0xf0] }
 0x154   : > { %v2114_v57 = vadd.f32 %v2113_v29, %v2085_v33  ;;  %v2173_v58 = vpop.f32.mrf.mxu1  ;;  %2482 = vmatpush.bf16.msra.mxu0 %v6262_v2  ;;  %v7794_v2 = vld [vmem:[%s12168_s1 + $0x48c] sm:$0xf]  ;;  %v6230_v12 = vor.u32 %v7762_v32, %v6227_v13 }
 0x155   : > { %2428 = vmatpush.bf16.msra.mxu2 %v5942_v3  ;;  %v7758_v46 = vld [vmem:[%s12168_s1 + $0x36c] sm:$0xf] }
 0x156   : > { %v2143_v55 = vadd.f32 %v2142_v35, %v2114_v57  ;;  %v6371_v35 = vld [vmem:[%s12168_s1 + $0x4b8] sm:$0xf0] }
 0x157   : > { %v6374_v27 = vor.u32 %v7798_v14, %v6371_v35  ;;  %v6211_v14 = vld [vmem:[%s12168_s1 + $0x378] sm:$0xf0] }
 0x158   : > { %v2172_v56 = vadd.f32 %v2171_v16, %v2143_v55  ;;  %v2086_v33 = vpop.f32.mrf.mxu2  ;;  %2483 = vmatpush.bf16.msra.mxu0 %v6246_v25  ;;  %v7722_v16 = vld [vmem:[%s12168_s1 + $0x24c] sm:$0xf]  ;;  %v6358_v55 = vor.u32 %v7794_v2, %v6355_v51  ;;  %v6195_v2 = vld [vmem:[%s12168_s1 + $0x358] sm:$0xf0] }
 0x159   : > { %v2087_v29 = vadd.f32 %v2086_v33, %v9371_v30  ;;  %2512 = vmatpush.bf16.msra.mxu1 %v6374_v27  ;;  %v6067_v30 = vld [vmem:[%s12168_s1 + $0x258] sm:$0xf0]  ;;  %v7790_v25 = vld [vmem:[%s12168_s1 + $0x46c] sm:$0xf]  ;;  %v6214_v27 = vor.u32 %v7758_v46, %v6211_v14 }
 0x15a   : > { %v6070_v57 = vor.u32 %v7722_v16, %v6067_v30  ;;  %v7686_v16 = vld [vmem:[%s12168_s1 + $0x12c] sm:$0xf] }
 0x15b   : > { %v2115_v50 = vpop.f32.mrf.mxu3  ;;  %v2147_v47 = vpop.f32.mrf.mxu0  ;;  %v7786_v51 = vld [vmem:[%s12168_s1 + $0x44c] sm:$0xf] }
 0x15c   : > { %v2116_v40 = vadd.f32 %v2115_v50, %v2087_v29  ;;  %v2176_v49 = vpop.f32.mrf.mxu1  ;;  %2457 = vmatpush.bf16.msra.mxu3 %v6070_v57  ;;  %2484 = vmatpush.bf16.msra.mxu0 %v6230_v12  ;;  %v2598_v50 = vmax.f32 %v2172_v56, 0.0  ;;  %v6051_v56 = vld [vmem:[%s12168_s1 + $0x238] sm:$0xf0] }
 0x15d   : > { %2320 = vmatmul.bf16.gmra.mxu2 %v8689_v53  ;;  %2513 = vmatpush.bf16.msra.mxu1 %v6358_v55  ;;  %v6323_v12 = vld [vmem:[%s12168_s1 + $0x458] sm:$0xf0] }
 0x15e   : > { %v2145_v24 = vadd.f32 %v2144_v5, %v2116_v40  ;;  %6560 = vmatmul.msk.bf16.gmra.mxu0 %vm1772_vm0, %v8898_v17  ;;  %v6339_v5 = vld [vmem:[%s12168_s1 + $0x478] sm:$0xf0]  ;;  %v6326_v46 = vor.u32 %v7786_v51, %v6323_v12 }
 0x15f   : > { %2407 = vmatmul.bf16.gmra.mxu1 %v8486_v63  ;;  %v6342_v29 = vor.u32 %v7790_v25, %v6339_v5  ;;  %v7718_v63 = vld [vmem:[%s12168_s1 + $0x22c] sm:$0xf]  ;;  %v6179_v5 = vld [vmem:[%s12168_s1 + $0x338] sm:$0xf0] }
 0x160   : > { %2349 = vmatmul.bf16.gmra.mxu3 %v8691_v54  ;;  %v2174_v35 = vadd.f32 %v2173_v58, %v2145_v24  ;;  %v2089_v33 = vpop.f32.mrf.mxu2  ;;  %v5923_v58 = vld [vmem:[%s12168_s1 + $0x138] sm:$0xf0]  ;;  %2485 = vmatpush.bf16.msra.mxu0 %v6214_v27  ;;  %v6054_v13 = vor.u32 %v7718_v63, %v6051_v56  ;;  %v7750_v25 = vld [vmem:[%s12168_s1 + $0x32c] sm:$0xf] }
 0x161   : > { %v2090_v26 = vadd.f32 %v2089_v33, %v9412_v11  ;;  %v5926_v30 = vor.u32 %v7686_v16, %v5923_v58  ;;  %v7754_v11 = vld [vmem:[%s12168_s1 + $0x34c] sm:$0xf]  ;;  %2514 = vmatpush.bf16.msra.mxu1 %v6342_v29  ;;  %v6307_v27 = vld [vmem:[%s12168_s1 + $0x438] sm:$0xf0] }
 0x162   : > { %v2602_v31 = vmax.f32 %v2174_v35, 0.0  ;;  %v6198_v24 = vor.u32 %v7754_v11, %v6195_v2  ;;  %2458 = vmatpush.bf16.msra.mxu3 %v6054_v13  ;;  %v7782_v35 = vld [vmem:[%s12168_s1 + $0x42c] sm:$0xf]  ;;  %v5907_v16 = vld [vmem:[%s12168_s1 + $0x118] sm:$0xf0] }
 0x163   : > { %v2118_v3 = vpop.f32.mrf.mxu3  ;;  %v2149_v57 = vpop.f32.mrf.mxu0  ;;  %2429 = vmatpush.bf16.msra.mxu2 %v5926_v30  ;;  %v6035_v30 = vld [vmem:[%s12168_s1 + $0x218] sm:$0xf0]  ;;  %v7778_v13 = vld [vmem:[%s12168_s1 + $0x40c] sm:$0xf] }
 0x164   : > { %v9620_v32 = vpack.c.bf16 %v2602_v31, %v2598_v50  ;;  %v2119_v40 = vadd.f32 %v2118_v3, %v2090_v26  ;;  %v2178_v55 = vpop.f32.mrf.mxu1  ;;  %2486 = vmatpush.bf16.msra.mxu0 %v6198_v24  ;;  %v6310_v50 = vor.u32 %v7782_v35, %v6307_v27  ;;  %v7682_v3 = vld [vmem:[%s12168_s1 + $0x10c] sm:$0xf]  ;;  %v6291_v2 = vld [vmem:[%s12168_s1 + $0x418] sm:$0xf0] }
 0x165   : > { %2515 = vmatpush.bf16.msra.mxu1 %v6326_v46  ;;  %v5910_v58 = vor.u32 %v7682_v3, %v5907_v16  ;;  %v6294_v24 = vor.u32 %v7778_v13, %v6291_v2 }
 0x166   : > { %v2148_v14 = vadd.f32 %v2147_v47, %v2119_v40  ;;  %v6182_v47 = vor.u32 %v7750_v25, %v6179_v5  ;;  %v6163_v40 = vld [vmem:[%s12168_s1 + $0x318] sm:$0xf0] }
 0x167   : > { %2430 = vmatpush.bf16.msra.mxu2 %v5910_v58  ;;  %v7834_v58 = vld [vmem:[%s12168_s1 + $0x5cc] sm:$0xf] }
 0x168   : > { %v2177_v33 = vadd.f32 %v2176_v49, %v2148_v14  ;;  %v2091_v29 = vpop.f32.mrf.mxu2  ;;  %v7714_v49 = vld [vmem:[%s12168_s1 + $0x20c] sm:$0xf]  ;;  %2487 = vmatpush.bf16.msra.mxu0 %v6182_v47 }
 0x169   : > { %v2092_v31 = vadd.f32 %v2091_v29, %v9433_v38  ;;  %v7746_v38 = vld [vmem:[%s12168_s1 + $0x30c] sm:$0xf]  ;;  %v6038_v11 = vor.u32 %v7714_v49, %v6035_v30  ;;  %2516 = vmatpush.bf16.msra.mxu1 %v6310_v50  ;;  %v6531_v29 = vld [vmem:[%s12168_s1 + $0x5f8] sm:$0xf0] }
 0x16a   : > { %v6166_v12 = vor.u32 %v7746_v38, %v6163_v40  ;;  %v2606_v5 = vmax.f32 %v2177_v33, 0.0  ;;  %v6515_v49 = vld [vmem:[%s12168_s1 + $0x5d8] sm:$0xf0] }
 0x16b   : > { %v2120_v26 = vpop.f32.mrf.mxu3  ;;  %v2152_v56 = vpop.f32.mrf.mxu0  ;;  %2459 = vmatpush.bf16.msra.mxu3 %v6038_v11  ;;  %v6518_v30 = vor.u32 %v7834_v58, %v6515_v49 }
 0x16c   : > { %v2121_v63 = vadd.f32 %v2120_v26, %v2092_v31  ;;  %v2181_v51 = vpop.f32.mrf.mxu1  ;;  %2488 = vmatpush.bf16.msra.mxu0 %v6166_v12 }
 0x16d   : > { %2325 = vmatmul.bf16.gmra.mxu2 %v8769_v43  ;;  %2517 = vmatpush.bf16.msra.mxu1 %v6294_v24 }
 0x16e   : > { %v2150_v46 = vadd.f32 %v2149_v57, %v2121_v63  ;;  %6561 = vmatmul.msk.bf16.gmra.mxu0 %vm1772_vm0, %v8963_v59  ;;  %v7838_v57 = vld [vmem:[%s12168_s1 + $0x5ec] sm:$0xf] }
 0x16f   : > { %2412 = vmatmul.bf16.gmra.mxu1 %v8372_v4  ;;  %v6534_v50 = vor.u32 %v7838_v57, %v6531_v29  ;;  %v7842_v4 = vld [vmem:[%s12168_s1 + $0x60c] sm:$0xf] }
 0x170   : > { %2354 = vmatmul.bf16.gmra.mxu3 %v8771_v44  ;;  %v2179_v14 = vadd.f32 %v2178_v55, %v2150_v46  ;;  %v2094_v25 = vpop.f32.mrf.mxu2  ;;  %v6547_v55 = vld [vmem:[%s12168_s1 + $0x618] sm:$0xf0] }
 0x171   : > { %v2095_v27 = vadd.f32 %v2094_v25, %v9450_v28  ;;  %v6550_v31 = vor.u32 %v7842_v4, %v6547_v55  ;;  %2539 = vmatpush.bf16.msrb.mxu2 %v6534_v50  ;;  %v7826_v4 = vld [vmem:[%s12168_s1 + $0x58c] sm:$0xf]  ;;  %v6483_v55 = vld [vmem:[%s12168_s1 + $0x598] sm:$0xf0] }
 0x172   : > { %v2610_v35 = vmax.f32 %v2179_v14, 0.0 }
 0x173   : > { %v2123_v47 = vpop.f32.mrf.mxu3  ;;  %v2154_v28 = vpop.f32.mrf.mxu0  ;;  %2575 = vmatpush.bf16.msrb.mxu3 %v6550_v31 }
 0x174   : > { %v2124_v33 = vadd.f32 %v2123_v47, %v2095_v27  ;;  %v9686_v26 = vpack.c.bf16 %v2610_v35, %v2606_v5  ;;  %v2183_v3 = vpop.f32.mrf.mxu1 }
 0x175   : > { %2540 = vmatpush.bf16.msrb.mxu2 %v6518_v30  ;;  %v9721_v30 = vld [vmem:[%s12169_s2] sm:$0xf] }
 0x176   : > { %v2153_v16 = vadd.f32 %v2152_v56, %v2124_v33  ;;  %v6486_v33 = vor.u32 %v7826_v4, %v6483_v55 }
 0x178   : > { %v2182_v38 = vadd.f32 %v2181_v51, %v2153_v16  ;;  %v2096_v63 = vpop.f32.mrf.mxu2  ;;  %v7830_v51 = vld [vmem:[%s12168_s1 + $0x5ac] sm:$0xf] }
 0x179   : > { %v2097_v11 = vadd.f32 %v2096_v63, %v9471_v45  ;;  %v6499_v45 = vld [vmem:[%s12168_s1 + $0x5b8] sm:$0xf0] }
 0x17a   : > { %v6502_v14 = vor.u32 %v7830_v51, %v6499_v45  ;;  %v2614_v25 = vmax.f32 %v2182_v38, 0.0  ;;  %v9724_v38 = vperm.slane %v9721_v30, 2 }
 0x17b   : > { %v2125_v40 = vpop.f32.mrf.mxu3  ;;  %v2157_v2 = vpop.f32.mrf.mxu0 }
 0x17c   : > { %v2126_v13 = vadd.f32 %v2125_v40, %v2097_v11  ;;  %v2186_v12 = vpop.f32.mrf.mxu1  ;;  %2541 = vmatpush.bf16.msrb.mxu2 %v6502_v14  ;;  %v7875_v11 = vld [vmem:[%s12170_s3 + $0xec] sm:$0xf0]  ;;  %v6809_v40 = vld [vmem:[%s12170_s3 + $0x1e0] sm:$0xf] }
 0x17d   : > { %2330 = vmatmul.bf16.gmra.mxu2 %v8813_v21 }
 0x17e   : > { %v2155_v56 = vadd.f32 %v2154_v28, %v2126_v13  ;;  %6562 = vmatmul.msk.bf16.gmra.mxu0 %vm1772_vm0, %v9018_v61 }
 0x17f   : > { %2417 = vmatmul.bf16.gmra.mxu1 %v8488_v0 }
 0x180   : > { %2359 = vmatmul.bf16.gmra.mxu3 %v8815_v22  ;;  %v2184_v24 = vadd.f32 %v2183_v3, %v2155_v56  ;;  %v2099_v46 = vpop.f32.mrf.mxu2  ;;  %2542 = vmatpush.bf16.msrb.mxu2 %v6486_v33  ;;  %v6467_v56 = vld [vmem:[%s12168_s1 + $0x578] sm:$0xf0]  ;;  %v7818_v33 = vld [vmem:[%s12168_s1 + $0x54c] sm:$0xf] }
 0x181   : > { %v2100_v35 = vadd.f32 %v2099_v46, %v9488_v34 }
 0x182   : > { %v2618_v5 = vmax.f32 %v2184_v24, 0.0 }
 0x183   : > { %v2128_v27 = vpop.f32.mrf.mxu3  ;;  %v2159_v57 = vpop.f32.mrf.mxu0 }
 0x184   : > { %v2129_v47 = vadd.f32 %v2128_v27, %v2100_v35  ;;  %v9707_v29 = vpack.c.bf16 %v2618_v5, %v2614_v25  ;;  %v2188_v0 = vpop.f32.mrf.mxu1  ;;  %v7871_v25 = vld [vmem:[%s12170_s3 + $0xcc] sm:$0xf0]  ;;  %v6793_v35 = vld [vmem:[%s12170_s3 + $0x1c0] sm:$0xf] }
 0x185   : > { %v7903_v27 = vld [vmem:[%s12170_s3 + $0x1cc] sm:$0xf0] }
 0x186   : > { %v2158_v50 = vadd.f32 %v2157_v2, %v2129_v47 }
 0x188   : > { %v2187_v28 = vadd.f32 %v2186_v12, %v2158_v50  ;;  %v2101_v31 = vpop.f32.mrf.mxu2  ;;  %v7822_v12 = vld [vmem:[%s12168_s1 + $0x56c] sm:$0xf] }
 0x189   : > { %v2102_v34 = vadd.f32 %v2101_v31, %v9522_v18  ;;  %v6681_v18 = vld [vmem:[%s12170_s3 + $0xe0] sm:$0xf]  ;;  %v6470_v51 = vor.u32 %v7822_v12, %v6467_v56 }
 0x18a   : > { %v6682_v13 = vor.u32 %v7875_v11, %v6681_v18  ;;  %v6649_v31 = vld [vmem:[%s12170_s3 + $0xa0] sm:$0xf] }
 0x18b   : > { %v2130_v3 = vpop.f32.mrf.mxu3  ;;  %v2258_v58 = vpop.f32.mrf.mxu0  ;;  %2543 = vmatpush.bf16.msrb.mxu2 %v6470_v51  ;;  %v6761_v12 = vld [vmem:[%s12170_s3 + $0x180] sm:$0xf] }
 0x18c   : > { %v2131_v16 = vadd.f32 %v2130_v3, %v2102_v34  ;;  %v9716_v49 = vpop.f32.mrf.mxu1  ;;  %3437 = vmatpush.bf16.msrb.mxu0 %v6682_v13  ;;  %v7867_v3 = vld [vmem:[%s12170_s3 + $0xac] sm:$0xf0] }
 0x18d   : > { %2431 = vmatmul.bf16.vlgmr.msra.gmra.mxu2 %v8383_v8  ;;  %v7907_v8 = vld [vmem:[%s12170_s3 + $0x1ec] sm:$0xf0] }
 0x18e   : > { %v2160_v63 = vadd.f32 %v2159_v57, %v2131_v16  ;;  %2489 = vmatmul.bf16.vlgmr.msra.gmra.mxu0 %v8595_v62  ;;  %v6810_v24 = vor.u32 %v7907_v8, %v6809_v40  ;;  %v2622_v62 = vmax.f32 %v2187_v28, 0.0  ;;  %v6451_v28 = vld [vmem:[%s12168_s1 + $0x558] sm:$0xf0]  ;;  %v6777_v16 = vld [vmem:[%s12170_s3 + $0x1a0] sm:$0xf] }
 0x18f   : > { %2518 = vmatmul.bf16.vlgmr.msra.gmra.mxu1 %v8597_v1  ;;  %v6665_v1 = vld [vmem:[%s12170_s3 + $0xc0] sm:$0xf]  ;;  %v6454_v34 = vor.u32 %v7818_v33, %v6451_v28  ;;  %v7855_v33 = vld [vmem:[%s12170_s3 + $0x4c] sm:$0xf0] }
 0x190   : > { %2460 = vmatmul.bf16.vlgmr.msra.gmra.mxu3 %v8593_v60  ;;  %v2189_v2 = vadd.f32 %v2188_v0, %v2160_v63  ;;  %v2200_v60 = vpop.f32.mrf.mxu2  ;;  %3466 = vmatpush.bf16.msrb.mxu1 %v6810_v24  ;;  %v6666_v5 = vor.u32 %v7871_v25, %v6665_v1  ;;  %v6794_v0 = vor.u32 %v7903_v27, %v6793_v35  ;;  %v6633_v8 = vld [vmem:[%s12170_s3 + $0x80] sm:$0xf]  ;;  %v7895_v24 = vld [vmem:[%s12170_s3 + $0x18c] sm:$0xf0]  ;;  %v6435_v35 = vld [vmem:[%s12168_s1 + $0x538] sm:$0xf0] }
 0x191   : > { %v2201_v46 = vadd.f32 %v2200_v60, %v9724_v38  ;;  %v6650_v63 = vor.u32 %v7867_v3, %v6649_v31  ;;  %2544 = vmatpush.bf16.msrb.mxu2 %v6454_v34  ;;  %v6745_v1 = vld [vmem:[%s12170_s3 + $0x160] sm:$0xf]  ;;  %v7887_v34 = vld [vmem:[%s12170_s3 + $0x14c] sm:$0xf0] }
 0x192   : > { %v2626_v45 = vmax.f32 %v2189_v2, 0.0  ;;  %3438 = vmatpush.bf16.msrb.mxu0 %v6666_v5  ;;  %v7863_v2 = vld [vmem:[%s12170_s3 + $0x8c] sm:$0xf0]  ;;  %v7814_v5 = vld [vmem:[%s12168_s1 + $0x52c] sm:$0xf] }
 0x193   : > { %v2229_v14 = vpop.f32.mrf.mxu3  ;;  %v9761_v57 = vpop.f32.mrf.mxu0  ;;  %v6634_v56 = vor.u32 %v7863_v2, %v6633_v8  ;;  %v6729_v28 = vld [vmem:[%s12170_s3 + $0x140] sm:$0xf]  ;;  %v7851_v2 = vld [vmem:[%s12170_s3 + $0x2c] sm:$0xf0] }
 0x194   : > { %v2230_v47 = vadd.f32 %v2229_v14, %v2201_v46  ;;  %v9763_v50 = vpack.c.bf16 %v2626_v45, %v2622_v62  ;;  %v9765_v4 = vpop.f32.mrf.mxu1  ;;  %3467 = vmatpush.bf16.msrb.mxu1 %v6794_v0  ;;  %v6762_v45 = vor.u32 %v7895_v24, %v6761_v12  ;;  %v6617_v46 = vld [vmem:[%s12170_s3 + $0x60] sm:$0xf]  ;;  %v7859_v14 = vld [vmem:[%s12170_s3 + $0x6c] sm:$0xf0] }
 0x195   : > { %v6618_v25 = vor.u32 %v7859_v14, %v6617_v46  ;;  %v6713_v12 = vld [vmem:[%s12170_s3 + $0x120] sm:$0xf] }
 0x196   : > { %v9767_v55 = vadd.f32 %v2258_v58, %v2230_v47  ;;  %v7899_v58 = vld [vmem:[%s12170_s3 + $0x1ac] sm:$0xf0]  ;;  %3439 = vmatpush.bf16.msrb.mxu0 %v6650_v63  ;;  %v6730_v63 = vor.u32 %v7887_v34, %v6729_v28 }
 0x197   : > { %v6778_v18 = vor.u32 %v7899_v58, %v6777_v16 }
 0x198   : > { %v2202_v11 = vpop.f32.mrf.mxu2 }
 0x199   : > { %v2203_v40 = vadd.f32 %v2202_v11, %v9724_v38  ;;  %3468 = vmatpush.bf16.msrb.mxu1 %v6778_v18  ;;  %v7810_v11 = vld [vmem:[%s12168_s1 + $0x50c] sm:$0xf] }
 0x19a   : > { %3440 = vmatpush.bf16.msrb.mxu0 %v6634_v56  ;;  %v7883_v56 = vld [vmem:[%s12170_s3 + $0x12c] sm:$0xf0] }
 0x19b   : > { %v2231_v13 = vpop.f32.mrf.mxu3  ;;  %v2263_v51 = vpop.f32.mrf.mxu0 }
 0x19c   : > { %v9800_v60 = vadd.f32 %v2231_v13, %v2203_v40  ;;  %v9802_v62 = vpop.f32.mrf.mxu1  ;;  %v6419_v40 = vld [vmem:[%s12168_s1 + $0x518] sm:$0xf0]  ;;  %v6585_v13 = vld [vmem:[%s12170_s3 + $0x20] sm:$0xf] }
 0x19d   : > { %2436 = vmatmul.bf16.gmra.mxu2 %v8499_v6  ;;  %v7891_v6 = vld [vmem:[%s12170_s3 + $0x16c] sm:$0xf0]  ;;  %3469 = vmatpush.bf16.msrb.mxu1 %v6762_v45  ;;  %v6422_v8 = vor.u32 %v7810_v11, %v6419_v40  ;;  %v6586_v24 = vor.u32 %v7851_v2, %v6585_v13  ;;  %v6714_v45 = vor.u32 %v7883_v56, %v6713_v12 }
 0x19e   : > { %2494 = vmatmul.bf16.gmra.mxu0 %v8687_v52  ;;  %v6746_v47 = vor.u32 %v7891_v6, %v6745_v1  ;;  %v6569_v1 = vld [vmem:[%s12170_s3] sm:$0xf] }
 0x19f   : > { %2523 = vmatmul.bf16.gmra.mxu1 %v8689_v53  ;;  %3441 = vmatpush.bf16.msrb.mxu0 %v6618_v25  ;;  %v6601_v53 = vld [vmem:[%s12170_s3 + $0x40] sm:$0xf]  ;;  %v7847_v25 = vld [vmem:[%s12170_s3 + $0xc] sm:$0xf0] }
 0x1a0   : > { %2465 = vmatmul.bf16.gmra.mxu3 %v8679_v48  ;;  %v2205_v27 = vpop.f32.mrf.mxu2  ;;  %v6438_v48 = vor.u32 %v7814_v5, %v6435_v35  ;;  %v6602_v31 = vor.u32 %v7855_v33, %v6601_v53  ;;  %v6697_v6 = vld [vmem:[%s12170_s3 + $0x100] sm:$0xf]  ;;  %v6570_v5 = vor.u32 %v7847_v25, %v6569_v1  ;;  %v7879_v35 = vld [vmem:[%s12170_s3 + $0x10c] sm:$0xf0]  ;;  %v7905_v25 = vld [vmem:[%s12170_s3 + $0x1e4] sm:$0xf] }
 0x1a1   : > { %v2206_v52 = vadd.f32 %v2205_v27, %v9724_v38  ;;  %3470 = vmatpush.bf16.msrb.mxu1 %v6746_v47 }
 0x1a2   : > { %2545 = vmatpush.bf16.msrb.mxu2 %v6438_v48 }
 0x1a3   : > { %v2234_v0 = vpop.f32.mrf.mxu3  ;;  %v9839_v16 = vpop.f32.mrf.mxu0  ;;  %3442 = vmatpush.bf16.msrb.mxu0 %v6602_v31 }
 0x1a4   : > { %v2235_v3 = vadd.f32 %v2234_v0, %v2206_v52  ;;  %v9841_v58 = vpop.f32.mrf.mxu1  ;;  %v6698_v52 = vor.u32 %v7879_v35, %v6697_v6  ;;  %v6811_v6 = vld [vmem:[%s12170_s3 + $0x1f0] sm:$0xf0] }
 0x1a5   : > { %3471 = vmatpush.bf16.msrb.mxu1 %v6730_v63  ;;  %v6814_v35 = vor.u32 %v7905_v25, %v6811_v6 }
 0x1a6   : > { %v9843_v18 = vadd.f32 %v2263_v51, %v2235_v3  ;;  %2546 = vmatpush.bf16.msrb.mxu2 %v6422_v8 }
 0x1a7   : > { %3443 = vmatpush.bf16.msrb.mxu0 %v6586_v24 }
 0x1a8   : > { %v2207_v51 = vpop.f32.mrf.mxu2 }
 0x1a9   : > { %v2208_v46 = vadd.f32 %v2207_v51, %v9724_v38  ;;  %3472 = vmatpush.bf16.msrb.mxu1 %v6714_v45 }
 0x1ab   : > { %v2236_v14 = vpop.f32.mrf.mxu3  ;;  %v2268_v48 = vpop.f32.mrf.mxu0  ;;  %3444 = vmatpush.bf16.msrb.mxu0 %v6570_v5 }
 0x1ac   : > { %v9876_v27 = vadd.f32 %v2236_v14, %v2208_v46  ;;  %v9878_v47 = vpop.f32.mrf.mxu1  ;;  %v7939_v14 = vld [vmem:[%s12170_s3 + $0x2ec] sm:$0xf0] }
 0x1ad   : > { %2441 = vmatmul.bf16.gmra.mxu2 %v8385_v9  ;;  %3473 = vmatpush.bf16.msrb.mxu1 %v6698_v52 }
 0x1ae   : > { %2499 = vmatmul.bf16.gmra.mxu0 %v8767_v42 }
 0x1af   : > { %2528 = vmatmul.bf16.gmra.mxu1 %v8769_v43 }
 0x1b0   : > { %2470 = vmatmul.bf16.gmra.mxu3 %v8759_v39  ;;  %v2210_v0 = vpop.f32.mrf.mxu2 }
 0x1b1   : > { %v2211_v53 = vadd.f32 %v2210_v0, %v9724_v38  ;;  %3582 = vmatpush.bf16.msra.mxu1 %v6814_v35  ;;  %v6921_v0 = vld [vmem:[%s12170_s3 + $0x2c0] sm:$0xf] }
 0x1b2   : > { %v6889_v35 = vld [vmem:[%s12170_s3 + $0x280] sm:$0xf] }
 0x1b3   : > { %v2239_v33 = vpop.f32.mrf.mxu3  ;;  %v9885_v31 = vpop.f32.mrf.mxu0 }
 0x1b4   : > { %v2240_v28 = vadd.f32 %v2239_v33, %v2211_v53  ;;  %v9887_v34 = vpop.f32.mrf.mxu1  ;;  %v7935_v53 = vld [vmem:[%s12170_s3 + $0x2cc] sm:$0xf0]  ;;  %v7869_v33 = vld [vmem:[%s12170_s3 + $0xc4] sm:$0xf] }
 0x1b6   : > { %v9889_v3 = vadd.f32 %v2268_v48, %v2240_v28  ;;  %v2288_v48 = vadd.f32 %v9716_v49, %v9767_v55  ;;  %v6922_v28 = vor.u32 %v7935_v53, %v6921_v0  ;;  %v6667_v49 = vld [vmem:[%s12170_s3 + $0xd0] sm:$0xf0]  ;;  %v7901_v55 = vld [vmem:[%s12170_s3 + $0x1c4] sm:$0xf] }
 0x1b7   : > { %v7893_v0 = vld [vmem:[%s12170_s3 + $0x184] sm:$0xf]  ;;  %v6763_v53 = vld [vmem:[%s12170_s3 + $0x190] sm:$0xf0] }
 0x1b8   : > { %v2212_v9 = vpop.f32.mrf.mxu2 }
 0x1b9   : > { %v2213_v63 = vadd.f32 %v2212_v9, %v9724_v38  ;;  %v6795_v9 = vld [vmem:[%s12170_s3 + $0x1d0] sm:$0xf0] }
 0x1bb   : > { %v2241_v39 = vpop.f32.mrf.mxu3  ;;  %v2273_v42 = vpop.f32.mrf.mxu0 }
 0x1bc   : > { %v9892_v11 = vadd.f32 %v2241_v39, %v2213_v63  ;;  %v9894_v43 = vpop.f32.mrf.mxu1  ;;  %v2261_v63 = vadd.f32 %v9761_v57, %v9800_v60  ;;  %v7865_v57 = vld [vmem:[%s12170_s3 + $0xa4] sm:$0xf] }
 0x1bd   : > { %2446 = vmatmul.bf16.gmra.mxu2 %v8501_v7 }
 0x1be   : > { %2504 = vmatmul.bf16.gmra.mxu0 %v8811_v20 }
 0x1bf   : > { %2533 = vmatmul.bf16.gmra.mxu1 %v8813_v21  ;;  %v6937_v21 = vld [vmem:[%s12170_s3 + $0x2e0] sm:$0xf] }
 0x1c0   : > { %2475 = vmatmul.bf16.gmra.mxu3 %v8809_v19  ;;  %v2215_v40 = vpop.f32.mrf.mxu2  ;;  %v6938_v1 = vor.u32 %v7939_v14, %v6937_v21  ;;  %v6779_v21 = vld [vmem:[%s12170_s3 + $0x1b0] sm:$0xf0] }
 0x1c1   : > { %v2216_v13 = vadd.f32 %v2215_v40, %v9724_v38  ;;  %v6670_v40 = vor.u32 %v7869_v33, %v6667_v49 }
 0x1c2   : > { %3495 = vmatpush.bf16.msra.mxu2 %v6938_v1 }
 0x1c3   : > { %v2244_v8 = vpop.f32.mrf.mxu3  ;;  %v9901_v12 = vpop.f32.mrf.mxu0 }
 0x1c4   : > { %v2245_v2 = vadd.f32 %v2244_v8, %v2216_v13  ;;  %v9903_v56 = vpop.f32.mrf.mxu1  ;;  %v6798_v13 = vor.u32 %v7901_v55, %v6795_v9 }
 0x1c6   : > { %v9905_v24 = vadd.f32 %v2273_v42, %v2245_v2  ;;  %3496 = vmatpush.bf16.msra.mxu2 %v6922_v28  ;;  %3583 = vmatpush.bf16.msra.mxu1 %v6798_v13  ;;  %v6905_v2 = vld [vmem:[%s12170_s3 + $0x2a0] sm:$0xf]  ;;  %v7857_v13 = vld [vmem:[%s12170_s3 + $0x64] sm:$0xf] }
 0x1c8   : > { %v2217_v51 = vpop.f32.mrf.mxu2 }
 0x1c9   : > { %v2218_v7 = vadd.f32 %v2217_v51, %v9724_v38  ;;  %v7873_v38 = vld [vmem:[%s12170_s3 + $0xe4] sm:$0xf]  ;;  %v7931_v51 = vld [vmem:[%s12170_s3 + $0x2ac] sm:$0xf0] }
 0x1ca   : > { %v6906_v60 = vor.u32 %v7931_v51, %v6905_v2  ;;  %v7889_v2 = vld [vmem:[%s12170_s3 + $0x164] sm:$0xf]  ;;  %v6747_v51 = vld [vmem:[%s12170_s3 + $0x170] sm:$0xf0] }
 0x1cb   : > { %v2246_v45 = vpop.f32.mrf.mxu3  ;;  %v2374_v20 = vpop.f32.mrf.mxu0 }
 0x1cc   : > { %v9908_v19 = vadd.f32 %v2246_v45, %v2218_v7  ;;  %v9910_v46 = vpop.f32.mrf.mxu1  ;;  %v6651_v7 = vld [vmem:[%s12170_s3 + $0xb0] sm:$0xf0]  ;;  %v7897_v45 = vld [vmem:[%s12170_s3 + $0x1a4] sm:$0xf]  ;;  %3497 = vmatpush.bf16.msra.mxu2 %v6906_v60 }
 0x1cd   : > { %2547 = vmatmul.bf16.vlgmr.msrb.gmra.mxu2 %v8605_v10  ;;  %v6683_v10 = vld [vmem:[%s12170_s3 + $0xf0] sm:$0xf0]  ;;  %v6654_v1 = vor.u32 %v7865_v57, %v6651_v7 }
 0x1ce   : > { %3445 = vmatmul.bf16.vlgmr.msrb.gmra.mxu0 %v9360_v36  ;;  %v6686_v5 = vor.u32 %v7873_v38, %v6683_v10  ;;  %v2290_v38 = vadd.f32 %v9765_v4, %v2261_v63  ;;  %v6782_v10 = vor.u32 %v7897_v45, %v6779_v21  ;;  %v7861_v4 = vld [vmem:[%s12170_s3 + $0x84] sm:$0xf]  ;;  %v6766_v63 = vor.u32 %v7893_v0, %v6763_v53  ;;  %v6841_v53 = vld [vmem:[%s12170_s3 + $0x220] sm:$0xf] }
 0x1cf   : > { %3474 = vmatmul.bf16.vlgmr.msrb.gmra.mxu1 %v9620_v32  ;;  %v6750_v45 = vor.u32 %v7889_v2, %v6747_v51  ;;  %v6825_v51 = vld [vmem:[%s12170_s3 + $0x200] sm:$0xf] }
 0x1d0   : > { %6563 = vmatmul.msk.bf16.vlgmr.msrb.gmra.mxu3 %vm1772_vm0, %v8847_v37  ;;  %v2316_v37 = vpop.f32.mrf.mxu2  ;;  %3553 = vmatpush.bf16.msra.mxu0 %v6686_v5 }
 0x1d1   : > { %v2317_v39 = vadd.f32 %v2316_v37, %v2288_v48  ;;  %3584 = vmatpush.bf16.msra.mxu1 %v6782_v10  ;;  %v7927_v37 = vld [vmem:[%s12170_s3 + $0x28c] sm:$0xf0] }
 0x1d2   : > { %v6890_v48 = vor.u32 %v7927_v37, %v6889_v35  ;;  %v7919_v10 = vld [vmem:[%s12170_s3 + $0x24c] sm:$0xf0]  ;;  %v2266_v35 = vadd.f32 %v9839_v16, %v9876_v27  ;;  %v7849_v16 = vld [vmem:[%s12170_s3 + $0x24] sm:$0xf] }
 0x1d3   : > { %v2345_v52 = vpop.f32.mrf.mxu3  ;;  %v2376_v42 = vpop.f32.mrf.mxu0 }
 0x1d4   : > { %v9957_v8 = vpop.f32.mrf.mxu1  ;;  %3554 = vmatpush.bf16.msra.mxu0 %v6670_v40  ;;  %v2346_v14 = vadd.f32 %v2345_v52, %v2317_v39  ;;  %v6635_v52 = vld [vmem:[%s12170_s3 + $0x90] sm:$0xf0]  ;;  %3498 = vmatpush.bf16.msra.mxu2 %v6890_v48  ;;  %v6873_v40 = vld [vmem:[%s12170_s3 + $0x260] sm:$0xf] }
 0x1d5   : > { %v6638_v55 = vor.u32 %v7861_v4, %v6635_v52  ;;  %3585 = vmatpush.bf16.msra.mxu1 %v6766_v63  ;;  %v6715_v63 = vld [vmem:[%s12170_s3 + $0x130] sm:$0xf0] }
 0x1d6   : > { %v2375_v33 = vadd.f32 %v2374_v20, %v2346_v14  ;;  %v7923_v20 = vld [vmem:[%s12170_s3 + $0x26c] sm:$0xf0]  ;;  %v2293_v14 = vadd.f32 %v9802_v62, %v9843_v18  ;;  %v7885_v62 = vld [vmem:[%s12170_s3 + $0x144] sm:$0xf]  ;;  %v6731_v18 = vld [vmem:[%s12170_s3 + $0x150] sm:$0xf0] }
 0x1d7   : > { %v6734_v0 = vor.u32 %v7885_v62, %v6731_v18 }
 0x1d8   : > { %v2318_v25 = vpop.f32.mrf.mxu2  ;;  %3555 = vmatpush.bf16.msra.mxu0 %v6654_v1  ;;  %v2599_v57 = vmax.f32 %v2375_v33, 0.0  ;;  %v6857_v1 = vld [vmem:[%s12170_s3 + $0x240] sm:$0xf]  ;;  %v7915_v33 = vld [vmem:[%s12170_s3 + $0x22c] sm:$0xf0] }
 0x1d9   : > { %v2319_v6 = vadd.f32 %v2318_v25, %v2290_v38  ;;  %v7853_v25 = vld [vmem:[%s12170_s3 + $0x44] sm:$0xf]  ;;  %3586 = vmatpush.bf16.msra.mxu1 %v6750_v45  ;;  %v6842_v27 = vor.u32 %v7915_v33, %v6841_v53  ;;  %v6699_v45 = vld [vmem:[%s12170_s3 + $0x110] sm:$0xf0] }
 0x1db   : > { %v2347_v5 = vpop.f32.mrf.mxu3  ;;  %v9996_v49 = vpop.f32.mrf.mxu0 }
 0x1dc   : > { %v2348_v28 = vadd.f32 %v2347_v5, %v2319_v6  ;;  %v9998_v9 = vpop.f32.mrf.mxu1  ;;  %3556 = vmatpush.bf16.msra.mxu0 %v6638_v55  ;;  %v6858_v6 = vor.u32 %v7919_v10, %v6857_v1  ;;  %v6603_v5 = vld [vmem:[%s12170_s3 + $0x50] sm:$0xf0]  ;;  %v7881_v55 = vld [vmem:[%s12170_s3 + $0x124] sm:$0xf] }
 0x1dd   : > { %2552 = vmatmul.bf16.gmra.mxu2 %v8691_v54  ;;  %v6619_v54 = vld [vmem:[%s12170_s3 + $0x70] sm:$0xf0]  ;;  %v6606_v48 = vor.u32 %v7853_v25, %v6603_v5  ;;  %3587 = vmatpush.bf16.msra.mxu1 %v6734_v0 }
 0x1de   : > { %v2377_v39 = vadd.f32 %v2376_v42, %v2348_v28  ;;  %3450 = vmatmul.bf16.gmra.mxu0 %v9428_v15  ;;  %v6874_v42 = vor.u32 %v7923_v20, %v6873_v40  ;;  %v6587_v28 = vld [vmem:[%s12170_s3 + $0x30] sm:$0xf0]  ;;  %v2295_v40 = vadd.f32 %v9841_v58, %v2266_v35  ;;  %v7845_v58 = vld [vmem:[%s12170_s3 + $0x4] sm:$0xf] }
 0x1df   : > { %3479 = vmatmul.bf16.gmra.mxu1 %v9686_v26  ;;  %v6590_v20 = vor.u32 %v7849_v16, %v6587_v28 }
 0x1e0   : > { %6564 = vmatmul.msk.bf16.gmra.mxu3 %vm1772_vm0, %v8898_v17  ;;  %v2603_v60 = vmax.f32 %v2377_v39, 0.0  ;;  %v6622_v17 = vor.u32 %v7857_v13, %v6619_v54  ;;  %v2321_v7 = vpop.f32.mrf.mxu2  ;;  %3499 = vmatpush.bf16.msra.mxu2 %v6874_v42  ;;  %v6718_v42 = vor.u32 %v7881_v55, %v6715_v63 }
 0x1e1   : > { %v2322_v37 = vadd.f32 %v2321_v7, %v2293_v14  ;;  %v7877_v7 = vld [vmem:[%s12170_s3 + $0x104] sm:$0xf] }
 0x1e2   : > { %v10023_v21 = vpack.c.bf16 %v2603_v60, %v2599_v57  ;;  %3557 = vmatpush.bf16.msra.mxu0 %v6622_v17  ;;  %v7911_v57 = vld [vmem:[%s12170_s3 + $0x20c] sm:$0xf0]  ;;  %v6571_v17 = vld [vmem:[%s12170_s3 + $0x10] sm:$0xf0]  ;;  %3588 = vmatpush.bf16.msra.mxu1 %v6718_v42  ;;  %v2276_v42 = vadd.f32 %v9901_v12, %v9908_v19 }
 0x1e3   : > { %v2350_v38 = vpop.f32.mrf.mxu3  ;;  %v2381_v4 = vpop.f32.mrf.mxu0  ;;  %v6826_v60 = vor.u32 %v7911_v57, %v6825_v51  ;;  %v6574_v10 = vor.u32 %v7845_v58, %v6571_v17 }
 0x1e4   : > { %v10047_v52 = vpop.f32.mrf.mxu1  ;;  %3500 = vmatpush.bf16.msra.mxu2 %v6858_v6  ;;  %v2351_v39 = vadd.f32 %v2350_v38, %v2322_v37  ;;  %v6702_v6 = vor.u32 %v7877_v7, %v6699_v45  ;;  %v2298_v37 = vadd.f32 %v9878_v47, %v9889_v3  ;;  %v2305_v58 = vadd.f32 %v9903_v56, %v2276_v42 }
 0x1e6   : > { %3558 = vmatpush.bf16.msra.mxu0 %v6606_v48  ;;  %v2380_v14 = vadd.f32 %v9996_v49, %v2351_v39  ;;  %3589 = vmatpush.bf16.msra.mxu1 %v6702_v6  ;;  %v7937_v6 = vld [vmem:[%s12170_s3 + $0x2e4] sm:$0xf] }
 0x1e8   : > { %v2323_v13 = vpop.f32.mrf.mxu2  ;;  %3501 = vmatpush.bf16.msra.mxu2 %v6842_v27  ;;  %v2607_v62 = vmax.f32 %v2380_v14, 0.0 }
 0x1e9   : > { %v2324_v54 = vadd.f32 %v2323_v13, %v2295_v40 }
 0x1ea   : > { %3559 = vmatpush.bf16.msra.mxu0 %v6590_v20  ;;  %v2303_v20 = vadd.f32 %v9894_v43, %v9905_v24 }
 0x1eb   : > { %v2352_v2 = vpop.f32.mrf.mxu3  ;;  %v2384_v1 = vpop.f32.mrf.mxu0 }
 0x1ec   : > { %v2353_v38 = vadd.f32 %v2352_v2, %v2324_v54  ;;  %v10087_v25 = vpop.f32.mrf.mxu1  ;;  %3502 = vmatpush.bf16.msra.mxu2 %v6826_v60  ;;  %v10126_v60 = vperm.slane %v9721_v30, 3  ;;  %v7049_v30 = vld [vmem:[%s12170_s3 + $0x3c0] sm:$0xf] }
 0x1ed   : > { %2557 = vmatmul.bf16.gmra.mxu2 %v8771_v44  ;;  %v2271_v44 = vadd.f32 %v9885_v31, %v9892_v11 }
 0x1ee   : > { %v2382_v5 = vadd.f32 %v2381_v4, %v2353_v38  ;;  %3560 = vmatpush.bf16.msra.mxu0 %v6574_v10  ;;  %v2404_v56 = vadd.f32 %v9910_v46, %v10126_v60  ;;  %v7967_v10 = vld [vmem:[%s12170_s3 + $0x3cc] sm:$0xf0]  ;;  %v6939_v46 = vld [vmem:[%s12170_s3 + $0x2f0] sm:$0xf0] }
 0x1ef   : > { %3455 = vmatmul.bf16.gmra.mxu0 %v9466_v41  ;;  %3484 = vmatmul.bf16.gmra.mxu1 %v9707_v29  ;;  %v2300_v33 = vadd.f32 %v9887_v34, %v2271_v44 }
 0x1f0   : > { %6565 = vmatmul.msk.bf16.gmra.mxu3 %vm1772_vm0, %v8963_v59  ;;  %v2611_v18 = vmax.f32 %v2382_v5, 0.0  ;;  %v2326_v49 = vpop.f32.mrf.mxu2  ;;  %v7050_v5 = vor.u32 %v7967_v10, %v7049_v30 }
 0x1f1   : > { %v2327_v48 = vadd.f32 %v2326_v49, %v2298_v37 }
 0x1f2   : > { %v10094_v35 = vpack.c.bf16 %v2611_v18, %v2607_v62  ;;  %v6689_v62 = vld [vmem:[%s12170_s3 + $0xe8] sm:$0xf]  ;;  %v7876_v18 = vld [vmem:[%s12170_s3 + $0xf4] sm:$0xf0] }
 0x1f3   : > { %v2355_v4 = vpop.f32.mrf.mxu3  ;;  %v2386_v0 = vpop.f32.mrf.mxu0  ;;  %v6690_v44 = vor.u32 %v7876_v18, %v6689_v62  ;;  %v7864_v18 = vld [vmem:[%s12170_s3 + $0x94] sm:$0xf0] }
 0x1f4   : > { %v10100_v59 = vpop.f32.mrf.mxu1  ;;  %v2356_v53 = vadd.f32 %v2355_v4, %v2327_v48  ;;  %v6942_v4 = vor.u32 %v7937_v6, %v6939_v46  ;;  %v6817_v48 = vld [vmem:[%s12170_s3 + $0x1e8] sm:$0xf]  ;;  %v7925_v6 = vld [vmem:[%s12170_s3 + $0x284] sm:$0xf] }
 0x1f5   : > { %3669 = vmatpush.bf16.msrb.mxu0 %v6690_v44  ;;  %v6641_v46 = vld [vmem:[%s12170_s3 + $0x88] sm:$0xf] }
 0x1f6   : > { %v2385_v55 = vadd.f32 %v2384_v1, %v2356_v53  ;;  %3611 = vmatpush.bf16.msrb.mxu2 %v6942_v4  ;;  %v6642_v44 = vor.u32 %v7864_v18, %v6641_v46  ;;  %v7001_v46 = vld [vmem:[%s12170_s3 + $0x360] sm:$0xf]  ;;  %v7913_v18 = vld [vmem:[%s12170_s3 + $0x224] sm:$0xf] }
 0x1f8   : > { %v2328_v16 = vpop.f32.mrf.mxu2  ;;  %v2615_v31 = vmax.f32 %v2385_v55, 0.0  ;;  %v7933_v55 = vld [vmem:[%s12170_s3 + $0x2c4] sm:$0xf] }
 0x1f9   : > { %v2329_v27 = vadd.f32 %v2328_v16, %v2300_v33 }
 0x1fb   : > { %v2357_v28 = vpop.f32.mrf.mxu3  ;;  %v2389_v39 = vpop.f32.mrf.mxu0 }
 0x1fc   : > { %v2358_v63 = vadd.f32 %v2357_v28, %v2329_v27  ;;  %v10103_v40 = vpop.f32.mrf.mxu1 }
 0x1fd   : > { %2562 = vmatmul.bf16.gmra.mxu2 %v8815_v22 }
 0x1fe   : > { %v2387_v47 = vadd.f32 %v2386_v0, %v2358_v63  ;;  %v7908_v0 = vld [vmem:[%s12170_s3 + $0x1f4] sm:$0xf0]  ;;  %v6923_v63 = vld [vmem:[%s12170_s3 + $0x2d0] sm:$0xf0] }
 0x1ff   : > { %3460 = vmatmul.bf16.gmra.mxu0 %v9504_v23  ;;  %3489 = vmatmul.bf16.gmra.mxu1 %v9763_v50  ;;  %v6818_v33 = vor.u32 %v7908_v0, %v6817_v48 }
 0x200   : > { %6566 = vmatmul.msk.bf16.gmra.mxu3 %vm1772_vm0, %v9018_v61  ;;  %v2619_v3 = vmax.f32 %v2387_v47, 0.0  ;;  %v2331_v34 = vpop.f32.mrf.mxu2  ;;  %v10121_v61 = vld [vmem:[%s12170_s3 + $0x3e0] sm:$0x33]  ;;  %v6926_v47 = vor.u32 %v7933_v55, %v6923_v63  ;;  %v6625_v63 = vld [vmem:[%s12170_s3 + $0x68] sm:$0xf] }
 0x201   : > { %v2332_v22 = vadd.f32 %v2331_v34, %v2303_v20  ;;  %v3155_v51 = vunpack.c.l.b16 %v10121_v61  ;;  %3698 = vmatpush.bf16.msrb.mxu1 %v6818_v33  ;;  %v7904_v34 = vld [vmem:[%s12170_s3 + $0x1d4] sm:$0xf0]  ;;  %v7017_v33 = vld [vmem:[%s12170_s3 + $0x380] sm:$0xf] }
 0x202   : > { %v10110_v11 = vpack.c.bf16 %v2619_v3, %v2615_v31  ;;  %v7872_v31 = vld [vmem:[%s12170_s3 + $0xd4] sm:$0xf0]  ;;  %v6801_v3 = vld [vmem:[%s12170_s3 + $0x1c8] sm:$0xf]  ;;  %3612 = vmatpush.bf16.msrb.mxu2 %v6926_v47 }
 0x203   : > { %v2360_v13 = vpop.f32.mrf.mxu3  ;;  %v2391_v54 = vpop.f32.mrf.mxu0  ;;  %v3283_v24 = vpack.c.b16 %v3155_v51, %v3155_v51  ;;  %v7033_v51 = vld [vmem:[%s12170_s3 + $0x3a0] sm:$0xf] }
 0x204   : > { %v10116_v2 = vpop.f32.mrf.mxu1  ;;  %v2361_v57 = vadd.f32 %v2360_v13, %v2332_v22  ;;  %v6802_v22 = vor.u32 %v7904_v34, %v6801_v3  ;;  %v6753_v3 = vld [vmem:[%s12170_s3 + $0x168] sm:$0xf]  ;;  %v7892_v34 = vld [vmem:[%s12170_s3 + $0x174] sm:$0xf0] }
 0x205   : > { %v3426_v17 = vsel %vm3424_vm1, %v3283_v24, 0  ;;  %v6907_v24 = vld [vmem:[%s12170_s3 + $0x2b0] sm:$0xf0] }
 0x206   : > { %v2390_v7 = vadd.f32 %v2389_v39, %v2361_v57  ;;  %3524 = vmatpush.bf16.msra.mxu3 %v3426_v17  ;;  %v6673_v39 = vld [vmem:[%s12170_s3 + $0xc8] sm:$0xf]  ;;  %v7963_v57 = vld [vmem:[%s12170_s3 + $0x3ac] sm:$0xf0]  ;;  %3699 = vmatpush.bf16.msrb.mxu1 %v6802_v22  ;;  %v6754_v22 = vor.u32 %v7892_v34, %v6753_v3  ;;  %v7848_v34 = vld [vmem:[%s12170_s3 + $0x14] sm:$0xf0] }
 0x207   : > { %v6674_v42 = vor.u32 %v7872_v31, %v6673_v39  ;;  %v7860_v39 = vld [vmem:[%s12170_s3 + $0x74] sm:$0xf0] }
 0x208   : > { %v2333_v43 = vpop.f32.mrf.mxu2  ;;  %v2623_v49 = vmax.f32 %v2390_v7, 0.0  ;;  %v6626_v31 = vor.u32 %v7860_v39, %v6625_v63  ;;  %v7909_v39 = vld [vmem:[%s12170_s3 + $0x204] sm:$0xf] }
 0x209   : > { %v2334_v12 = vadd.f32 %v2333_v43, %v2305_v58  ;;  %3670 = vmatpush.bf16.msrb.mxu0 %v6674_v42  ;;  %v7929_v58 = vld [vmem:[%s12170_s3 + $0x2a4] sm:$0xf]  ;;  %v7034_v43 = vor.u32 %v7963_v57, %v7033_v51 }
 0x20a   : > { %3525 = vmatpush.bf16.msra.mxu3 %v7050_v5  ;;  %v6910_v17 = vor.u32 %v7929_v58, %v6907_v24  ;;  %v6891_v5 = vld [vmem:[%s12170_s3 + $0x290] sm:$0xf0]  ;;  %v7917_v58 = vld [vmem:[%s12170_s3 + $0x244] sm:$0xf]  ;;  %v6609_v24 = vld [vmem:[%s12170_s3 + $0x48] sm:$0xf] }
 0x20b   : > { %v2362_v19 = vpop.f32.mrf.mxu3  ;;  %v10129_v14 = vpop.f32.mrf.mxu0  ;;  %v6894_v62 = vor.u32 %v7925_v6, %v6891_v5 }
 0x20c   : > { %v2363_v45 = vadd.f32 %v2362_v19, %v2334_v12  ;;  %v10131_v38 = vpop.f32.mrf.mxu1  ;;  %v6657_v12 = vld [vmem:[%s12170_s3 + $0xa8] sm:$0xf]  ;;  %v7868_v19 = vld [vmem:[%s12170_s3 + $0xb4] sm:$0xf0]  ;;  %3613 = vmatpush.bf16.msrb.mxu2 %v6910_v17 }
 0x20d   : > { %3503 = vmatmul.bf16.vlgmr.msra.gmra.mxu2 %v10023_v21  ;;  %v6658_v7 = vor.u32 %v7868_v19, %v6657_v12  ;;  %v7856_v19 = vld [vmem:[%s12170_s3 + $0x54] sm:$0xf0]  ;;  %v6737_v17 = vld [vmem:[%s12170_s3 + $0x148] sm:$0xf] }
 0x20e   : > { %v2392_v1 = vadd.f32 %v2391_v54, %v2363_v45  ;;  %v6785_v45 = vld [vmem:[%s12170_s3 + $0x1a8] sm:$0xf]  ;;  %3526 = vmatpush.bf16.msra.mxu3 %v7034_v43  ;;  %v6859_v43 = vld [vmem:[%s12170_s3 + $0x250] sm:$0xf0] }
 0x20f   : > { %3561 = vmatmul.bf16.vlgmr.msra.gmra.mxu0 %v9360_v36  ;;  %3590 = vmatmul.bf16.vlgmr.msra.gmra.mxu1 %v9620_v32  ;;  %v6862_v12 = vor.u32 %v7917_v58, %v6859_v43 }
 0x210   : > { %v2627_v37 = vmax.f32 %v2392_v1, 0.0  ;;  %v2432_v53 = vpop.f32.mrf.mxu2  ;;  %3671 = vmatpush.bf16.msrb.mxu0 %v6658_v7  ;;  %3614 = vmatpush.bf16.msrb.mxu2 %v6894_v62  ;;  %v7888_v7 = vld [vmem:[%s12170_s3 + $0x154] sm:$0xf0]  ;;  %v7955_v62 = vld [vmem:[%s12170_s3 + $0x36c] sm:$0xf0] }
 0x211   : > { %v2433_v27 = vadd.f32 %v2432_v53, %v2404_v56  ;;  %v7900_v56 = vld [vmem:[%s12170_s3 + $0x1b4] sm:$0xf0]  ;;  %v2409_v53 = vadd.f32 %v9998_v9, %v10126_v60  ;;  %v6875_v9 = vld [vmem:[%s12170_s3 + $0x270] sm:$0xf0]  ;;  %v6738_v5 = vor.u32 %v7888_v7, %v6737_v17 }
 0x212   : > { %v10162_v16 = vpack.c.bf16 %v2627_v37, %v2623_v49  ;;  %v6786_v30 = vor.u32 %v7900_v56, %v6785_v45  ;;  %v6769_v49 = vld [vmem:[%s12170_s3 + $0x188] sm:$0xf]  ;;  %v7896_v37 = vld [vmem:[%s12170_s3 + $0x194] sm:$0xf0] }
 0x213   : > { %v2461_v28 = vpop.f32.mrf.mxu3  ;;  %v10184_v13 = vpop.f32.mrf.mxu0  ;;  %v6770_v0 = vor.u32 %v7896_v37, %v6769_v49  ;;  %v7002_v49 = vor.u32 %v7955_v62, %v7001_v46  ;;  %v6843_v37 = vld [vmem:[%s12170_s3 + $0x230] sm:$0xf0] }
 0x214   : > { %v10182_v20 = vadd.f32 %v2461_v28, %v2433_v27  ;;  %v10186_v54 = vpop.f32.mrf.mxu1  ;;  %3700 = vmatpush.bf16.msrb.mxu1 %v6786_v30  ;;  %v7959_v27 = vld [vmem:[%s12170_s3 + $0x38c] sm:$0xf0]  ;;  %3672 = vmatpush.bf16.msrb.mxu0 %v6642_v44  ;;  %v7921_v28 = vld [vmem:[%s12170_s3 + $0x264] sm:$0xf]  ;;  %v6610_v30 = vor.u32 %v7856_v19, %v6609_v24  ;;  %v6593_v44 = vld [vmem:[%s12170_s3 + $0x28] sm:$0xf]  ;;  %v2414_v24 = vadd.f32 %v10087_v25, %v10126_v60 }
 0x215   : > { %v7018_v55 = vor.u32 %v7959_v27, %v7017_v33  ;;  %v6878_v47 = vor.u32 %v7921_v28, %v6875_v9  ;;  %v6721_v27 = vld [vmem:[%s12170_s3 + $0x128] sm:$0xf]  ;;  %v7884_v28 = vld [vmem:[%s12170_s3 + $0x134] sm:$0xf0]  ;;  %v7951_v19 = vld [vmem:[%s12170_s3 + $0x34c] sm:$0xf0] }
 0x216   : > { %v6722_v9 = vor.u32 %v7884_v28, %v6721_v27  ;;  %v2419_v27 = vadd.f32 %v10103_v40, %v10126_v60  ;;  %v6953_v28 = vld [vmem:[%s12170_s3 + $0x300] sm:$0xf] }
 0x217   : > { %3527 = vmatpush.bf16.msra.mxu3 %v7018_v55  ;;  %3615 = vmatpush.bf16.msrb.mxu2 %v6878_v47  ;;  %v6827_v47 = vld [vmem:[%s12170_s3 + $0x210] sm:$0xf0] }
 0x218   : > { %v10212_v1 = vpop.f32.mrf.mxu2  ;;  %3701 = vmatpush.bf16.msrb.mxu1 %v6770_v0  ;;  %3673 = vmatpush.bf16.msrb.mxu0 %v6626_v31  ;;  %v7852_v0 = vld [vmem:[%s12170_s3 + $0x34] sm:$0xf0]  ;;  %v6577_v31 = vld [vmem:[%s12170_s3 + $0x8] sm:$0xf]  ;;  %v6830_v3 = vor.u32 %v7909_v39, %v6827_v47 }
 0x219   : > { %v6594_v33 = vor.u32 %v7852_v0, %v6593_v44 }
 0x21b   : > { %v10214_v10 = vpop.f32.mrf.mxu3  ;;  %v10234_v4 = vpop.f32.mrf.mxu0  ;;  %3616 = vmatpush.bf16.msrb.mxu2 %v6862_v12  ;;  %3528 = vmatpush.bf16.msra.mxu3 %v7002_v49  ;;  %v6985_v12 = vld [vmem:[%s12170_s3 + $0x340] sm:$0xf]  ;;  %v7947_v49 = vld [vmem:[%s12170_s3 + $0x32c] sm:$0xf0] }
 0x21c   : > { %v10236_v48 = vpop.f32.mrf.mxu1  ;;  %3702 = vmatpush.bf16.msrb.mxu1 %v6754_v22  ;;  %3674 = vmatpush.bf16.msrb.mxu0 %v6610_v30  ;;  %v6986_v17 = vor.u32 %v7951_v19, %v6985_v12  ;;  %v2406_v19 = vadd.f32 %v9957_v8, %v10126_v60  ;;  %v7940_v8 = vld [vmem:[%s12170_s3 + $0x2f4] sm:$0xf0] }
 0x21d   : > { %3508 = vmatmul.bf16.gmra.mxu2 %v10094_v35 }
 0x21f   : > { %3566 = vmatmul.bf16.gmra.mxu0 %v9428_v15  ;;  %3595 = vmatmul.bf16.gmra.mxu1 %v9686_v26 }
 0x220   : > { %v2437_v42 = vpop.f32.mrf.mxu2  ;;  %3703 = vmatpush.bf16.msrb.mxu1 %v6738_v5  ;;  %3675 = vmatpush.bf16.msrb.mxu0 %v6594_v33 }
 0x221   : > { %v2438_v51 = vadd.f32 %v2437_v42, %v2409_v53  ;;  %v6846_v53 = vor.u32 %v7913_v18, %v6843_v37  ;;  %v6705_v42 = vld [vmem:[%s12170_s3 + $0x108] sm:$0xf]  ;;  %3529 = vmatpush.bf16.msra.mxu3 %v6986_v17  ;;  %v6969_v18 = vld [vmem:[%s12170_s3 + $0x320] sm:$0xf] }
 0x222   : > { %v6970_v37 = vor.u32 %v7947_v49, %v6969_v18 }
 0x223   : > { %v2466_v57 = vpop.f32.mrf.mxu3  ;;  %v10287_v56 = vpop.f32.mrf.mxu0  ;;  %3617 = vmatpush.bf16.msrb.mxu2 %v6846_v53 }
 0x224   : > { %v10285_v45 = vadd.f32 %v2466_v57, %v2438_v51  ;;  %v10289_v6 = vpop.f32.mrf.mxu1  ;;  %v6578_v51 = vor.u32 %v7848_v34, %v6577_v31  ;;  %v7880_v57 = vld [vmem:[%s12170_s3 + $0x114] sm:$0xf0]  ;;  %3704 = vmatpush.bf16.msrb.mxu1 %v6722_v9  ;;  %v7943_v9 = vld [vmem:[%s12170_s3 + $0x30c] sm:$0xf0] }
 0x225   : > { %v6706_v43 = vor.u32 %v7880_v57, %v6705_v42  ;;  %3530 = vmatpush.bf16.msra.mxu3 %v6970_v37  ;;  %v6954_v39 = vor.u32 %v7943_v9, %v6953_v28  ;;  %v3156_v57 = vunpack.c.h.b16 %v10121_v61  ;;  %v6945_v61 = vld [vmem:[%s12170_s3 + $0x2e8] sm:$0xf]  ;;  %v7874_v37 = vld [vmem:[%s12170_s3 + $0xec] sm:$0xf]  ;;  %v6691_v28 = vld [vmem:[%s12170_s3 + $0xf8] sm:$0xf0] }
 0x226   : > { %3676 = vmatpush.bf16.msrb.mxu0 %v6578_v51  ;;  %v2771_v51 = vld [vmem:[%s12171_s4] sm:$0xf]  ;;  %v7906_v9 = vld [vmem:[%s12170_s3 + $0x1ec] sm:$0xf] }
 0x227   : > { %3618 = vmatpush.bf16.msrb.mxu2 %v6830_v3  ;;  %v10395_v12 = vperm.slane %v2771_v51, 0  ;;  %v7051_v51 = vld [vmem:[%s12170_s3 + $0x3d0] sm:$0xf0] }
 0x228   : > { %v10315_v55 = vpop.f32.mrf.mxu2  ;;  %3705 = vmatpush.bf16.msrb.mxu1 %v6706_v43  ;;  %v3284_v43 = vpack.c.b16 %v3156_v57, %v3156_v57  ;;  %v6694_v57 = vor.u32 %v7874_v37, %v6691_v28 }
 0x229   : > { %3531 = vmatpush.bf16.msra.mxu3 %v6954_v39  ;;  %v6819_v39 = vld [vmem:[%s12170_s3 + $0x1f8] sm:$0xf0] }
 0x22a   : > { %3785 = vmatpush.bf16.msra.mxu0 %v6694_v57  ;;  %v7961_v57 = vld [vmem:[%s12170_s3 + $0x3a4] sm:$0xf] }
 0x22b   : > { %v10317_v63 = vpop.f32.mrf.mxu3  ;;  %v10334_v22 = vpop.f32.mrf.mxu0 }
 0x22c   : > { %v10339_v58 = vpop.f32.mrf.mxu1 }
 0x22d   : > { %3513 = vmatmul.bf16.gmra.mxu2 %v10110_v11 }
 0x22f   : > { %3571 = vmatmul.bf16.gmra.mxu0 %v9466_v41  ;;  %3600 = vmatmul.bf16.gmra.mxu1 %v9707_v29 }
 0x230   : > { %v2442_v7 = vpop.f32.mrf.mxu2 }
 0x231   : > { %v2443_v25 = vadd.f32 %v2442_v7, %v2414_v24  ;;  %v3429_v7 = vsel %vm3424_vm1, %v3284_v43, 0  ;;  %v6822_v43 = vor.u32 %v7906_v9, %v6819_v39 }
 0x232   : > { %3640 = vmatpush.bf16.msrb.mxu3 %v3429_v7 }
 0x233   : > { %v2471_v30 = vpop.f32.mrf.mxu3  ;;  %v10354_v46 = vpop.f32.mrf.mxu0  ;;  %3814 = vmatpush.bf16.msra.mxu1 %v6822_v43  ;;  %v7035_v43 = vld [vmem:[%s12170_s3 + $0x3b0] sm:$0xf0] }
 0x234   : > { %v10352_v5 = vadd.f32 %v2471_v30, %v2443_v25  ;;  %v10356_v62 = vpop.f32.mrf.mxu1  ;;  %v2435_v25 = vadd.f32 %v10212_v1, %v2406_v19  ;;  %v6946_v1 = vor.u32 %v7940_v8, %v6945_v61  ;;  %v6803_v61 = vld [vmem:[%s12170_s3 + $0x1d8] sm:$0xf0] }
 0x236   : > { %3727 = vmatpush.bf16.msra.mxu2 %v6946_v1 }
 0x238   : > { %v10364_v44 = vpop.f32.mrf.mxu2 }
 0x23b   : > { %v10366_v0 = vpop.f32.mrf.mxu3  ;;  %v10368_v53 = vpop.f32.mrf.mxu0 }
 0x23c   : > { %v10370_v33 = vpop.f32.mrf.mxu1 }
 0x23d   : > { %3518 = vmatmul.bf16.gmra.mxu2 %v10162_v16 }
 0x23f   : > { %3576 = vmatmul.bf16.gmra.mxu0 %v9504_v23  ;;  %3605 = vmatmul.bf16.gmra.mxu1 %v9763_v50 }
 0x240   : > { %v2447_v47 = vpop.f32.mrf.mxu2 }
 0x241   : > { %v2448_v31 = vadd.f32 %v2447_v47, %v2419_v27  ;;  %v2491_v47 = vadd.f32 %v10129_v14, %v10182_v20  ;;  %v6929_v14 = vld [vmem:[%s12170_s3 + $0x2c8] sm:$0xf]  ;;  %v7936_v20 = vld [vmem:[%s12170_s3 + $0x2d4] sm:$0xf0] }
 0x243   : > { %v2476_v3 = vpop.f32.mrf.mxu3  ;;  %v10385_v34 = vpop.f32.mrf.mxu0  ;;  %v2520_v37 = vadd.f32 %v10131_v38, %v2491_v47  ;;  %v7038_v38 = vor.u32 %v7961_v57, %v7035_v43  ;;  %v6913_v47 = vld [vmem:[%s12170_s3 + $0x2a8] sm:$0xf] }
 0x244   : > { %v10383_v40 = vadd.f32 %v2476_v3, %v2448_v31  ;;  %v10387_v42 = vpop.f32.mrf.mxu1  ;;  %v2464_v31 = vadd.f32 %v10214_v10, %v2435_v25  ;;  %v7965_v3 = vld [vmem:[%s12170_s3 + $0x3c4] sm:$0xf]  ;;  %v7870_v10 = vld [vmem:[%s12170_s3 + $0xcc] sm:$0xf]  ;;  %v6930_v25 = vor.u32 %v7936_v20, %v6929_v14  ;;  %v6659_v20 = vld [vmem:[%s12170_s3 + $0xb8] sm:$0xf0] }
 0x245   : > { %v7054_v7 = vor.u32 %v7965_v3, %v7051_v51 }
 0x246   : > { %v2493_v8 = vadd.f32 %v10184_v13, %v2464_v31  ;;  %3728 = vmatpush.bf16.msra.mxu2 %v6930_v25  ;;  %v7932_v31 = vld [vmem:[%s12170_s3 + $0x2b4] sm:$0xf0]  ;;  %v6787_v25 = vld [vmem:[%s12170_s3 + $0x1b8] sm:$0xf0] }
 0x247   : > { %3641 = vmatpush.bf16.msrb.mxu3 %v7054_v7  ;;  %v6914_v14 = vor.u32 %v7932_v31, %v6913_v47 }
 0x248   : > { %v10393_v24 = vpop.f32.mrf.mxu2  ;;  %v2522_v7 = vadd.f32 %v10186_v54, %v2493_v8  ;;  %v2411_v54 = vadd.f32 %v10047_v52, %v10126_v60  ;;  %v6643_v52 = vld [vmem:[%s12170_s3 + $0x98] sm:$0xf0] }
 0x24a   : > { %3729 = vmatpush.bf16.msra.mxu2 %v6914_v14  ;;  %v2440_v57 = vadd.f32 %v10315_v55, %v2411_v54  ;;  %v7924_v55 = vld [vmem:[%s12170_s3 + $0x274] sm:$0xf0]  ;;  %v6627_v54 = vld [vmem:[%s12170_s3 + $0x78] sm:$0xf0] }
 0x24b   : > { %v10399_v17 = vpop.f32.mrf.mxu3  ;;  %v3446_v30 = vpop.f32.mrf.mxu0  ;;  %3642 = vmatpush.bf16.msrb.mxu3 %v7038_v38 }
 0x24c   : > { %v3447_v18 = vadd.f32 %v3446_v30, %v10395_v12  ;;  %v3475_v49 = vpop.f32.mrf.mxu1 }
 0x24d   : > { %3619 = vmatmul.bf16.vlgmr.msrb.gmra.mxu2 %v10023_v21 }
 0x24e   : > { %v10414_v27 = vadd.f32 %v3475_v49, %v3447_v18  ;;  %v6675_v18 = vld [vmem:[%s12170_s3 + $0xd8] sm:$0xf0]  ;;  %v7902_v49 = vld [vmem:[%s12170_s3 + $0x1cc] sm:$0xf] }
 0x24f   : > { %3677 = vmatmul.bf16.vlgmr.msrb.gmra.mxu0 %v9360_v36  ;;  %3706 = vmatmul.bf16.vlgmr.msrb.gmra.mxu1 %v9620_v32  ;;  %v6678_v28 = vor.u32 %v7870_v10, %v6675_v18  ;;  %v6806_v9 = vor.u32 %v7902_v49, %v6803_v61  ;;  %v7898_v10 = vld [vmem:[%s12170_s3 + $0x1ac] sm:$0xf] }
 0x250   : > { %v2548_v19 = vpop.f32.mrf.mxu2  ;;  %v6790_v61 = vor.u32 %v7898_v10, %v6787_v25  ;;  %v6881_v10 = vld [vmem:[%s12170_s3 + $0x268] sm:$0xf]  ;;  %v2496_v25 = vadd.f32 %v10234_v4, %v10285_v45  ;;  %v2469_v4 = vadd.f32 %v10317_v63, %v2440_v57  ;;  %v7854_v57 = vld [vmem:[%s12170_s3 + $0x4c] sm:$0xf] }
 0x251   : > { %v2549_v51 = vadd.f32 %v2548_v19, %v2520_v37  ;;  %3786 = vmatpush.bf16.msra.mxu0 %v6678_v28  ;;  %3815 = vmatpush.bf16.msra.mxu1 %v6806_v9  ;;  %v7866_v19 = vld [vmem:[%s12170_s3 + $0xac] sm:$0xf]  ;;  %v6897_v28 = vld [vmem:[%s12170_s3 + $0x288] sm:$0xf]  ;;  %v7928_v9 = vld [vmem:[%s12170_s3 + $0x294] sm:$0xf0] }
 0x252   : > { %v6662_v49 = vor.u32 %v7866_v19, %v6659_v20 }
 0x253   : > { %v2577_v30 = vpop.f32.mrf.mxu3  ;;  %v3448_v1 = vpop.f32.mrf.mxu0 }
 0x254   : > { %v3449_v39 = vadd.f32 %v3448_v1, %v10395_v12  ;;  %v3477_v3 = vpop.f32.mrf.mxu1  ;;  %v2578_v8 = vadd.f32 %v2577_v30, %v2549_v51  ;;  %v7894_v30 = vld [vmem:[%s12170_s3 + $0x18c] sm:$0xf]  ;;  %v6771_v51 = vld [vmem:[%s12170_s3 + $0x198] sm:$0xf0] }
 0x255   : > { %3787 = vmatpush.bf16.msra.mxu0 %v6662_v49  ;;  %3816 = vmatpush.bf16.msra.mxu1 %v6790_v61  ;;  %v6882_v49 = vor.u32 %v7924_v55, %v6881_v10  ;;  %v7858_v61 = vld [vmem:[%s12170_s3 + $0x6c] sm:$0xf] }
 0x256   : > { %v10463_v13 = vadd.f32 %v3477_v3, %v3449_v39  ;;  %v7862_v39 = vld [vmem:[%s12170_s3 + $0x8c] sm:$0xf]  ;;  %v6898_v3 = vor.u32 %v7928_v9, %v6897_v28  ;;  %v2600_v14 = vmax.f32 %v2578_v8, 0.0  ;;  %v6630_v28 = vor.u32 %v7858_v61, %v6627_v54  ;;  %v6755_v9 = vld [vmem:[%s12170_s3 + $0x178] sm:$0xf0] }
 0x257   : > { %v6646_v47 = vor.u32 %v7862_v39, %v6643_v52  ;;  %v7890_v8 = vld [vmem:[%s12170_s3 + $0x16c] sm:$0xf]  ;;  %v7953_v54 = vld [vmem:[%s12170_s3 + $0x364] sm:$0xf] }
 0x258   : > { %v2550_v18 = vpop.f32.mrf.mxu2  ;;  %3730 = vmatpush.bf16.msra.mxu2 %v6898_v3  ;;  %v6758_v3 = vor.u32 %v7890_v8, %v6755_v9  ;;  %v7003_v8 = vld [vmem:[%s12170_s3 + $0x370] sm:$0xf0]  ;;  %v6595_v9 = vld [vmem:[%s12170_s3 + $0x38] sm:$0xf0] }
 0x259   : > { %v2551_v37 = vadd.f32 %v2550_v18, %v2522_v7  ;;  %v6774_v7 = vor.u32 %v7894_v30, %v6771_v51  ;;  %3788 = vmatpush.bf16.msra.mxu0 %v6646_v47  ;;  %v6865_v30 = vld [vmem:[%s12170_s3 + $0x248] sm:$0xf]  ;;  %v7920_v51 = vld [vmem:[%s12170_s3 + $0x254] sm:$0xf0]  ;;  %v7886_v47 = vld [vmem:[%s12170_s3 + $0x14c] sm:$0xf] }
 0x25b   : > { %v2579_v1 = vpop.f32.mrf.mxu3  ;;  %v3451_v38 = vpop.f32.mrf.mxu0  ;;  %3817 = vmatpush.bf16.msra.mxu1 %v6774_v7  ;;  %v2525_v7 = vadd.f32 %v10236_v48, %v2496_v25  ;;  %v7006_v48 = vor.u32 %v7953_v54, %v7003_v8  ;;  %v6849_v25 = vld [vmem:[%s12170_s3 + $0x228] sm:$0xf] }
 0x25c   : > { %v2580_v43 = vadd.f32 %v2579_v1, %v2551_v37  ;;  %v3452_v31 = vadd.f32 %v3451_v38, %v10395_v12  ;;  %v3480_v19 = vpop.f32.mrf.mxu1  ;;  %v7957_v37 = vld [vmem:[%s12170_s3 + $0x384] sm:$0xf]  ;;  %v7019_v1 = vld [vmem:[%s12170_s3 + $0x390] sm:$0xf0]  ;;  %3731 = vmatpush.bf16.msra.mxu2 %v6882_v49  ;;  %v6611_v38 = vld [vmem:[%s12170_s3 + $0x58] sm:$0xf0] }
 0x25d   : > { %3624 = vmatmul.bf16.gmra.mxu2 %v10094_v35  ;;  %v7022_v63 = vor.u32 %v7957_v37, %v7019_v1  ;;  %3789 = vmatpush.bf16.msra.mxu0 %v6630_v28  ;;  %v7850_v37 = vld [vmem:[%s12170_s3 + $0x2c] sm:$0xf] }
 0x25e   : > { %v2604_v20 = vmax.f32 %v2580_v43, 0.0  ;;  %v10515_v18 = vadd.f32 %v3480_v19, %v3452_v31  ;;  %v6866_v43 = vor.u32 %v7920_v51, %v6865_v30  ;;  %v6739_v31 = vld [vmem:[%s12170_s3 + $0x158] sm:$0xf0]  ;;  %v2498_v19 = vadd.f32 %v10287_v56, %v2469_v4  ;;  %v7916_v4 = vld [vmem:[%s12170_s3 + $0x234] sm:$0xf0] }
 0x25f   : > { %3682 = vmatmul.bf16.gmra.mxu0 %v9428_v15  ;;  %3711 = vmatmul.bf16.gmra.mxu1 %v9686_v26  ;;  %v6742_v49 = vor.u32 %v7886_v47, %v6739_v31  ;;  %v6850_v28 = vor.u32 %v7916_v4, %v6849_v25  ;;  %v6598_v30 = vor.u32 %v7850_v37, %v6595_v9  ;;  %v6833_v47 = vld [vmem:[%s12170_s3 + $0x208] sm:$0xf]  ;;  %v7912_v31 = vld [vmem:[%s12170_s3 + $0x214] sm:$0xf0]  ;;  %v6987_v9 = vld [vmem:[%s12170_s3 + $0x350] sm:$0xf0] }
 0x260   : > { %v10528_v45 = vpack.c.bf16 %v2604_v20, %v2600_v14  ;;  %v2553_v39 = vpop.f32.mrf.mxu2  ;;  %3643 = vmatpush.bf16.msrb.mxu3 %v7022_v63  ;;  %v6614_v20 = vor.u32 %v7854_v57, %v6611_v38  ;;  %3818 = vmatpush.bf16.msra.mxu1 %v6758_v3  ;;  %v2527_v1 = vadd.f32 %v10289_v6, %v2498_v19  ;;  %v6723_v63 = vld [vmem:[%s12170_s3 + $0x138] sm:$0xf0]  ;;  %v7846_v19 = vld [vmem:[%s12170_s3 + $0xc] sm:$0xf] }
 0x261   : > { %v2554_v61 = vadd.f32 %v2553_v39, %v2525_v7  ;;  %3732 = vmatpush.bf16.msra.mxu2 %v6866_v43  ;;  %v7882_v39 = vld [vmem:[%s12170_s3 + $0x12c] sm:$0xf]  ;;  %v2416_v6 = vadd.f32 %v10100_v59, %v10126_v60  ;;  %v6834_v7 = vor.u32 %v7912_v31, %v6833_v47  ;;  %v6579_v59 = vld [vmem:[%s12170_s3 + $0x18] sm:$0xf0] }
 0x262   : > { %7063 = vmatmul.msk.bf16.vlgmr.msra.gmra.mxu3 %vm3411_vm2, %v10528_v45  ;;  %3790 = vmatpush.bf16.msra.mxu0 %v6614_v20  ;;  %v6726_v51 = vor.u32 %v7882_v39, %v6723_v63 }
 0x263   : > { %v2582_v52 = vpop.f32.mrf.mxu3  ;;  %v3453_v14 = vpop.f32.mrf.mxu0  ;;  %v2445_v20 = vadd.f32 %v10364_v44, %v2416_v6  ;;  %v2501_v44 = vadd.f32 %v10334_v22, %v10352_v5  ;;  %v7945_v22 = vld [vmem:[%s12170_s3 + $0x324] sm:$0xf]  ;;  %v6971_v5 = vld [vmem:[%s12170_s3 + $0x330] sm:$0xf0] }
 0x264   : > { %v3454_v10 = vadd.f32 %v3453_v14, %v10395_v12  ;;  %v3482_v55 = vpop.f32.mrf.mxu1  ;;  %3644 = vmatpush.bf16.msrb.mxu3 %v7006_v48  ;;  %3819 = vmatpush.bf16.msra.mxu1 %v6742_v49  ;;  %v2583_v57 = vadd.f32 %v2582_v52, %v2554_v61  ;;  %v7878_v52 = vld [vmem:[%s12170_s3 + $0x10c] sm:$0xf]  ;;  %v6707_v14 = vld [vmem:[%s12170_s3 + $0x118] sm:$0xf0]  ;;  %v6582_v49 = vor.u32 %v7846_v19, %v6579_v59 }
 0x265   : > { %3733 = vmatpush.bf16.msra.mxu2 %v6850_v28  ;;  %v6710_v8 = vor.u32 %v7878_v52, %v6707_v14  ;;  %v2474_v37 = vadd.f32 %v10366_v0, %v2445_v20  ;;  %v7949_v28 = vld [vmem:[%s12170_s3 + $0x344] sm:$0xf]  ;;  %v6974_v0 = vor.u32 %v7945_v22, %v6971_v5 }
 0x266   : > { %v10569_v56 = vadd.f32 %v3482_v55, %v3454_v10  ;;  %3791 = vmatpush.bf16.msra.mxu0 %v6598_v30  ;;  %v2608_v48 = vmax.f32 %v2583_v57, 0.0  ;;  %v6990_v63 = vor.u32 %v7949_v28, %v6987_v9 }
 0x267   : > { %v2503_v30 = vadd.f32 %v10354_v46, %v2474_v37  ;;  %v6955_v46 = vld [vmem:[%s12170_s3 + $0x310] sm:$0xf0]  ;;  %v10667_v37 = vld [vmem:[%s12170_s3 + $0x3e8] sm:$0x33] }
 0x268   : > { %v2555_v3 = vpop.f32.mrf.mxu2  ;;  %3820 = vmatpush.bf16.msra.mxu1 %v6726_v51  ;;  %3645 = vmatpush.bf16.msrb.mxu3 %v6990_v63  ;;  %v2530_v51 = vadd.f32 %v10339_v58, %v2501_v44  ;;  %v7941_v58 = vld [vmem:[%s12170_s3 + $0x304] sm:$0xf]  ;;  %v3157_v28 = vunpack.c.l.b16 %v10667_v37 }
 0x269   : > { %v2556_v43 = vadd.f32 %v2555_v3, %v2527_v1  ;;  %3734 = vmatpush.bf16.msra.mxu2 %v6834_v7  ;;  %v2532_v31 = vadd.f32 %v10356_v62, %v2503_v30  ;;  %v2421_v7 = vadd.f32 %v10116_v2, %v10126_v60  ;;  %v6958_v20 = vor.u32 %v7941_v58, %v6955_v46 }
 0x26a   : > { %3792 = vmatpush.bf16.msra.mxu0 %v6582_v49 }
 0x26b   : > { %v2584_v38 = vpop.f32.mrf.mxu3 }
 0x26c   : > { %v2585_v10 = vadd.f32 %v2584_v38, %v2556_v43  ;;  %v3456_v55 = vpop.f32.mrf.mxu0  ;;  %v3485_v54 = vpop.f32.mrf.mxu1  ;;  %3821 = vmatpush.bf16.msra.mxu1 %v6710_v8  ;;  %3646 = vmatpush.bf16.msrb.mxu3 %v6974_v0  ;;  %v2506_v8 = vadd.f32 %v10368_v53, %v10383_v40 }
 0x26d   : > { %v3457_v61 = vadd.f32 %v3456_v55, %v10395_v12  ;;  %3629 = vmatmul.bf16.gmra.mxu2 %v10110_v11 }
 0x26e   : > { %v2612_v25 = vmax.f32 %v2585_v10, 0.0  ;;  %v2450_v10 = vadd.f32 %v10393_v24, %v2421_v7  ;;  %v2535_v40 = vadd.f32 %v10370_v33, %v2506_v8  ;;  %v7057_v33 = vld [vmem:[%s12170_s3 + $0x3c8] sm:$0xf] }
 0x26f   : > { %v10613_v4 = vadd.f32 %v3485_v54, %v3457_v61  ;;  %3687 = vmatmul.bf16.gmra.mxu0 %v9466_v41  ;;  %3716 = vmatmul.bf16.gmra.mxu1 %v9707_v29 }
 0x270   : > { %v10619_v1 = vpack.c.bf16 %v2612_v25, %v2608_v48  ;;  %v2558_v39 = vpop.f32.mrf.mxu2  ;;  %3647 = vmatpush.bf16.msrb.mxu3 %v6958_v20  ;;  %v2479_v48 = vadd.f32 %v10399_v17, %v2450_v10  ;;  %v7930_v20 = vld [vmem:[%s12170_s3 + $0x2ac] sm:$0xf]  ;;  %v6915_v10 = vld [vmem:[%s12170_s3 + $0x2b8] sm:$0xf0] }
 0x271   : > { %v2559_v38 = vadd.f32 %v2558_v39, %v2530_v51  ;;  %v3285_v39 = vpack.c.b16 %v3157_v28, %v3157_v28  ;;  %v7009_v28 = vld [vmem:[%s12170_s3 + $0x368] sm:$0xf] }
 0x272   : > { %7064 = vmatmul.msk.bf16.gmra.mxu3 %vm3411_vm2, %v10619_v1  ;;  %v2508_v53 = vadd.f32 %v10385_v34, %v2479_v48  ;;  %v7968_v34 = vld [vmem:[%s12170_s3 + $0x3d4] sm:$0xf0]  ;;  %v7922_v48 = vld [vmem:[%s12170_s3 + $0x26c] sm:$0xf] }
 0x273   : > { %v2587_v3 = vpop.f32.mrf.mxu3  ;;  %v3432_v5 = vsel %vm3424_vm1, %v3285_v39, 0  ;;  %v7914_v39 = vld [vmem:[%s12170_s3 + $0x22c] sm:$0xf] }
 0x274   : > { %v3458_v6 = vpop.f32.mrf.mxu0  ;;  %v3487_v43 = vpop.f32.mrf.mxu1  ;;  %v2588_v59 = vadd.f32 %v2587_v3, %v2559_v38  ;;  %v2537_v0 = vadd.f32 %v10387_v42, %v2508_v53  ;;  %3756 = vmatpush.bf16.msra.mxu3 %v3432_v5  ;;  %v7938_v42 = vld [vmem:[%s12170_s3 + $0x2ec] sm:$0xf]  ;;  %v7956_v53 = vld [vmem:[%s12170_s3 + $0x374] sm:$0xf0]  ;;  %v6993_v5 = vld [vmem:[%s12170_s3 + $0x348] sm:$0xf] }
 0x275   : > { %v3459_v57 = vadd.f32 %v3458_v6, %v10395_v12 }
 0x276   : > { %v2616_v2 = vmax.f32 %v2588_v59, 0.0 }
 0x277   : > { %v10639_v47 = vadd.f32 %v3487_v43, %v3459_v57  ;;  %v7058_v57 = vor.u32 %v7968_v34, %v7057_v33 }
 0x278   : > { %v2560_v19 = vpop.f32.mrf.mxu2 }
 0x279   : > { %v2561_v52 = vadd.f32 %v2560_v19, %v2532_v31  ;;  %3757 = vmatpush.bf16.msra.mxu3 %v7058_v57  ;;  %v6947_v19 = vld [vmem:[%s12170_s3 + $0x2f8] sm:$0xf0]  ;;  %v7948_v57 = vld [vmem:[%s12170_s3 + $0x334] sm:$0xf0] }
 0x27a   : > { %v6950_v7 = vor.u32 %v7938_v42, %v6947_v19  ;;  %v7153_v42 = vld [vmem:[%s12172_s5 + $0x90] sm:$0xf]  ;;  %v7988_v19 = vld [vmem:[%s12172_s5 + $0x98] sm:$0xf0] }
 0x27b   : > { %v2589_v14 = vpop.f32.mrf.mxu3 }
 0x27c   : > { %v2590_v55 = vadd.f32 %v2589_v14, %v2561_v52  ;;  %v3461_v62 = vpop.f32.mrf.mxu0  ;;  %v3490_v61 = vpop.f32.mrf.mxu1  ;;  %3843 = vmatpush.bf16.msrb.mxu2 %v6950_v7  ;;  %v7041_v52 = vld [vmem:[%s12170_s3 + $0x3a8] sm:$0xf]  ;;  %v7964_v14 = vld [vmem:[%s12170_s3 + $0x3b4] sm:$0xf0]  ;;  %v7154_v7 = vor.u32 %v7988_v19, %v7153_v42 }
 0x27d   : > { %v3462_v49 = vadd.f32 %v3461_v62, %v10395_v12  ;;  %3634 = vmatmul.bf16.gmra.mxu2 %v10162_v16  ;;  %v7042_v58 = vor.u32 %v7964_v14, %v7041_v52  ;;  %v7025_v62 = vld [vmem:[%s12170_s3 + $0x388] sm:$0xf]  ;;  %v7944_v14 = vld [vmem:[%s12170_s3 + $0x314] sm:$0xf0] }
 0x27e   : > { %v2620_v60 = vmax.f32 %v2590_v55, 0.0  ;;  %v6918_v55 = vor.u32 %v7930_v20, %v6915_v10  ;;  %v6961_v52 = vld [vmem:[%s12170_s3 + $0x308] sm:$0xf]  ;;  %v7129_v10 = vld [vmem:[%s12172_s5 + $0x60] sm:$0xf] }
 0x27f   : > { %v10653_v54 = vadd.f32 %v3490_v61, %v3462_v49  ;;  %3692 = vmatmul.bf16.gmra.mxu0 %v9504_v23  ;;  %3721 = vmatmul.bf16.gmra.mxu1 %v9763_v50  ;;  %v7960_v49 = vld [vmem:[%s12170_s3 + $0x394] sm:$0xf0]  ;;  %v7926_v61 = vld [vmem:[%s12170_s3 + $0x28c] sm:$0xf] }
 0x280   : > { %v10659_v24 = vpack.c.bf16 %v2620_v60, %v2616_v2  ;;  %v2563_v25 = vpop.f32.mrf.mxu2  ;;  %3758 = vmatpush.bf16.msra.mxu3 %v7042_v58  ;;  %v7026_v2 = vor.u32 %v7960_v49, %v7025_v62  ;;  %v6899_v60 = vld [vmem:[%s12170_s3 + $0x298] sm:$0xf0]  ;;  %v7141_v58 = vld [vmem:[%s12172_s5 + $0x78] sm:$0xf] }
 0x281   : > { %v2564_v63 = vadd.f32 %v2563_v25, %v2535_v40  ;;  %v6902_v8 = vor.u32 %v7926_v61, %v6899_v60  ;;  %v6883_v25 = vld [vmem:[%s12170_s3 + $0x278] sm:$0xf0]  ;;  %v7918_v40 = vld [vmem:[%s12170_s3 + $0x24c] sm:$0xf]  ;;  %v3158_v61 = vunpack.c.h.b16 %v10667_v37 }
 0x282   : > { %7065 = vmatmul.msk.bf16.gmra.mxu3 %vm3411_vm2, %v10659_v24  ;;  %v7976_v37 = vld [vmem:[%s12172_s5 + $0x38] sm:$0xf0] }
 0x283   : > { %v2592_v44 = vpop.f32.mrf.mxu3 }
 0x284   : > { %v3463_v17 = vpop.f32.mrf.mxu0  ;;  %v3492_v3 = vpop.f32.mrf.mxu1  ;;  %v2593_v51 = vadd.f32 %v2592_v44, %v2564_v63  ;;  %3759 = vmatpush.bf16.msra.mxu3 %v7026_v2  ;;  %v6886_v44 = vor.u32 %v7922_v48, %v6883_v25  ;;  %v6851_v63 = vld [vmem:[%s12170_s3 + $0x238] sm:$0xf0]  ;;  %v7979_v2 = vld [vmem:[%s12172_s5 + $0x50] sm:$0xf0]  ;;  %v7105_v48 = vld [vmem:[%s12172_s5 + $0x30] sm:$0xf] }
 0x285   : > { %v3464_v9 = vadd.f32 %v3463_v17, %v10395_v12  ;;  %v7010_v17 = vor.u32 %v7956_v53, %v7009_v28  ;;  %v7966_v28 = vld [vmem:[%s12170_s3 + $0x3cc] sm:$0xf]  ;;  %v7059_v53 = vld [vmem:[%s12170_s3 + $0x3d8] sm:$0xf0] }
 0x286   : > { %v2624_v38 = vmax.f32 %v2593_v51, 0.0  ;;  %v7910_v51 = vld [vmem:[%s12170_s3 + $0x20c] sm:$0xf] }
 0x287   : > { %v10673_v22 = vadd.f32 %v3492_v3, %v3464_v9  ;;  %v6854_v3 = vor.u32 %v7914_v39, %v6851_v63  ;;  %v7081_v63 = vld [vmem:[%s12172_s5] sm:$0xf] }
 0x288   : > { %v2565_v30 = vpop.f32.mrf.mxu2  ;;  %3760 = vmatpush.bf16.msra.mxu3 %v7010_v17  ;;  %v7062_v17 = vor.u32 %v7966_v28, %v7059_v53  ;;  %v7249_v53 = vld [vmem:[%s12172_s5 + $0x150] sm:$0xf] }
 0x289   : > { %v2566_v6 = vadd.f32 %v2565_v30, %v2537_v0  ;;  %v7952_v0 = vld [vmem:[%s12170_s3 + $0x354] sm:$0xf0] }
 0x28a   : > { %v6994_v30 = vor.u32 %v7952_v0, %v6993_v5  ;;  %v7962_v0 = vld [vmem:[%s12170_s3 + $0x3ac] sm:$0xf] }
 0x28b   : > { %v2594_v12 = vpop.f32.mrf.mxu3 }
 0x28c   : > { %v2595_v43 = vadd.f32 %v2594_v12, %v2566_v6  ;;  %v6835_v6 = vld [vmem:[%s12170_s3 + $0x218] sm:$0xf0]  ;;  %3761 = vmatpush.bf16.msra.mxu3 %v6994_v30  ;;  %v6977_v12 = vld [vmem:[%s12170_s3 + $0x328] sm:$0xf]  ;;  %v10809_v20 = vpop.f32.mrf.mxu0 }
 0x28d   : > { %3735 = vmatmul.bf16.vlgmr.msra.gmra.mxu2 %v10023_v21  ;;  %v6838_v33 = vor.u32 %v7910_v51, %v6835_v6 }
 0x28e   : > { %v2628_v31 = vmax.f32 %v2595_v43, 0.0  ;;  %v6978_v43 = vor.u32 %v7948_v57, %v6977_v12  ;;  %v7027_v12 = vld [vmem:[%s12170_s3 + $0x398] sm:$0xf0] }
 0x28f   : > { %3793 = vmatmul.bf16.vlgmr.msra.gmra.mxu0 %v9360_v36  ;;  %3822 = vmatmul.bf16.vlgmr.msra.gmra.mxu1 %v9620_v32  ;;  %v7934_v36 = vld [vmem:[%s12170_s3 + $0x2cc] sm:$0xf]  ;;  %v6931_v32 = vld [vmem:[%s12170_s3 + $0x2d8] sm:$0xf0] }
 0x290   : > { %v10691_v59 = vpack.c.bf16 %v2628_v31, %v2624_v38  ;;  %v6934_v46 = vor.u32 %v7934_v36, %v6931_v32  ;;  %v7165_v38 = vld [vmem:[%s12172_s5 + $0xa8] sm:$0xf]  ;;  %3762 = vmatpush.bf16.msra.mxu3 %v6978_v43  ;;  %v6962_v36 = vor.u32 %v7944_v14, %v6961_v52  ;;  %v7985_v32 = vld [vmem:[%s12172_s5 + $0x80] sm:$0xf0]  ;;  %v7950_v14 = vld [vmem:[%s12170_s3 + $0x34c] sm:$0xf] }
 0x292   : > { %7066 = vmatmul.msk.bf16.gmra.mxu3 %vm3411_vm2, %v10691_v59  ;;  %3844 = vmatpush.bf16.msrb.mxu2 %v6934_v46  ;;  %v7142_v46 = vor.u32 %v7985_v32, %v7141_v58 }
 0x294   : > { %3763 = vmatpush.bf16.msra.mxu3 %v6962_v36  ;;  %v10837_v25 = vpop.f32.mrf.mxu0  ;;  %v6995_v36 = vld [vmem:[%s12170_s3 + $0x358] sm:$0xf0] }
 0x295   : > { %v6998_v58 = vor.u32 %v7950_v14, %v6995_v36 }
 0x296   : > { %3845 = vmatpush.bf16.msrb.mxu2 %v6918_v55  ;;  %v7982_v55 = vld [vmem:[%s12172_s5 + $0x68] sm:$0xf0] }
 0x297   : > { %v7130_v49 = vor.u32 %v7982_v55, %v7129_v10 }
 0x29a   : > { %3846 = vmatpush.bf16.msrb.mxu2 %v6902_v8 }
 0x29c   : > { %v10868_v30 = vpop.f32.mrf.mxu0 }
 0x29d   : > { %3740 = vmatmul.bf16.gmra.mxu2 %v10094_v35 }
 0x29e   : > { %3847 = vmatpush.bf16.msrb.mxu2 %v6886_v44  ;;  %v7106_v44 = vor.u32 %v7976_v37, %v7105_v48 }
 0x29f   : > { %3798 = vmatmul.bf16.gmra.mxu0 %v9428_v15  ;;  %3827 = vmatmul.bf16.gmra.mxu1 %v9686_v26  ;;  %v10746_v15 = vpop.f32.mrf.mxu2  ;;  %v6867_v26 = vld [vmem:[%s12170_s3 + $0x258] sm:$0xf0] }
 0x2a0   : > { %v6870_v9 = vor.u32 %v7918_v40, %v6867_v26  ;;  %v7093_v26 = vld [vmem:[%s12172_s5 + $0x18] sm:$0xf] }
 0x2a2   : > { %7067 = vmatmul.msk.bf16.vlgmr.msrb.gmra.mxu3 %vm3411_vm2, %v10528_v45  ;;  %3848 = vmatpush.bf16.msrb.mxu2 %v6870_v9  ;;  %v7973_v9 = vld [vmem:[%s12172_s5 + $0x20] sm:$0xf0] }
 0x2a3   : > { %v7094_v39 = vor.u32 %v7973_v9, %v7093_v26  ;;  %v7987_v9 = vld [vmem:[%s12172_s5 + $0x94] sm:$0xf] }
 0x2a4   : > { %v10878_v43 = vpop.f32.mrf.mxu0 }
 0x2a6   : > { %3849 = vmatpush.bf16.msrb.mxu2 %v6854_v3  ;;  %v7970_v3 = vld [vmem:[%s12172_s5 + $0x8] sm:$0xf0] }
 0x2a7   : > { %v10769_v34 = vpop.f32.mrf.mxu2  ;;  %v7082_v5 = vor.u32 %v7970_v3, %v7081_v63 }
 0x2a8   : > { %v3507_v32 = vadd.f32 %v10769_v34, %v10463_v13  ;;  %v7946_v13 = vld [vmem:[%s12170_s3 + $0x32c] sm:$0xf]  ;;  %v6979_v34 = vld [vmem:[%s12170_s3 + $0x338] sm:$0xf0] }
 0x2aa   : > { %3850 = vmatpush.bf16.msrb.mxu2 %v6838_v33  ;;  %v7958_v33 = vld [vmem:[%s12170_s3 + $0x38c] sm:$0xf] }
 0x2ab   : > { %v7030_v57 = vor.u32 %v7958_v33, %v7027_v12 }
 0x2ad   : > { %3745 = vmatmul.bf16.gmra.mxu2 %v10110_v11 }
 0x2af   : > { %3803 = vmatmul.bf16.gmra.mxu0 %v9466_v41  ;;  %3832 = vmatmul.bf16.gmra.mxu1 %v9707_v29  ;;  %v7991_v41 = vld [vmem:[%s12172_s5 + $0xb0] sm:$0xf0]  ;;  %v10788_v31 = vpop.f32.mrf.mxu2 }
 0x2b0   : > { %v7166_v29 = vor.u32 %v7991_v41, %v7165_v38  ;;  %v7954_v41 = vld [vmem:[%s12170_s3 + $0x36c] sm:$0xf]  ;;  %v3510_v63 = vadd.f32 %v10788_v31, %v10515_v18  ;;  %v7237_v18 = vld [vmem:[%s12172_s5 + $0x138] sm:$0xf]  ;;  %v8009_v31 = vld [vmem:[%s12172_s5 + $0x140] sm:$0xf0] }
 0x2b2   : > { %7068 = vmatmul.msk.bf16.gmra.mxu3 %vm3411_vm2, %v10619_v1  ;;  %4469 = vmatpush.bf16.msrb.mxu0 %v7166_v29  ;;  %v7011_v29 = vld [vmem:[%s12170_s3 + $0x378] sm:$0xf0] }
 0x2b3   : > { %v7014_v42 = vor.u32 %v7954_v41, %v7011_v29  ;;  %v7984_v41 = vld [vmem:[%s12172_s5 + $0x7c] sm:$0xf] }
 0x2b6   : > { %4470 = vmatpush.bf16.msrb.mxu0 %v7154_v7  ;;  %v10891_v7 = vpop.f32.mrf.mxu0 }
 0x2b7   : > { %v10819_v62 = vpop.f32.mrf.mxu2 }
 0x2b8   : > { %v3512_v12 = vadd.f32 %v10819_v62, %v10569_v56  ;;  %v7143_v56 = vld [vmem:[%s12172_s5 + $0x84] sm:$0xf0] }
 0x2ba   : > { %4471 = vmatpush.bf16.msrb.mxu0 %v7142_v46 }
 0x2bd   : > { %3750 = vmatmul.bf16.gmra.mxu2 %v10162_v16 }
 0x2be   : > { %4472 = vmatpush.bf16.msrb.mxu0 %v7130_v49 }
 0x2bf   : > { %3808 = vmatmul.bf16.gmra.mxu0 %v9504_v23  ;;  %3837 = vmatmul.bf16.gmra.mxu1 %v9763_v50  ;;  %v3286_v23 = vpack.c.b16 %v3158_v61, %v3158_v61  ;;  %v7117_v50 = vld [vmem:[%s12172_s5 + $0x48] sm:$0xf]  ;;  %v10845_v40 = vpop.f32.mrf.mxu2  ;;  %v10908_v61 = vpop.f32.mrf.mxu1 }
 0x2c0   : > { %v7118_v60 = vor.u32 %v7979_v2, %v7117_v50  ;;  %v6982_v50 = vor.u32 %v7946_v13, %v6979_v34  ;;  %v7261_v2 = vld [vmem:[%s12172_s5 + $0x168] sm:$0xf]  ;;  %v8003_v13 = vld [vmem:[%s12172_s5 + $0x110] sm:$0xf0]  ;;  %v7978_v34 = vld [vmem:[%s12172_s5 + $0x4c] sm:$0xf] }
 0x2c1   : > { %v3435_v8 = vsel %vm3424_vm1, %v3286_v23, 0 }
 0x2c2   : > { %7069 = vmatmul.msk.bf16.gmra.mxu3 %vm3411_vm2, %v10659_v24  ;;  %4473 = vmatpush.bf16.msrb.mxu0 %v7118_v60  ;;  %v8015_v60 = vld [vmem:[%s12172_s5 + $0x170] sm:$0xf0] }
 0x2c3   : > { %3872 = vmatpush.bf16.msrb.mxu3 %v3435_v8  ;;  %v7990_v8 = vld [vmem:[%s12172_s5 + $0xac] sm:$0xf]  ;;  %v7262_v37 = vor.u32 %v8015_v60, %v7261_v2 }
 0x2c5   : > { %4498 = vmatpush.bf16.msrb.mxu1 %v7262_v37 }
 0x2c6   : > { %4474 = vmatpush.bf16.msrb.mxu0 %v7106_v44  ;;  %v7167_v44 = vld [vmem:[%s12172_s5 + $0xb4] sm:$0xf0] }
 0x2c7   : > { %3873 = vmatpush.bf16.msrb.mxu3 %v7062_v17  ;;  %v10870_v6 = vpop.f32.mrf.mxu2  ;;  %v7170_v28 = vor.u32 %v7990_v8, %v7167_v44  ;;  %v8012_v17 = vld [vmem:[%s12172_s5 + $0x158] sm:$0xf0]  ;;  %v10957_v33 = vpop.f32.mrf.mxu1  ;;  %v7119_v8 = vld [vmem:[%s12172_s5 + $0x54] sm:$0xf0] }
 0x2c8   : > { %v7250_v26 = vor.u32 %v8012_v17, %v7249_v53  ;;  %v7122_v37 = vor.u32 %v7978_v34, %v7119_v8  ;;  %v8000_v53 = vld [vmem:[%s12172_s5 + $0xf8] sm:$0xf0]  ;;  %v11075_v8 = vld [vmem:[%s12171_s4] sm:$0xf] }
 0x2ca   : > { %4475 = vmatpush.bf16.msrb.mxu0 %v7094_v39  ;;  %v7155_v39 = vld [vmem:[%s12172_s5 + $0x9c] sm:$0xf0]  ;;  %4499 = vmatpush.bf16.msrb.mxu1 %v7250_v26  ;;  %v7975_v26 = vld [vmem:[%s12172_s5 + $0x34] sm:$0xf] }
 0x2cb   : > { %v7158_v3 = vor.u32 %v7987_v9, %v7155_v39  ;;  %v7107_v9 = vld [vmem:[%s12172_s5 + $0x3c] sm:$0xf0]  ;;  %v3515_v39 = vadd.f32 %v10845_v40, %v10613_v4 }
 0x2cd   : > { %3851 = vmatmul.bf16.vlgmr.msrb.gmra.mxu2 %v10023_v21  ;;  %v7043_v21 = vld [vmem:[%s12170_s3 + $0x3b8] sm:$0xf0] }
 0x2ce   : > { %v7046_v51 = vor.u32 %v7962_v0, %v7043_v21  ;;  %4476 = vmatpush.bf16.msrb.mxu0 %v7082_v5  ;;  %v7942_v5 = vld [vmem:[%s12170_s3 + $0x30c] sm:$0xf]  ;;  %v6963_v0 = vld [vmem:[%s12170_s3 + $0x318] sm:$0xf0] }
 0x2cf   : > { %v10881_v38 = vpop.f32.mrf.mxu2 }
 0x2d0   : > { %3874 = vmatpush.bf16.msrb.mxu3 %v7046_v51  ;;  %v6966_v51 = vor.u32 %v7942_v5, %v6963_v0  ;;  %v7189_v0 = vld [vmem:[%s12172_s5 + $0xd8] sm:$0xf] }
 0x2d2   : > { %7070 = vmatmul.msk.bf16.gmra.mxu3 %vm3411_vm2, %v10691_v59  ;;  %4585 = vmatpush.bf16.msra.mxu0 %v7170_v28  ;;  %v7201_v28 = vld [vmem:[%s12172_s5 + $0xf0] sm:$0xf] }
 0x2d3   : > { %v7202_v17 = vor.u32 %v8000_v53, %v7201_v28 }
 0x2d4   : > { %3875 = vmatpush.bf16.msrb.mxu3 %v7030_v57 }
 0x2d6   : > { %4586 = vmatpush.bf16.msra.mxu0 %v7158_v3  ;;  %v3517_v3 = vadd.f32 %v10870_v6, %v10639_v47  ;;  %v7095_v47 = vld [vmem:[%s12172_s5 + $0x24] sm:$0xf0] }
 0x2d7   : > { %v10893_v52 = vpop.f32.mrf.mxu2 }
 0x2d8   : > { %3876 = vmatpush.bf16.msrb.mxu3 %v7014_v42 }
 0x2dc   : > { %3877 = vmatpush.bf16.msrb.mxu3 %v6998_v58  ;;  %v7225_v58 = vld [vmem:[%s12172_s5 + $0x120] sm:$0xf] }
 0x2dd   : > { %3856 = vmatmul.bf16.gmra.mxu2 %v10094_v35  ;;  %v3505_v35 = vadd.f32 %v10746_v15, %v10414_v27  ;;  %v10906_v15 = vpop.f32.mrf.mxu0 }
 0x2e0   : > { %3878 = vmatpush.bf16.msrb.mxu3 %v6982_v50 }
 0x2e2   : > { %7071 = vmatmul.msk.bf16.vlgmr.msra.gmra.mxu3 %vm3411_vm2, %v10528_v45 }
 0x2e4   : > { %3879 = vmatpush.bf16.msrb.mxu3 %v6966_v51  ;;  %v7997_v51 = vld [vmem:[%s12172_s5 + $0xe0] sm:$0xf0] }
 0x2e5   : > { %v3533_v19 = vpop.f32.mrf.mxu3  ;;  %v10955_v21 = vpop.f32.mrf.mxu0  ;;  %v7190_v4 = vor.u32 %v7997_v51, %v7189_v0 }
 0x2e6   : > { %v3534_v46 = vadd.f32 %v3533_v19, %v3505_v35  ;;  %v7238_v19 = vor.u32 %v8009_v31, %v7237_v18  ;;  %v7146_v35 = vor.u32 %v7984_v41, %v7143_v56  ;;  %v7994_v56 = vld [vmem:[%s12172_s5 + $0xc8] sm:$0xf0] }
 0x2e8   : > { %v3901_v49 = vmax.f32 %v3534_v46, 0.0  ;;  %4500 = vmatpush.bf16.msrb.mxu1 %v7238_v19  ;;  %4587 = vmatpush.bf16.msra.mxu0 %v7146_v35  ;;  %v7177_v19 = vld [vmem:[%s12172_s5 + $0xc0] sm:$0xf] }
 0x2e9   : > { %v7178_v35 = vor.u32 %v7994_v56, %v7177_v19 }
 0x2ed   : > { %v3535_v10 = vpop.f32.mrf.mxu3  ;;  %3861 = vmatmul.bf16.gmra.mxu2 %v10110_v11  ;;  %v10920_v11 = vpop.f32.mrf.mxu2 }
 0x2ee   : > { %v3536_v55 = vadd.f32 %v3535_v10, %v3507_v32  ;;  %v8006_v32 = vld [vmem:[%s12172_s5 + $0x128] sm:$0xf0]  ;;  %v7981_v10 = vld [vmem:[%s12172_s5 + $0x64] sm:$0xf]  ;;  %v11002_v50 = vpop.f32.mrf.mxu0 }
 0x2ef   : > { %v7226_v46 = vor.u32 %v8006_v32, %v7225_v58 }
 0x2f0   : > { %v3905_v27 = vmax.f32 %v3536_v55, 0.0 }
 0x2f1   : > { %4501 = vmatpush.bf16.msrb.mxu1 %v7226_v46 }
 0x2f2   : > { %v10910_v23 = vpack.c.bf16 %v3905_v27, %v3901_v49  ;;  %7072 = vmatmul.msk.bf16.gmra.mxu3 %vm3411_vm2, %v10619_v1  ;;  %v7213_v27 = vld [vmem:[%s12172_s5 + $0x108] sm:$0xf] }
 0x2f3   : > { %v7214_v60 = vor.u32 %v8003_v13, %v7213_v27  ;;  %v3522_v13 = vadd.f32 %v10893_v52, %v10673_v22 }
 0x2f4   : > { %4477 = vmatmul.bf16.vlgmr.msrb.gmra.mxu0 %v10910_v23 }
 0x2f5   : > { %v3538_v48 = vpop.f32.mrf.mxu3  ;;  %v10970_v29 = vpop.f32.mrf.mxu2  ;;  %4502 = vmatpush.bf16.msrb.mxu1 %v7214_v60 }
 0x2f6   : > { %v3539_v57 = vadd.f32 %v3538_v48, %v3510_v63  ;;  %v11007_v48 = vpop.f32.mrf.mxu1  ;;  %v7110_v63 = vor.u32 %v7975_v26, %v7107_v9  ;;  %v11039_v18 = vpop.f32.mrf.mxu0 }
 0x2f8   : > { %v3909_v14 = vmax.f32 %v3539_v57, 0.0 }
 0x2f9   : > { %4503 = vmatpush.bf16.msrb.mxu1 %v7202_v17 }
 0x2fd   : > { %v3540_v42 = vpop.f32.mrf.mxu3  ;;  %3866 = vmatmul.bf16.gmra.mxu2 %v10162_v16  ;;  %v7131_v16 = vld [vmem:[%s12172_s5 + $0x6c] sm:$0xf0]  ;;  %v11009_v44 = vpop.f32.mrf.mxu2  ;;  %4504 = vmatpush.bf16.msrb.mxu1 %v7190_v4 }
 0x2fe   : > { %v3541_v62 = vadd.f32 %v3540_v42, %v3512_v12  ;;  %v7134_v49 = vor.u32 %v7981_v10, %v7131_v16  ;;  %v7972_v12 = vld [vmem:[%s12172_s5 + $0x1c] sm:$0xf]  ;;  %v11041_v31 = vpop.f32.mrf.mxu1  ;;  %v11062_v10 = vpop.f32.mrf.mxu0 }
 0x2ff   : > { %v7098_v6 = vor.u32 %v7972_v12, %v7095_v47 }
 0x300   : > { %v3913_v36 = vmax.f32 %v3541_v62, 0.0  ;;  %4588 = vmatpush.bf16.msra.mxu0 %v7134_v49  ;;  %v3520_v49 = vadd.f32 %v10881_v38, %v10653_v54 }
 0x301   : > { %4505 = vmatpush.bf16.msrb.mxu1 %v7178_v35 }
 0x302   : > { %7073 = vmatmul.msk.bf16.gmra.mxu3 %vm3411_vm2, %v10659_v24  ;;  %v10990_v55 = vpack.c.bf16 %v3913_v36, %v3909_v14  ;;  %v7969_v14 = vld [vmem:[%s12172_s5 + $0x4] sm:$0xf]  ;;  %v7083_v36 = vld [vmem:[%s12172_s5 + $0xc] sm:$0xf0] }
 0x303   : > { %v7086_v32 = vor.u32 %v7969_v14, %v7083_v36 }
 0x304   : > { %4482 = vmatmul.bf16.gmra.mxu0 %v10990_v55 }
 0x305   : > { %v3543_v2 = vpop.f32.mrf.mxu3  ;;  %4589 = vmatpush.bf16.msra.mxu0 %v7122_v37  ;;  %v11049_v62 = vpop.f32.mrf.mxu2  ;;  %v11078_v37 = vperm.slane %v11075_v8, 1 }
 0x306   : > { %v3544_v5 = vadd.f32 %v3543_v2, %v3515_v39  ;;  %v11064_v16 = vpop.f32.mrf.mxu1  ;;  %v11084_v38 = vpop.f32.mrf.mxu0 }
 0x307   : > { %v3563_v22 = vadd.f32 %v10809_v20, %v11078_v37  ;;  %v3565_v9 = vadd.f32 %v10837_v25, %v11078_v37 }
 0x308   : > { %v3917_v41 = vmax.f32 %v3544_v5, 0.0 }
 0x309   : > { %4590 = vmatpush.bf16.msra.mxu0 %v7110_v63  ;;  %v3592_v39 = vadd.f32 %v10908_v61, %v3563_v22  ;;  %v3568_v61 = vadd.f32 %v10868_v30, %v11078_v37  ;;  %v7263_v30 = vld [vmem:[%s12172_s5 + $0x174] sm:$0xf0] }
 0x30b   : > { %v3621_v63 = vadd.f32 %v10920_v11, %v3592_v39  ;;  %v7357_v11 = vld [vmem:[%s12172_s5 + $0x228] sm:$0xf]  ;;  %v3597_v14 = vadd.f32 %v11007_v48, %v3568_v61  ;;  %v7251_v48 = vld [vmem:[%s12172_s5 + $0x15c] sm:$0xf0]  ;;  %v7333_v39 = vld [vmem:[%s12172_s5 + $0x1f8] sm:$0xf] }
 0x30d   : > { %v3545_v57 = vpop.f32.mrf.mxu3  ;;  %4591 = vmatpush.bf16.msra.mxu0 %v7098_v6  ;;  %v11068_v27 = vpop.f32.mrf.mxu2  ;;  %v7173_v6 = vld [vmem:[%s12172_s5 + $0xb0] sm:$0xf] }
 0x30e   : > { %v3546_v40 = vadd.f32 %v3545_v57, %v3517_v3  ;;  %v11088_v52 = vpop.f32.mrf.mxu1  ;;  %v11099_v20 = vpop.f32.mrf.mxu0 }
 0x310   : > { %v3921_v42 = vmax.f32 %v3546_v40, 0.0 }
 0x311   : > { %4592 = vmatpush.bf16.msra.mxu0 %v7086_v32  ;;  %v7345_v32 = vld [vmem:[%s12172_s5 + $0x210] sm:$0xf] }
 0x312   : > { %7074 = vmatmul.msk.bf16.gmra.mxu3 %vm3411_vm2, %v10691_v59  ;;  %v11059_v58 = vpack.c.bf16 %v3921_v42, %v3917_v41  ;;  %v7992_v41 = vld [vmem:[%s12172_s5 + $0xb8] sm:$0xf0]  ;;  %v3570_v42 = vadd.f32 %v10878_v43, %v11078_v37 }
 0x313   : > { %v7174_v56 = vor.u32 %v7992_v41, %v7173_v6  ;;  %v7137_v6 = vld [vmem:[%s12172_s5 + $0x68] sm:$0xf] }
 0x314   : > { %4487 = vmatmul.bf16.gmra.mxu0 %v11059_v58 }
 0x315   : > { %v3548_v46 = vpop.f32.mrf.mxu3  ;;  %v11091_v17 = vpop.f32.mrf.mxu2  ;;  %4701 = vmatpush.bf16.msrb.mxu0 %v7174_v56  ;;  %v7983_v56 = vld [vmem:[%s12172_s5 + $0x70] sm:$0xf0] }
 0x316   : > { %v3549_v34 = vadd.f32 %v3548_v46, %v3520_v49  ;;  %v11101_v51 = vpop.f32.mrf.mxu1  ;;  %v11133_v35 = vpop.f32.mrf.mxu0  ;;  %v8036_v46 = vld [vmem:[%s12172_s5 + $0x218] sm:$0xf0] }
 0x317   : > { %v7346_v49 = vor.u32 %v8036_v46, %v7345_v32  ;;  %v7138_v32 = vor.u32 %v7983_v56, %v7137_v6  ;;  %v3573_v46 = vadd.f32 %v10891_v7, %v11078_v37 }
 0x318   : > { %v3925_v28 = vmax.f32 %v3549_v34, 0.0  ;;  %v7161_v34 = vld [vmem:[%s12172_s5 + $0x98] sm:$0xf] }
 0x31d   : > { %v3550_v2 = vpop.f32.mrf.mxu3  ;;  %v11103_v57 = vpop.f32.mrf.mxu2 }
 0x31e   : > { %v3551_v60 = vadd.f32 %v3550_v2, %v3522_v13  ;;  %v11136_v36 = vpop.f32.mrf.mxu1  ;;  %v8011_v13 = vld [vmem:[%s12172_s5 + $0x154] sm:$0xf]  ;;  %v3599_v2 = vadd.f32 %v11041_v31, %v3570_v42  ;;  %v8033_v31 = vld [vmem:[%s12172_s5 + $0x200] sm:$0xf0] }
 0x320   : > { %v3929_v53 = vmax.f32 %v3551_v60, 0.0  ;;  %v3626_v60 = vadd.f32 %v11009_v44, %v3597_v14  ;;  %v8008_v44 = vld [vmem:[%s12172_s5 + $0x13c] sm:$0xf] }
 0x322   : > { %7075 = vmatmul.msk.bf16.vlgmr.msrb.gmra.mxu3 %vm3411_vm2, %v10528_v45  ;;  %v11082_v54 = vpack.c.bf16 %v3929_v53, %v3925_v28  ;;  %v3594_v45 = vadd.f32 %v10957_v33, %v3565_v9  ;;  %v8039_v33 = vld [vmem:[%s12172_s5 + $0x230] sm:$0xf0]  ;;  %v7254_v28 = vor.u32 %v8011_v13, %v7251_v48  ;;  %v7989_v53 = vld [vmem:[%s12172_s5 + $0xa0] sm:$0xf0]  ;;  %v8002_v13 = vld [vmem:[%s12172_s5 + $0x10c] sm:$0xf] }
 0x323   : > { %v7358_v40 = vor.u32 %v8039_v33, %v7357_v11  ;;  %v7162_v22 = vor.u32 %v7989_v53, %v7161_v34  ;;  %v7321_v11 = vld [vmem:[%s12172_s5 + $0x1e0] sm:$0xf]  ;;  %v8030_v33 = vld [vmem:[%s12172_s5 + $0x1e8] sm:$0xf0]  ;;  %v7215_v34 = vld [vmem:[%s12172_s5 + $0x114] sm:$0xf0] }
 0x324   : > { %4492 = vmatmul.bf16.gmra.mxu0 %v11082_v54  ;;  %v3623_v3 = vadd.f32 %v10970_v29, %v3594_v45  ;;  %v8014_v29 = vld [vmem:[%s12172_s5 + $0x16c] sm:$0xf]  ;;  %v7218_v53 = vor.u32 %v8002_v13, %v7215_v34 }
 0x325   : > { %v3649_v26 = vpop.f32.mrf.mxu3  ;;  %v7266_v19 = vor.u32 %v8014_v29, %v7263_v30  ;;  %4527 = vmatpush.bf16.msra.mxu2 %v7358_v40  ;;  %v11144_v43 = vpop.f32.mrf.mxu2  ;;  %4702 = vmatpush.bf16.msrb.mxu0 %v7162_v22  ;;  %v8005_v40 = vld [vmem:[%s12172_s5 + $0x124] sm:$0xf]  ;;  %v7227_v30 = vld [vmem:[%s12172_s5 + $0x12c] sm:$0xf0] }
 0x326   : > { %v3650_v5 = vadd.f32 %v3649_v26, %v3621_v63  ;;  %v3628_v26 = vadd.f32 %v11049_v62, %v3599_v2  ;;  %v7334_v63 = vor.u32 %v8033_v31, %v7333_v39  ;;  %v7239_v62 = vld [vmem:[%s12172_s5 + $0x144] sm:$0xf0]  ;;  %v11185_v29 = vpop.f32.mrf.mxu0  ;;  %v11196_v41 = vpop.f32.mrf.mxu1  ;;  %v7125_v2 = vld [vmem:[%s12172_s5 + $0x50] sm:$0xf]  ;;  %v8024_v39 = vld [vmem:[%s12172_s5 + $0x1b8] sm:$0xf0] }
 0x327   : > { %4614 = vmatpush.bf16.msra.mxu1 %v7266_v19  ;;  %v7230_v19 = vor.u32 %v8005_v40, %v7227_v30  ;;  %v7101_v40 = vld [vmem:[%s12172_s5 + $0x20] sm:$0xf]  ;;  %v7974_v30 = vld [vmem:[%s12172_s5 + $0x28] sm:$0xf0] }
 0x328   : > { %v3902_v4 = vmax.f32 %v3650_v5, 0.0  ;;  %v7986_v5 = vld [vmem:[%s12172_s5 + $0x88] sm:$0xf0]  ;;  %v7102_v56 = vor.u32 %v7974_v30, %v7101_v40 }
 0x329   : > { %4528 = vmatpush.bf16.msra.mxu2 %v7346_v49  ;;  %v8027_v49 = vld [vmem:[%s12172_s5 + $0x1d0] sm:$0xf0] }
 0x32b   : > { %4615 = vmatpush.bf16.msra.mxu1 %v7254_v28  ;;  %v3575_v28 = vadd.f32 %v10906_v15, %v11078_v37  ;;  %v7999_v15 = vld [vmem:[%s12172_s5 + $0xf4] sm:$0xf] }
 0x32d   : > { %v3651_v0 = vpop.f32.mrf.mxu3  ;;  %4529 = vmatpush.bf16.msra.mxu2 %v7334_v63  ;;  %v11205_v14 = vpop.f32.mrf.mxu2 }
 0x32e   : > { %v3652_v12 = vadd.f32 %v3651_v0, %v3623_v3  ;;  %v7149_v3 = vld [vmem:[%s12172_s5 + $0x80] sm:$0xf] }
 0x330   : > { %v3906_v47 = vmax.f32 %v3652_v12, 0.0  ;;  %v7242_v12 = vor.u32 %v8008_v44, %v7239_v62  ;;  %v7203_v44 = vld [vmem:[%s12172_s5 + $0xfc] sm:$0xf0] }
 0x331   : > { %v7206_v62 = vor.u32 %v7999_v15, %v7203_v44 }
 0x332   : > { %v11105_v25 = vpack.c.bf16 %v3906_v47, %v3902_v4  ;;  %7076 = vmatmul.msk.bf16.gmra.mxu3 %vm3411_vm2, %v10619_v1  ;;  %v7150_v4 = vor.u32 %v7986_v5, %v7149_v3  ;;  %4616 = vmatpush.bf16.msra.mxu1 %v7242_v12  ;;  %v7977_v3 = vld [vmem:[%s12172_s5 + $0x40] sm:$0xf0]  ;;  %v11252_v5 = vpop.f32.mrf.mxu0  ;;  %v11254_v12 = vpop.f32.mrf.mxu1 }
 0x334   : > { %4506 = vmatmul.bf16.vlgmr.msrb.gmra.mxu1 %v11105_v25  ;;  %4593 = vmatmul.bf16.vlgmr.msra.gmra.mxu0 %v10910_v23 }
 0x335   : > { %v3654_v1 = vpop.f32.mrf.mxu3  ;;  %4703 = vmatpush.bf16.msrb.mxu0 %v7150_v4 }
 0x336   : > { %v3655_v9 = vadd.f32 %v3654_v1, %v3626_v60  ;;  %v7322_v1 = vor.u32 %v8030_v33, %v7321_v11  ;;  %4617 = vmatpush.bf16.msra.mxu1 %v7230_v19  ;;  %v7980_v60 = vld [vmem:[%s12172_s5 + $0x58] sm:$0xf0]  ;;  %v11266_v11 = vpop.f32.mrf.mxu2 }
 0x337   : > { %v7126_v22 = vor.u32 %v7980_v60, %v7125_v2  ;;  %v7089_v60 = vld [vmem:[%s12172_s5 + $0x8] sm:$0xf] }
 0x338   : > { %v3910_v47 = vmax.f32 %v3655_v9, 0.0  ;;  %4530 = vmatpush.bf16.msra.mxu2 %v7322_v1  ;;  %v7297_v9 = vld [vmem:[%s12172_s5 + $0x1b0] sm:$0xf] }
 0x339   : > { %4704 = vmatpush.bf16.msrb.mxu0 %v7138_v32  ;;  %v7298_v31 = vor.u32 %v8024_v39, %v7297_v9 }
 0x33a   : > { %4618 = vmatpush.bf16.msra.mxu1 %v7218_v53  ;;  %v11309_v9 = vpop.f32.mrf.mxu0  ;;  %v3712_v15 = vpop.f32.mrf.mxu1 }
 0x33d   : > { %v3656_v45 = vpop.f32.mrf.mxu3  ;;  %4705 = vmatpush.bf16.msrb.mxu0 %v7126_v22  ;;  %v3578_v22 = vadd.f32 %v10955_v21, %v11078_v37  ;;  %v3580_v21 = vadd.f32 %v11002_v50, %v11078_v37 }
 0x33e   : > { %v3657_v0 = vadd.f32 %v3656_v45, %v3628_v26  ;;  %v3602_v26 = vadd.f32 %v11064_v16, %v3573_v46  ;;  %v7113_v16 = vld [vmem:[%s12172_s5 + $0x38] sm:$0xf]  ;;  %v3604_v45 = vadd.f32 %v11088_v52, %v3575_v28  ;;  %4619 = vmatpush.bf16.msra.mxu1 %v7206_v62  ;;  %v7971_v28 = vld [vmem:[%s12172_s5 + $0x10] sm:$0xf0]  ;;  %v3741_v44 = vpop.f32.mrf.mxu2 }
 0x33f   : > { %v7285_v52 = vld [vmem:[%s12172_s5 + $0x198] sm:$0xf]  ;;  %v7090_v53 = vor.u32 %v7971_v28, %v7089_v60 }
 0x340   : > { %v3914_v61 = vmax.f32 %v3657_v0, 0.0  ;;  %v3631_v63 = vadd.f32 %v11068_v27, %v3602_v26  ;;  %v7114_v0 = vor.u32 %v7977_v3, %v7113_v16  ;;  %v3633_v4 = vadd.f32 %v11091_v17, %v3604_v45  ;;  %v8021_v27 = vld [vmem:[%s12172_s5 + $0x1a0] sm:$0xf0]  ;;  %v7191_v17 = vld [vmem:[%s12172_s5 + $0xe4] sm:$0xf0] }
 0x341   : > { %v7286_v1 = vor.u32 %v8021_v27, %v7285_v52  ;;  %v8042_v26 = vld [vmem:[%s12172_s5 + $0x248] sm:$0xf0]  ;;  %v3607_v16 = vadd.f32 %v11101_v51, %v3578_v22  ;;  %v3609_v45 = vadd.f32 %v11136_v36, %v3580_v21  ;;  %v11320_v52 = vperm.slane %v11075_v8, 2  ;;  %v8035_v22 = vld [vmem:[%s12172_s5 + $0x214] sm:$0xf] }
 0x342   : > { %7077 = vmatmul.msk.bf16.gmra.mxu3 %vm3411_vm2, %v10659_v24  ;;  %v11200_v42 = vpack.c.bf16 %v3914_v61, %v3910_v47  ;;  %v7309_v24 = vld [vmem:[%s12172_s5 + $0x1c8] sm:$0xf]  ;;  %v7996_v61 = vld [vmem:[%s12172_s5 + $0xdc] sm:$0xf]  ;;  %4706 = vmatpush.bf16.msrb.mxu0 %v7114_v0  ;;  %v3714_v50 = vpop.f32.mrf.mxu1 }
 0x343   : > { %v7310_v7 = vor.u32 %v8027_v49, %v7309_v24  ;;  %v7194_v19 = vor.u32 %v7996_v61, %v7191_v17  ;;  %v7273_v24 = vld [vmem:[%s12172_s5 + $0x180] sm:$0xf]  ;;  %v8018_v49 = vld [vmem:[%s12172_s5 + $0x188] sm:$0xf0]  ;;  %v3638_v62 = vadd.f32 %v11144_v43, %v3609_v45  ;;  %v3679_v51 = vadd.f32 %v11039_v18, %v11320_v52  ;;  %v8032_v45 = vld [vmem:[%s12172_s5 + $0x1fc] sm:$0xf] }
 0x344   : > { %4511 = vmatmul.bf16.gmra.mxu1 %v11200_v42  ;;  %4598 = vmatmul.bf16.gmra.mxu0 %v10990_v55  ;;  %v7274_v13 = vor.u32 %v8018_v49, %v7273_v24  ;;  %v3681_v36 = vadd.f32 %v11062_v10, %v11320_v52  ;;  %v3686_v60 = vadd.f32 %v11099_v20, %v11320_v52  ;;  %v8013_v20 = vld [vmem:[%s12172_s5 + $0x160] sm:$0xf0] }
 0x345   : > { %v3659_v48 = vpop.f32.mrf.mxu3  ;;  %4531 = vmatpush.bf16.msra.mxu2 %v7310_v7  ;;  %4620 = vmatpush.bf16.msra.mxu1 %v7194_v19  ;;  %v7179_v7 = vld [vmem:[%s12172_s5 + $0xcc] sm:$0xf0]  ;;  %v3708_v43 = vadd.f32 %v11196_v41, %v3679_v51 }
 0x346   : > { %v3660_v47 = vadd.f32 %v3659_v48, %v3631_v63  ;;  %4707 = vmatpush.bf16.msrb.mxu0 %v7102_v56  ;;  %v7993_v48 = vld [vmem:[%s12172_s5 + $0xc4] sm:$0xf]  ;;  %v3636_v63 = vadd.f32 %v11103_v57, %v3607_v16  ;;  %v3743_v61 = vpop.f32.mrf.mxu2  ;;  %v3710_v17 = vadd.f32 %v11254_v12, %v3681_v36  ;;  %v3684_v12 = vadd.f32 %v11084_v38, %v11320_v52 }
 0x347   : > { %v7182_v2 = vor.u32 %v7993_v48, %v7179_v7  ;;  %v3737_v30 = vadd.f32 %v11205_v14, %v3708_v43  ;;  %v8038_v14 = vld [vmem:[%s12172_s5 + $0x22c] sm:$0xf]  ;;  %v8029_v36 = vld [vmem:[%s12172_s5 + $0x1e4] sm:$0xf]  ;;  %v7323_v43 = vld [vmem:[%s12172_s5 + $0x1ec] sm:$0xf0] }
 0x348   : > { %v3918_v32 = vmax.f32 %v3660_v47, 0.0  ;;  %v11317_v47 = vpop.f32.mrf.mxu0  ;;  %v3739_v18 = vadd.f32 %v11266_v11, %v3710_v17  ;;  %v7359_v11 = vld [vmem:[%s12172_s5 + $0x234] sm:$0xf0]  ;;  %v7326_v17 = vor.u32 %v8029_v36, %v7323_v43 }
 0x349   : > { %4532 = vmatpush.bf16.msra.mxu2 %v7298_v31  ;;  %4621 = vmatpush.bf16.msra.mxu1 %v7182_v2  ;;  %v7362_v7 = vor.u32 %v8038_v14, %v7359_v11  ;;  %v8016_v2 = vld [vmem:[%s12172_s5 + $0x178] sm:$0xf0] }
 0x34a   : > { %4708 = vmatpush.bf16.msrb.mxu0 %v7090_v53  ;;  %v11334_v40 = vpop.f32.mrf.mxu1  ;;  %v3713_v53 = vadd.f32 %v3712_v15, %v3684_v12  ;;  %v7221_v12 = vld [vmem:[%s12172_s5 + $0x110] sm:$0xf]  ;;  %v8004_v11 = vld [vmem:[%s12172_s5 + $0x118] sm:$0xf0] }
 0x34d   : > { %v3661_v33 = vpop.f32.mrf.mxu3  ;;  %4533 = vmatpush.bf16.msra.mxu2 %v7286_v1 }
 0x34e   : > { %v3662_v6 = vadd.f32 %v3661_v33, %v3633_v4 }
 0x350   : > { %v3922_v46 = vmax.f32 %v3662_v6, 0.0  ;;  %v11331_v1 = vpop.f32.mrf.mxu0  ;;  %v11337_v6 = vpop.f32.mrf.mxu2 }
 0x351   : > { %4534 = vmatpush.bf16.msra.mxu2 %v7274_v13  ;;  %v7269_v13 = vld [vmem:[%s12172_s5 + $0x170] sm:$0xf] }
 0x352   : > { %7078 = vmatmul.msk.bf16.gmra.mxu3 %vm3411_vm2, %v10691_v59  ;;  %v11291_v34 = vpack.c.bf16 %v3922_v46, %v3918_v32  ;;  %v7369_v59 = vld [vmem:[%s12172_s5 + $0x240] sm:$0xf]  ;;  %v11346_v49 = vpop.f32.mrf.mxu1  ;;  %v7270_v28 = vor.u32 %v8016_v2, %v7269_v13  ;;  %v3691_v13 = vadd.f32 %v11185_v29, %v11320_v52  ;;  %v7209_v29 = vld [vmem:[%s12172_s5 + $0xf8] sm:$0xf] }
 0x353   : > { %v7370_v31 = vor.u32 %v8042_v26, %v7369_v59  ;;  %v7257_v26 = vld [vmem:[%s12172_s5 + $0x158] sm:$0xf] }
 0x354   : > { %4516 = vmatmul.bf16.gmra.mxu1 %v11291_v34  ;;  %4603 = vmatmul.bf16.gmra.mxu0 %v11059_v58  ;;  %v7258_v21 = vor.u32 %v8013_v20, %v7257_v26 }
 0x355   : > { %v3664_v39 = vpop.f32.mrf.mxu3  ;;  %4563 = vmatpush.bf16.msra.mxu3 %v7370_v31  ;;  %4643 = vmatpush.bf16.msrb.mxu2 %v7362_v7  ;;  %v3742_v31 = vadd.f32 %v3741_v44, %v3713_v53 }
 0x356   : > { %v3665_v3 = vadd.f32 %v3664_v39, %v3636_v63  ;;  %4730 = vmatpush.bf16.msrb.mxu1 %v7270_v28  ;;  %v3715_v39 = vadd.f32 %v3714_v50, %v3686_v60  ;;  %v7335_v63 = vld [vmem:[%s12172_s5 + $0x204] sm:$0xf0]  ;;  %v7299_v28 = vld [vmem:[%s12172_s5 + $0x1bc] sm:$0xf0] }
 0x358   : > { %v3926_v37 = vmax.f32 %v3665_v3, 0.0  ;;  %v11342_v41 = vpop.f32.mrf.mxu0  ;;  %v11359_v48 = vpop.f32.mrf.mxu2  ;;  %v3744_v15 = vadd.f32 %v3743_v61, %v3715_v39 }
 0x35a   : > { %4731 = vmatpush.bf16.msrb.mxu1 %v7258_v21  ;;  %v11393_v50 = vpop.f32.mrf.mxu1  ;;  %v7287_v21 = vld [vmem:[%s12172_s5 + $0x1a4] sm:$0xf0] }
 0x35d   : > { %v3666_v0 = vpop.f32.mrf.mxu3 }
 0x35e   : > { %v3667_v4 = vadd.f32 %v3666_v0, %v3638_v62  ;;  %v7245_v62 = vld [vmem:[%s12172_s5 + $0x140] sm:$0xf]  ;;  %v7338_v0 = vor.u32 %v8032_v45, %v7335_v63 }
 0x360   : > { %v3930_v27 = vmax.f32 %v3667_v4, 0.0  ;;  %v11388_v3 = vpop.f32.mrf.mxu0  ;;  %v8010_v4 = vld [vmem:[%s12172_s5 + $0x148] sm:$0xf0]  ;;  %v11395_v61 = vpop.f32.mrf.mxu2 }
 0x362   : > { %v11322_v33 = vpack.c.bf16 %v3930_v27, %v3926_v37  ;;  %v7246_v27 = vor.u32 %v8010_v4, %v7245_v62  ;;  %v3724_v60 = vpop.f32.mrf.mxu1 }
 0x364   : > { %4521 = vmatmul.bf16.gmra.mxu1 %v11322_v33  ;;  %4608 = vmatmul.bf16.gmra.mxu0 %v11082_v54 }
 0x365   : > { %v3765_v57 = vpop.f32.mrf.mxu3  ;;  %4732 = vmatpush.bf16.msrb.mxu1 %v7246_v27  ;;  %v7185_v27 = vld [vmem:[%s12172_s5 + $0xc8] sm:$0xf] }
 0x366   : > { %v3766_v19 = vadd.f32 %v3765_v57, %v3737_v30  ;;  %v7233_v30 = vld [vmem:[%s12172_s5 + $0x128] sm:$0xf] }
 0x368   : > { %v3903_v46 = vmax.f32 %v3766_v19, 0.0  ;;  %v11430_v7 = vpop.f32.mrf.mxu0  ;;  %v3753_v53 = vpop.f32.mrf.mxu2 }
 0x36d   : > { %v3767_v56 = vpop.f32.mrf.mxu3 }
 0x36e   : > { %v3768_v32 = vadd.f32 %v3767_v56, %v3739_v18  ;;  %v8007_v18 = vld [vmem:[%s12172_s5 + $0x130] sm:$0xf0] }
 0x36f   : > { %v7234_v56 = vor.u32 %v8007_v18, %v7233_v30  ;;  %v3694_v30 = vadd.f32 %v11252_v5, %v11320_v52  ;;  %v8041_v18 = vld [vmem:[%s12172_s5 + $0x244] sm:$0xf]  ;;  %v3696_v5 = vadd.f32 %v11309_v9, %v11320_v52 }
 0x370   : > { %v3907_v24 = vmax.f32 %v3768_v32, 0.0  ;;  %v3689_v32 = vadd.f32 %v11133_v35, %v11320_v52  ;;  %v11466_v4 = vpop.f32.mrf.mxu0 }
 0x371   : > { %4733 = vmatpush.bf16.msrb.mxu1 %v7234_v56  ;;  %v7371_v56 = vld [vmem:[%s12172_s5 + $0x24c] sm:$0xf0] }
 0x372   : > { %v11340_v10 = vpack.c.bf16 %v3907_v24, %v3903_v46  ;;  %v8026_v46 = vld [vmem:[%s12172_s5 + $0x1cc] sm:$0xf]  ;;  %v7311_v24 = vld [vmem:[%s12172_s5 + $0x1d4] sm:$0xf0]  ;;  %v3718_v2 = vadd.f32 %v11334_v40, %v3689_v32  ;;  %v8001_v40 = vld [vmem:[%s12172_s5 + $0x100] sm:$0xf0] }
 0x373   : > { %v7314_v35 = vor.u32 %v8026_v46, %v7311_v24  ;;  %v7210_v26 = vor.u32 %v8001_v40, %v7209_v29  ;;  %v7374_v46 = vor.u32 %v8041_v18, %v7371_v56  ;;  %v3723_v24 = vadd.f32 %v11393_v50, %v3694_v30 }
 0x374   : > { %4535 = vmatmul.bf16.vlgmr.msra.gmra.mxu2 %v11340_v10  ;;  %4622 = vmatmul.bf16.vlgmr.msra.gmra.mxu1 %v11105_v25 }
 0x375   : > { %4709 = vmatmul.bf16.vlgmr.msrb.gmra.mxu0 %v10910_v23  ;;  %v3770_v38 = vpop.f32.mrf.mxu3  ;;  %v7347_v23 = vld [vmem:[%s12172_s5 + $0x21c] sm:$0xf0]  ;;  %4679 = vmatpush.bf16.msrb.mxu3 %v7374_v46 }
 0x376   : > { %v7350_v59 = vor.u32 %v8035_v22, %v7347_v23  ;;  %v3771_v16 = vadd.f32 %v3770_v38, %v3742_v31  ;;  %v7222_v38 = vor.u32 %v8004_v11, %v7221_v12  ;;  %v3720_v23 = vadd.f32 %v11346_v49, %v3691_v13  ;;  %v8020_v31 = vld [vmem:[%s12172_s5 + $0x19c] sm:$0xf] }
 0x377   : > { %v3725_v12 = vadd.f32 %v3724_v60, %v3696_v5  ;;  %v7329_v5 = vld [vmem:[%s12172_s5 + $0x1e8] sm:$0xf] }
 0x378   : > { %4644 = vmatpush.bf16.msrb.mxu2 %v7350_v59  ;;  %v3911_v51 = vmax.f32 %v3771_v16, 0.0  ;;  %4734 = vmatpush.bf16.msrb.mxu1 %v7222_v38  ;;  %v3747_v59 = vadd.f32 %v11337_v6, %v3718_v2  ;;  %v3749_v20 = vadd.f32 %v11359_v48, %v3720_v23  ;;  %v7290_v6 = vor.u32 %v8020_v31, %v7287_v21  ;;  %v7998_v48 = vld [vmem:[%s12172_s5 + $0xe8] sm:$0xf0] }
 0x379   : > { %v3754_v13 = vadd.f32 %v3753_v53, %v3725_v12 }
 0x37c   : > { %4645 = vmatpush.bf16.msrb.mxu2 %v7338_v0  ;;  %4735 = vmatpush.bf16.msrb.mxu1 %v7210_v26  ;;  %v7275_v0 = vld [vmem:[%s12172_s5 + $0x18c] sm:$0xf0] }
 0x37d   : > { %v3772_v44 = vpop.f32.mrf.mxu3 }
 0x37e   : > { %v3773_v37 = vadd.f32 %v3772_v44, %v3744_v15  ;;  %v7197_v15 = vld [vmem:[%s12172_s5 + $0xe0] sm:$0xf]  ;;  %v8017_v44 = vld [vmem:[%s12172_s5 + $0x184] sm:$0xf] }
 0x37f   : > { %v7198_v45 = vor.u32 %v7998_v48, %v7197_v15  ;;  %v8040_v48 = vld [vmem:[%s12172_s5 + $0x238] sm:$0xf0] }
 0x380   : > { %v3915_v57 = vmax.f32 %v3773_v37, 0.0  ;;  %4646 = vmatpush.bf16.msrb.mxu2 %v7326_v17  ;;  %v7278_v37 = vor.u32 %v8017_v44, %v7275_v0  ;;  %v3852_v17 = vpop.f32.mrf.mxu2  ;;  %v8037_v44 = vld [vmem:[%s12172_s5 + $0x220] sm:$0xf0] }
 0x381   : > { %4736 = vmatpush.bf16.msrb.mxu1 %v7198_v45 }
 0x382   : > { %v11409_v19 = vpack.c.bf16 %v3915_v57, %v3911_v51  ;;  %v7995_v51 = vld [vmem:[%s12172_s5 + $0xd0] sm:$0xf0]  ;;  %v3823_v57 = vpop.f32.mrf.mxu1 }
 0x383   : > { %v7186_v43 = vor.u32 %v7995_v51, %v7185_v27 }
 0x384   : > { %4540 = vmatmul.bf16.gmra.mxu2 %v11409_v19  ;;  %4627 = vmatmul.bf16.gmra.mxu1 %v11200_v42 }
 0x385   : > { %4714 = vmatmul.bf16.gmra.mxu0 %v10990_v55  ;;  %v3775_v14 = vpop.f32.mrf.mxu3  ;;  %4647 = vmatpush.bf16.msrb.mxu2 %v7314_v35  ;;  %v8023_v55 = vld [vmem:[%s12172_s5 + $0x1b4] sm:$0xf]  ;;  %v11491_v35 = vpop.f32.mrf.mxu0 }
 0x386   : > { %v7302_v22 = vor.u32 %v8023_v55, %v7299_v28  ;;  %v3776_v39 = vadd.f32 %v3775_v14, %v3747_v59  ;;  %4737 = vmatpush.bf16.msrb.mxu1 %v7186_v43  ;;  %v3752_v14 = vadd.f32 %v11395_v61, %v3723_v24  ;;  %v11494_v28 = vperm.slane %v11075_v8, 3  ;;  %v8031_v24 = vld [vmem:[%s12172_s5 + $0x1f0] sm:$0xf0] }
 0x387   : > { %v7330_v12 = vor.u32 %v8031_v24, %v7329_v5 }
 0x388   : > { %v3919_v63 = vmax.f32 %v3776_v39, 0.0  ;;  %v3854_v2 = vpop.f32.mrf.mxu2  ;;  %v3795_v52 = vadd.f32 %v11317_v47, %v11494_v28  ;;  %v3797_v8 = vadd.f32 %v11331_v1, %v11494_v28  ;;  %v7365_v1 = vld [vmem:[%s12172_s5 + $0x230] sm:$0xf] }
 0x389   : > { %4648 = vmatpush.bf16.msrb.mxu2 %v7302_v22  ;;  %v7366_v45 = vor.u32 %v8040_v48, %v7365_v1  ;;  %v3810_v48 = vadd.f32 %v11491_v35, %v11494_v28 }
 0x38a   : > { %v3825_v11 = vpop.f32.mrf.mxu1  ;;  %v3824_v40 = vadd.f32 %v3823_v57, %v3795_v52  ;;  %v7305_v52 = vld [vmem:[%s12172_s5 + $0x1b8] sm:$0xf] }
 0x38b   : > { %v3826_v23 = vadd.f32 %v3825_v11, %v3797_v8  ;;  %v3805_v11 = vadd.f32 %v11430_v7, %v11494_v28  ;;  %v3807_v7 = vadd.f32 %v11466_v4, %v11494_v28  ;;  %v8022_v4 = vld [vmem:[%s12172_s5 + $0x1a8] sm:$0xf0] }
 0x38c   : > { %v3853_v59 = vadd.f32 %v3852_v17, %v3824_v40  ;;  %v8034_v17 = vld [vmem:[%s12172_s5 + $0x208] sm:$0xf0] }
 0x38d   : > { %v3777_v49 = vpop.f32.mrf.mxu3  ;;  %4649 = vmatpush.bf16.msrb.mxu2 %v7290_v6  ;;  %v11502_v50 = vpop.f32.mrf.mxu0  ;;  %v3855_v26 = vadd.f32 %v3854_v2, %v3826_v23  ;;  %v8028_v2 = vld [vmem:[%s12172_s5 + $0x1d8] sm:$0xf0] }
 0x38e   : > { %v3778_v16 = vadd.f32 %v3777_v49, %v3749_v20  ;;  %v3812_v35 = vadd.f32 %v11502_v50, %v11494_v28 }
 0x390   : > { %v3923_v62 = vmax.f32 %v3778_v16, 0.0  ;;  %v3857_v53 = vpop.f32.mrf.mxu2 }
 0x391   : > { %4650 = vmatpush.bf16.msrb.mxu2 %v7278_v37 }
 0x392   : > { %v11474_v36 = vpack.c.bf16 %v3923_v62, %v3919_v63  ;;  %v3828_v60 = vpop.f32.mrf.mxu1  ;;  %v7353_v62 = vld [vmem:[%s12172_s5 + $0x218] sm:$0xf] }
 0x393   : > { %v7354_v0 = vor.u32 %v8037_v44, %v7353_v62 }
 0x394   : > { %4545 = vmatmul.bf16.gmra.mxu2 %v11474_v36  ;;  %4632 = vmatmul.bf16.gmra.mxu1 %v11291_v34 }
 0x395   : > { %4719 = vmatmul.bf16.gmra.mxu0 %v11059_v58  ;;  %v3780_v32 = vpop.f32.mrf.mxu3  ;;  %4759 = vmatpush.bf16.msra.mxu2 %v7366_v45  ;;  %v8043_v45 = vld [vmem:[%s12172_s5 + $0x250] sm:$0xf0] }
 0x396   : > { %v3781_v38 = vadd.f32 %v3780_v32, %v3752_v14 }
 0x398   : > { %v3927_v22 = vmax.f32 %v3781_v38, 0.0  ;;  %v3859_v49 = vpop.f32.mrf.mxu2  ;;  %v7317_v38 = vld [vmem:[%s12172_s5 + $0x1d0] sm:$0xf] }
 0x399   : > { %4760 = vmatpush.bf16.msra.mxu2 %v7354_v0 }
 0x39a   : > { %v3830_v31 = vpop.f32.mrf.mxu1 }
 0x39d   : > { %v3782_v55 = vpop.f32.mrf.mxu3 }
 0x39e   : > { %v3783_v58 = vadd.f32 %v3782_v55, %v3754_v13 }
 0x3a0   : > { %v3931_v29 = vmax.f32 %v3783_v58, 0.0 }
 0x3a2   : > { %v11496_v9 = vpack.c.bf16 %v3931_v29, %v3927_v22  ;;  %v3833_v27 = vpop.f32.mrf.mxu1  ;;  %v7318_v22 = vor.u32 %v8028_v2, %v7317_v38 }
 0x3a3   : > { %v3834_v29 = vadd.f32 %v3833_v27, %v3805_v11  ;;  %v8055_v11 = vld [vmem:[%s12174_s7 + $0x54] sm:$0xf0] }
 0x3a4   : > { %4550 = vmatmul.bf16.gmra.mxu2 %v11496_v9  ;;  %4637 = vmatmul.bf16.gmra.mxu1 %v11322_v33 }
 0x3a5   : > { %4724 = vmatmul.bf16.gmra.mxu0 %v11082_v54  ;;  %v3881_v61 = vpop.f32.mrf.mxu3  ;;  %v3800_v54 = vadd.f32 %v11342_v41, %v11494_v28  ;;  %v3802_v41 = vadd.f32 %v11388_v3, %v11494_v28  ;;  %v7341_v3 = vld [vmem:[%s12172_s5 + $0x200] sm:$0xf] }
 0x3a6   : > { %v3882_v20 = vadd.f32 %v3881_v61, %v3853_v59  ;;  %v7342_v18 = vor.u32 %v8034_v17, %v7341_v3  ;;  %v8025_v61 = vld [vmem:[%s12172_s5 + $0x1c0] sm:$0xf0] }
 0x3a7   : > { %v3829_v63 = vadd.f32 %v3828_v60, %v3800_v54  ;;  %v3831_v37 = vadd.f32 %v3830_v31, %v3802_v41  ;;  %v7306_v8 = vor.u32 %v8025_v61, %v7305_v52 }
 0x3a8   : > { %v3904_v21 = vmax.f32 %v3882_v20, 0.0  ;;  %4761 = vmatpush.bf16.msra.mxu2 %v7342_v18 }
 0x3a9   : > { %v3858_v51 = vadd.f32 %v3857_v53, %v3829_v63  ;;  %v3860_v57 = vadd.f32 %v3859_v49, %v3831_v37  ;;  %v8019_v49 = vld [vmem:[%s12172_s5 + $0x190] sm:$0xf0] }
 0x3aa   : > { %v3835_v13 = vpop.f32.mrf.mxu1 }
 0x3ab   : > { %v3836_v60 = vadd.f32 %v3835_v13, %v3807_v7  ;;  %v7417_v7 = vld [vmem:[%s12174_s7 + $0x30] sm:$0xf] }
 0x3ac   : > { %4762 = vmatpush.bf16.msra.mxu2 %v7330_v12  ;;  %v7433_v12 = vld [vmem:[%s12174_s7 + $0x50] sm:$0xf] }
 0x3ad   : > { %v3883_v47 = vpop.f32.mrf.mxu3  ;;  %v7434_v38 = vor.u32 %v8055_v11, %v7433_v12 }
 0x3ae   : > { %v3884_v39 = vadd.f32 %v3883_v47, %v3855_v26 }
 0x3b0   : > { %v3908_v15 = vmax.f32 %v3884_v39, 0.0  ;;  %4763 = vmatpush.bf16.msra.mxu2 %v7318_v22 }
 0x3b2   : > { %v11507_v6 = vpack.c.bf16 %v3908_v15, %v3904_v21  ;;  %v3838_v47 = vpop.f32.mrf.mxu1  ;;  %v7281_v15 = vld [vmem:[%s12172_s5 + $0x188] sm:$0xf] }
 0x3b3   : > { %v7282_v54 = vor.u32 %v8019_v49, %v7281_v15  ;;  %v3839_v62 = vadd.f32 %v3838_v47, %v3810_v48  ;;  %v7513_v15 = vld [vmem:[%s12174_s7 + $0xf0] sm:$0xf]  ;;  %v8075_v49 = vld [vmem:[%s12174_s7 + $0xf4] sm:$0xf0] }
 0x3b4   : > { %7379 = vmatmul.msk.bf16.vlgmr.msra.gmra.mxu3 %vm1772_vm0, %v11507_v6  ;;  %4651 = vmatmul.bf16.vlgmr.msrb.gmra.mxu2 %v11340_v10 }
 0x3b5   : > { %4738 = vmatmul.bf16.vlgmr.msrb.gmra.mxu1 %v11105_v25  ;;  %v3886_v16 = vpop.f32.mrf.mxu3  ;;  %v3862_v25 = vpop.f32.mrf.mxu2  ;;  %4764 = vmatpush.bf16.msra.mxu2 %v7306_v8 }
 0x3b6   : > { %v3887_v43 = vadd.f32 %v3886_v16, %v3858_v51  ;;  %v3863_v53 = vadd.f32 %v3862_v25, %v3834_v29  ;;  %v7377_v16 = vld [vmem:[%s12172_s5 + $0x248] sm:$0xf]  ;;  %v8051_v29 = vld [vmem:[%s12174_s7 + $0x34] sm:$0xf0] }
 0x3b7   : > { %v7378_v63 = vor.u32 %v8043_v45, %v7377_v16  ;;  %v7418_v61 = vor.u32 %v8051_v29, %v7417_v7 }
 0x3b8   : > { %v3912_v32 = vmax.f32 %v3887_v43, 0.0 }
 0x3b9   : > { %4795 = vmatpush.bf16.msra.mxu3 %v7378_v63  ;;  %v7451_v63 = vld [vmem:[%s12174_s7 + $0x78] sm:$0xf0] }
 0x3ba   : > { %v3840_v44 = vpop.f32.mrf.mxu1 }
 0x3bb   : > { %v3841_v37 = vadd.f32 %v3840_v44, %v3812_v35  ;;  %v7505_v44 = vld [vmem:[%s12174_s7 + $0xe0] sm:$0xf] }
 0x3bd   : > { %v3888_v30 = vpop.f32.mrf.mxu3  ;;  %v3864_v55 = vpop.f32.mrf.mxu2 }
 0x3be   : > { %v3889_v56 = vadd.f32 %v3888_v30, %v3860_v57  ;;  %v3865_v23 = vadd.f32 %v3864_v55, %v3836_v60  ;;  %v7425_v55 = vld [vmem:[%s12174_s7 + $0x40] sm:$0xf] }
 0x3bf   : > { %v7409_v60 = vld [vmem:[%s12174_s7 + $0x20] sm:$0xf] }
 0x3c0   : > { %v3916_v46 = vmax.f32 %v3889_v56, 0.0  ;;  %v8059_v56 = vld [vmem:[%s12174_s7 + $0x74] sm:$0xf0] }
 0x3c2   : > { %v11541_v14 = vpack.c.bf16 %v3916_v46, %v3912_v32  ;;  %v11604_v50 = vpop.f32.mrf.mxu1  ;;  %v7441_v46 = vld [vmem:[%s12174_s7 + $0x60] sm:$0xf] }
 0x3c4   : > { %7380 = vmatmul.msk.bf16.gmra.mxu3 %vm1772_vm0, %v11541_v14  ;;  %4656 = vmatmul.bf16.gmra.mxu2 %v11409_v19 }
 0x3c5   : > { %4743 = vmatmul.bf16.gmra.mxu1 %v11200_v42  ;;  %v3891_v58 = vpop.f32.mrf.mxu3  ;;  %v7293_v42 = vld [vmem:[%s12172_s5 + $0x1a0] sm:$0xf]  ;;  %v3867_v39 = vpop.f32.mrf.mxu2 }
 0x3c6   : > { %v7294_v40 = vor.u32 %v8022_v4, %v7293_v42  ;;  %v3892_v59 = vadd.f32 %v3891_v58, %v3863_v53  ;;  %v3868_v27 = vadd.f32 %v3867_v39, %v3839_v62  ;;  %v8053_v58 = vld [vmem:[%s12174_s7 + $0x44] sm:$0xf0]  ;;  %v7401_v4 = vld [vmem:[%s12174_s7 + $0x10] sm:$0xf] }
 0x3c7   : > { %v7426_v22 = vor.u32 %v8053_v58, %v7425_v55 }
 0x3c8   : > { %4765 = vmatpush.bf16.msra.mxu2 %v7294_v40  ;;  %v3920_v31 = vmax.f32 %v3892_v59, 0.0  ;;  %v8047_v40 = vld [vmem:[%s12174_s7 + $0x14] sm:$0xf0] }
 0x3ca   : > { %v11625_v24 = vpop.f32.mrf.mxu1 }
 0x3cc   : > { %4766 = vmatpush.bf16.msra.mxu2 %v7282_v54  ;;  %v7514_v54 = vor.u32 %v8075_v49, %v7513_v15 }
 0x3cd   : > { %v3893_v26 = vpop.f32.mrf.mxu3  ;;  %v3869_v0 = vpop.f32.mrf.mxu2 }
 0x3ce   : > { %v3894_v20 = vadd.f32 %v3893_v26, %v3865_v23  ;;  %v3870_v51 = vadd.f32 %v3869_v0, %v3841_v37  ;;  %v7402_v23 = vor.u32 %v8047_v40, %v7401_v4  ;;  %v7393_v26 = vld [vmem:[%s12174_s7] sm:$0xf]  ;;  %5134 = vmatpush.bf16.msra.mxu1 %v7514_v54  ;;  %v8073_v0 = vld [vmem:[%s12174_s7 + $0xe4] sm:$0xf0]  ;;  %v8048_v54 = vld [vmem:[%s12174_s7 + $0x24] sm:$0xf] }
 0x3cf   : > { %v7489_v40 = vld [vmem:[%s12174_s7 + $0xc0] sm:$0xf] }
 0x3d0   : > { %v3924_v21 = vmax.f32 %v3894_v20, 0.0  ;;  %v8045_v20 = vld [vmem:[%s12174_s7 + $0x4] sm:$0xf0] }
 0x3d1   : > { %v7394_v39 = vor.u32 %v8045_v20, %v7393_v26 }
 0x3d2   : > { %v11575_v1 = vpack.c.bf16 %v3924_v21, %v3920_v31  ;;  %v11652_v52 = vpop.f32.mrf.mxu1 }
 0x3d4   : > { %7381 = vmatmul.msk.bf16.gmra.mxu3 %vm1772_vm0, %v11575_v1  ;;  %4661 = vmatmul.bf16.gmra.mxu2 %v11474_v36 }
 0x3d5   : > { %4748 = vmatmul.bf16.gmra.mxu1 %v11291_v34  ;;  %v3896_v41 = vpop.f32.mrf.mxu3  ;;  %v11597_v34 = vpop.f32.mrf.mxu0 }
 0x3d6   : > { %v3897_v25 = vadd.f32 %v3896_v41, %v3868_v27  ;;  %v8058_v41 = vld [vmem:[%s12174_s7 + $0x74] sm:$0xf]  ;;  %v7506_v27 = vor.u32 %v8073_v0, %v7505_v44 }
 0x3d7   : > { %v7454_v62 = vor.u32 %v8058_v41, %v7451_v63  ;;  %v7411_v41 = vld [vmem:[%s12174_s7 + $0x28] sm:$0xf0] }
 0x3d8   : > { %v3928_v3 = vmax.f32 %v3897_v25, 0.0  ;;  %v8056_v25 = vld [vmem:[%s12174_s7 + $0x64] sm:$0xf]  ;;  %5135 = vmatpush.bf16.msra.mxu1 %v7506_v27 }
 0x3da   : > { %v11670_v59 = vpop.f32.mrf.mxu1 }
 0x3dd   : > { %v3898_v57 = vpop.f32.mrf.mxu3  ;;  %v11602_v28 = vpop.f32.mrf.mxu0 }
 0x3de   : > { %v3899_v43 = vadd.f32 %v3898_v57, %v3870_v51  ;;  %v7443_v57 = vld [vmem:[%s12174_s7 + $0x68] sm:$0xf0] }
 0x3e0   : > { %v3932_v17 = vmax.f32 %v3899_v43, 0.0 }
 0x3e2   : > { %v11591_v30 = vpack.c.bf16 %v3932_v17, %v3928_v3  ;;  %v11685_v21 = vpop.f32.mrf.mxu1  ;;  %v7446_v3 = vor.u32 %v8056_v25, %v7443_v57  ;;  %v8046_v25 = vld [vmem:[%s12174_s7 + $0x14] sm:$0xf] }
 0x3e4   : > { %7382 = vmatmul.msk.bf16.gmra.mxu3 %vm1772_vm0, %v11591_v30  ;;  %4666 = vmatmul.bf16.gmra.mxu2 %v11496_v9 }
 0x3e5   : > { %4753 = vmatmul.bf16.gmra.mxu1 %v11322_v33  ;;  %v7449_v33 = vld [vmem:[%s12174_s7 + $0x70] sm:$0xf] }
 0x3e6   : > { %v7450_v32 = vor.u32 %v8059_v56, %v7449_v33  ;;  %v7435_v56 = vld [vmem:[%s12174_s7 + $0x58] sm:$0xf0] }
 0x3e8   : > { %5105 = vmatpush.bf16.msra.mxu0 %v7450_v32  ;;  %v7497_v32 = vld [vmem:[%s12174_s7 + $0xd0] sm:$0xf] }
 0x3ea   : > { %v11713_v35 = vpop.f32.mrf.mxu1 }
 0x3f4   : > { %7383 = vmatmul.msk.bf16.vlgmr.msrb.gmra.mxu3 %vm1772_vm0, %v11507_v6  ;;  %4767 = vmatmul.bf16.vlgmr.msra.gmra.mxu2 %v11340_v10  ;;  %v11617_v10 = vpop.f32.mrf.mxu0 }
 0x3f5   : > { %5192 = vmatpush.bf16.msrb.mxu3 %v7454_v62  ;;  %v7414_v62 = vor.u32 %v8048_v54, %v7411_v41  ;;  %v7475_v54 = vld [vmem:[%s12174_s7 + $0xa8] sm:$0xf0] }
 0x3f7   : > { %v11609_v18 = vpop.f32.mrf.mxu2 }
 0x3f9   : > { %5193 = vmatpush.bf16.msrb.mxu3 %v7446_v3 }
 0x3fc   : > { %v11635_v2 = vpop.f32.mrf.mxu0 }
 0x3ff   : > { %v11633_v13 = vpop.f32.mrf.mxu2 }
 0x404   : > { %7384 = vmatmul.msk.bf16.gmra.mxu3 %vm1772_vm0, %v11541_v14  ;;  %4772 = vmatmul.bf16.gmra.mxu2 %v11409_v19  ;;  %v8057_v19 = vld [vmem:[%s12174_s7 + $0x64] sm:$0xf0]  ;;  %v11662_v53 = vpop.f32.mrf.mxu0 }
 0x405   : > { %v7442_v5 = vor.u32 %v8057_v19, %v7441_v46 }
 0x407   : > { %5106 = vmatpush.bf16.msra.mxu0 %v7442_v5  ;;  %v11654_v8 = vpop.f32.mrf.mxu2 }
 0x40b   : > { %5107 = vmatpush.bf16.msra.mxu0 %v7434_v38  ;;  %v11751_v38 = vpop.f32.mrf.mxu1 }
 0x40c   : > { %v11683_v31 = vpop.f32.mrf.mxu0 }
 0x40f   : > { %5108 = vmatpush.bf16.msra.mxu0 %v7426_v22  ;;  %v11678_v47 = vpop.f32.mrf.mxu2 }
 0x413   : > { %5109 = vmatpush.bf16.msra.mxu0 %v7418_v61  ;;  %v11794_v63 = vpop.f32.mrf.mxu1 }
 0x414   : > { %7385 = vmatmul.msk.bf16.gmra.mxu3 %vm1772_vm0, %v11575_v1  ;;  %4777 = vmatmul.bf16.gmra.mxu2 %v11474_v36  ;;  %v8049_v36 = vld [vmem:[%s12174_s7 + $0x24] sm:$0xf0]  ;;  %v11695_v16 = vpop.f32.mrf.mxu0 }
 0x415   : > { %v7410_v42 = vor.u32 %v8049_v36, %v7409_v60  ;;  %v8050_v36 = vld [vmem:[%s12174_s7 + $0x34] sm:$0xf] }
 0x417   : > { %5110 = vmatpush.bf16.msra.mxu0 %v7410_v42  ;;  %v11693_v48 = vpop.f32.mrf.mxu2  ;;  %v7419_v42 = vld [vmem:[%s12174_s7 + $0x38] sm:$0xf0] }
 0x418   : > { %v7422_v4 = vor.u32 %v8050_v36, %v7419_v42  ;;  %v7473_v36 = vld [vmem:[%s12174_s7 + $0xa0] sm:$0xf]  ;;  %v8065_v42 = vld [vmem:[%s12174_s7 + $0xa4] sm:$0xf0] }
 0x41b   : > { %5111 = vmatpush.bf16.msra.mxu0 %v7402_v23  ;;  %v8069_v23 = vld [vmem:[%s12174_s7 + $0xc4] sm:$0xf0] }
 0x41c   : > { %v11731_v43 = vpop.f32.mrf.mxu0  ;;  %v7490_v20 = vor.u32 %v8069_v23, %v7489_v40  ;;  %v7474_v23 = vor.u32 %v8065_v42, %v7473_v36 }
 0x41f   : > { %5112 = vmatpush.bf16.msra.mxu0 %v7394_v39  ;;  %v7515_v39 = vld [vmem:[%s12174_s7 + $0xf8] sm:$0xf0] }
 0x424   : > { %7386 = vmatmul.msk.bf16.gmra.mxu3 %vm1772_vm0, %v11591_v30  ;;  %4782 = vmatmul.bf16.gmra.mxu2 %v11496_v9  ;;  %v11700_v9 = vld [vmem:[%s12173_s6] sm:$0x7]  ;;  %v11761_v61 = vpop.f32.mrf.mxu0 }
 0x425   : > { %v11703_v45 = vperm.slane %v11700_v9, 0 }
 0x427   : > { %v4479_v51 = vadd.f32 %v11597_v34, %v11703_v45  ;;  %v4481_v17 = vadd.f32 %v11602_v28, %v11703_v45  ;;  %v8054_v34 = vld [vmem:[%s12174_s7 + $0x54] sm:$0xf]  ;;  %v4484_v15 = vadd.f32 %v11617_v10, %v11703_v45  ;;  %v4486_v44 = vadd.f32 %v11635_v2, %v11703_v45  ;;  %v8072_v10 = vld [vmem:[%s12174_s7 + $0xe4] sm:$0xf]  ;;  %v7403_v2 = vld [vmem:[%s12174_s7 + $0x18] sm:$0xf0] }
 0x428   : > { %v7438_v28 = vor.u32 %v8054_v34, %v7435_v56 }
 0x429   : > { %v4508_v33 = vadd.f32 %v11604_v50, %v4479_v51  ;;  %v4510_v46 = vadd.f32 %v11625_v24, %v4481_v17  ;;  %v8071_v50 = vld [vmem:[%s12174_s7 + $0xd4] sm:$0xf0]  ;;  %v8052_v24 = vld [vmem:[%s12174_s7 + $0x44] sm:$0xf]  ;;  %v4513_v0 = vadd.f32 %v11652_v52, %v4484_v15  ;;  %v7481_v52 = vld [vmem:[%s12174_s7 + $0xb0] sm:$0xf]  ;;  %v4515_v57 = vadd.f32 %v11670_v59, %v4486_v44 }
 0x42a   : > { %v7498_v5 = vor.u32 %v8071_v50, %v7497_v32  ;;  %5194 = vmatpush.bf16.msrb.mxu3 %v7438_v28  ;;  %v7406_v17 = vor.u32 %v8046_v25, %v7403_v2  ;;  %v7467_v25 = vld [vmem:[%s12174_s7 + $0x98] sm:$0xf0] }
 0x42b   : > { %v4537_v19 = vadd.f32 %v11609_v18, %v4508_v33  ;;  %v4539_v12 = vadd.f32 %v11633_v13, %v4510_v46  ;;  %v7427_v18 = vld [vmem:[%s12174_s7 + $0x48] sm:$0xf0]  ;;  %v4542_v3 = vadd.f32 %v11654_v8, %v4513_v0  ;;  %v8067_v33 = vld [vmem:[%s12174_s7 + $0xb4] sm:$0xf0]  ;;  %v4544_v32 = vadd.f32 %v11678_v47, %v4515_v57  ;;  %v7499_v8 = vld [vmem:[%s12174_s7 + $0xd8] sm:$0xf0] }
 0x42c   : > { %5136 = vmatpush.bf16.msra.mxu1 %v7498_v5  ;;  %v7430_v7 = vor.u32 %v8052_v24, %v7427_v18  ;;  %v11821_v34 = vpop.f32.mrf.mxu0  ;;  %v7482_v56 = vor.u32 %v8067_v33, %v7481_v52  ;;  %v8044_v5 = vld [vmem:[%s12174_s7 + $0x4] sm:$0xf]  ;;  %v7395_v47 = vld [vmem:[%s12174_s7 + $0x8] sm:$0xf0]  ;;  %v11842_v18 = vpop.f32.mrf.mxu1  ;;  %v8061_v33 = vld [vmem:[%s12174_s7 + $0x84] sm:$0xf0] }
 0x42d   : > { %v7491_v24 = vld [vmem:[%s12174_s7 + $0xc8] sm:$0xf0] }
 0x42e   : > { %5195 = vmatpush.bf16.msrb.mxu3 %v7430_v7 }
 0x430   : > { %5137 = vmatpush.bf16.msra.mxu1 %v7490_v20 }
 0x432   : > { %5196 = vmatpush.bf16.msrb.mxu3 %v7422_v4  ;;  %v8066_v4 = vld [vmem:[%s12174_s7 + $0xb4] sm:$0xf] }
 0x434   : > { %7387 = vmatmul.msk.bf16.vlgmr.msra.gmra.mxu3 %vm1772_vm0, %v11507_v6  ;;  %v11721_v6 = vpop.f32.mrf.mxu2  ;;  %5138 = vmatpush.bf16.msra.mxu1 %v7482_v56  ;;  %v11860_v40 = vpop.f32.mrf.mxu0 }
 0x435   : > { %v11884_v0 = vpop.f32.mrf.mxu1 }
 0x436   : > { %5197 = vmatpush.bf16.msrb.mxu3 %v7414_v62 }
 0x437   : > { %v4565_v37 = vpop.f32.mrf.mxu3 }
 0x438   : > { %v4566_v11 = vadd.f32 %v4565_v37, %v4537_v19  ;;  %v7507_v37 = vld [vmem:[%s12174_s7 + $0xe8] sm:$0xf0]  ;;  %v8070_v19 = vld [vmem:[%s12174_s7 + $0xd4] sm:$0xf]  ;;  %5139 = vmatpush.bf16.msra.mxu1 %v7474_v23 }
 0x439   : > { %v7510_v51 = vor.u32 %v8072_v10, %v7507_v37  ;;  %v7502_v28 = vor.u32 %v8070_v19, %v7499_v8 }
 0x43a   : > { %v4817_v29 = vmax.f32 %v4566_v11, 0.0  ;;  %5198 = vmatpush.bf16.msrb.mxu3 %v7406_v17  ;;  %v7457_v17 = vld [vmem:[%s12174_s7 + $0x80] sm:$0xf] }
 0x43b   : > { %v7458_v56 = vor.u32 %v8061_v33, %v7457_v17 }
 0x43c   : > { %v11759_v22 = vpop.f32.mrf.mxu2  ;;  %v11895_v57 = vpop.f32.mrf.mxu0 }
 0x43f   : > { %v4567_v55 = vpop.f32.mrf.mxu3 }
 0x440   : > { %v4568_v58 = vadd.f32 %v4567_v55, %v4539_v12  ;;  %v7398_v12 = vor.u32 %v8044_v5, %v7395_v47  ;;  %v4494_v47 = vadd.f32 %v11695_v16, %v11703_v45 }
 0x442   : > { %v4820_v13 = vmax.f32 %v4568_v58, 0.0  ;;  %v8068_v58 = vld [vmem:[%s12174_s7 + $0xc4] sm:$0xf]  ;;  %5199 = vmatpush.bf16.msrb.mxu3 %v7398_v12 }
 0x443   : > { %v7494_v7 = vor.u32 %v8068_v58, %v7491_v24  ;;  %v4523_v58 = vadd.f32 %v11751_v38, %v4494_v47  ;;  %v8080_v24 = vld [vmem:[%s12174_s7 + $0x124] sm:$0xf] }
 0x444   : > { %v11763_v60 = vpack.c.bf16 %v4820_v13, %v4817_v29  ;;  %7388 = vmatmul.msk.bf16.gmra.mxu3 %vm1772_vm0, %v11541_v14  ;;  %v8074_v14 = vld [vmem:[%s12174_s7 + $0xf4] sm:$0xf]  ;;  %v11805_v27 = vpop.f32.mrf.mxu2  ;;  %v11934_v36 = vpop.f32.mrf.mxu0 }
 0x445   : > { %v7518_v49 = vor.u32 %v8074_v14, %v7515_v39  ;;  %v7483_v14 = vld [vmem:[%s12174_s7 + $0xb8] sm:$0xf0]  ;;  %v4491_v39 = vadd.f32 %v11683_v31, %v11703_v45  ;;  %v8063_v31 = vld [vmem:[%s12174_s7 + $0x94] sm:$0xf0] }
 0x446   : > { %5113 = vmatmul.bf16.vlgmr.msra.gmra.mxu0 %v11763_v60  ;;  %v7486_v20 = vor.u32 %v8066_v4, %v7483_v14  ;;  %v4552_v4 = vadd.f32 %v11759_v22, %v4523_v58 }
 0x447   : > { %v4570_v26 = vpop.f32.mrf.mxu3  ;;  %5221 = vmatpush.bf16.msrb.mxu0 %v7518_v49  ;;  %v8064_v49 = vld [vmem:[%s12174_s7 + $0xa4] sm:$0xf] }
 0x448   : > { %v4571_v46 = vadd.f32 %v4570_v26, %v4542_v3  ;;  %v4489_v26 = vadd.f32 %v11662_v53, %v11703_v45  ;;  %v7478_v41 = vor.u32 %v8064_v49, %v7475_v54  ;;  %v7465_v53 = vld [vmem:[%s12174_s7 + $0x90] sm:$0xf] }
 0x449   : > { %v7466_v44 = vor.u32 %v8063_v31, %v7465_v53  ;;  %v7529_v53 = vld [vmem:[%s12174_s7 + $0x110] sm:$0xf] }
 0x44a   : > { %v4823_v11 = vmax.f32 %v4571_v46, 0.0  ;;  %v4518_v15 = vadd.f32 %v11685_v21, %v4489_v26  ;;  %v4520_v21 = vadd.f32 %v11713_v35, %v4491_v39  ;;  %v7459_v46 = vld [vmem:[%s12174_s7 + $0x88] sm:$0xf0] }
 0x44b   : > { %5222 = vmatpush.bf16.msrb.mxu0 %v7510_v51  ;;  %5140 = vmatpush.bf16.msra.mxu1 %v7466_v44  ;;  %v8062_v51 = vld [vmem:[%s12174_s7 + $0x94] sm:$0xf] }
 0x44c   : > { %v11848_v13 = vpop.f32.mrf.mxu2  ;;  %v4547_v62 = vadd.f32 %v11693_v48, %v4518_v15  ;;  %v4549_v10 = vadd.f32 %v11721_v6, %v4520_v21  ;;  %v7470_v48 = vor.u32 %v8062_v51, %v7467_v25  ;;  %v11941_v15 = vperm.slane %v11700_v9, 1  ;;  %v4606_v22 = vpop.f32.mrf.mxu0 }
 0x44e   : > { %v4597_v54 = vadd.f32 %v11821_v34, %v11941_v15  ;;  %v4600_v17 = vadd.f32 %v11860_v40, %v11941_v15  ;;  %v7521_v40 = vld [vmem:[%s12174_s7 + $0x100] sm:$0xf] }
 0x44f   : > { %v4572_v59 = vpop.f32.mrf.mxu3  ;;  %5223 = vmatpush.bf16.msrb.mxu0 %v7502_v28  ;;  %5141 = vmatpush.bf16.msra.mxu1 %v7458_v56  ;;  %v8081_v28 = vld [vmem:[%s12174_s7 + $0x124] sm:$0x30] }
 0x450   : > { %v4573_v50 = vadd.f32 %v4572_v59, %v4544_v32  ;;  %v8060_v32 = vld [vmem:[%s12174_s7 + $0x84] sm:$0xf]  ;;  %v7537_v59 = vld [vmem:[%s12174_s7 + $0x120] sm:$0xf] }
 0x451   : > { %v7462_v8 = vor.u32 %v8060_v32, %v7459_v46 }
 0x452   : > { %v4826_v55 = vmax.f32 %v4573_v50, 0.0  ;;  %v11920_v50 = vpop.f32.mrf.mxu1 }
 0x453   : > { %5224 = vmatpush.bf16.msrb.mxu0 %v7494_v7  ;;  %v7539_v7 = vld [vmem:[%s12174_s7 + $0x128] sm:$0x30]  ;;  %v4629_v56 = vadd.f32 %v11920_v50, %v4600_v17 }
 0x454   : > { %7389 = vmatmul.msk.bf16.gmra.mxu3 %vm1772_vm0, %v11575_v1  ;;  %v11846_v29 = vpack.c.bf16 %v4826_v55, %v4823_v11  ;;  %v11893_v2 = vpop.f32.mrf.mxu2  ;;  %v4496_v55 = vadd.f32 %v11731_v43, %v11703_v45  ;;  %v7542_v16 = vor.u32 %v8080_v24, %v7539_v7  ;;  %v4605_v7 = vadd.f32 %v11934_v36, %v11941_v15 }
 0x456   : > { %5118 = vmatmul.bf16.gmra.mxu0 %v11846_v29  ;;  %v4525_v42 = vadd.f32 %v11794_v63, %v4496_v55  ;;  %v5103_v45 = vsel %vm5098_vm3, %v7542_v16, 0 }
 0x457   : > { %v4575_v1 = vpop.f32.mrf.mxu3  ;;  %5225 = vmatpush.bf16.msrb.mxu0 %v7486_v20  ;;  %5255 = vmatpush.bf16.msrb.mxu1 %v5103_v45  ;;  %v8076_v45 = vld [vmem:[%s12174_s7 + $0x104] sm:$0xf] }
 0x458   : > { %v4576_v37 = vadd.f32 %v4575_v1, %v4547_v62  ;;  %v4554_v43 = vadd.f32 %v11805_v27, %v4525_v42  ;;  %v4595_v27 = vadd.f32 %v11761_v61, %v11941_v15  ;;  %v4626_v62 = vadd.f32 %v11884_v0, %v4597_v54  ;;  %v8078_v0 = vld [vmem:[%s12174_s7 + $0x114] sm:$0xf] }
 0x459   : > { %v4607_v42 = vadd.f32 %v4606_v22, %v11941_v15 }
 0x45a   : > { %v4829_v3 = vmax.f32 %v4576_v37, 0.0  ;;  %v4630_v14 = vpop.f32.mrf.mxu1  ;;  %v4655_v34 = vadd.f32 %v11893_v2, %v4626_v62 }
 0x45b   : > { %5226 = vmatpush.bf16.msrb.mxu0 %v7478_v41  ;;  %v4624_v41 = vadd.f32 %v11842_v18, %v4595_v27  ;;  %v11961_v18 = vpop.f32.mrf.mxu0 }
 0x45c   : > { %v4657_v12 = vpop.f32.mrf.mxu2 }
 0x45d   : > { %v4653_v44 = vadd.f32 %v11848_v13, %v4624_v41  ;;  %v7531_v13 = vld [vmem:[%s12174_s7 + $0x118] sm:$0xf0]  ;;  %v4658_v46 = vadd.f32 %v4657_v12, %v4629_v56 }
 0x45e   : > { %v7534_v2 = vor.u32 %v8078_v0, %v7531_v13  ;;  %v11996_v13 = vperm.slane %v11700_v9, 2 }
 0x45f   : > { %v4577_v35 = vpop.f32.mrf.mxu3  ;;  %5227 = vmatpush.bf16.msrb.mxu0 %v7470_v48 }
 0x460   : > { %v4578_v52 = vadd.f32 %v4577_v35, %v4549_v10  ;;  %5256 = vmatpush.bf16.msrb.mxu1 %v7534_v2 }
 0x462   : > { %v4832_v6 = vmax.f32 %v4578_v52, 0.0  ;;  %v4633_v31 = vpop.f32.mrf.mxu1 }
 0x463   : > { %5228 = vmatpush.bf16.msrb.mxu0 %v7462_v8  ;;  %v4611_v33 = vpop.f32.mrf.mxu0 }
 0x464   : > { %7390 = vmatmul.msk.bf16.gmra.mxu3 %vm1772_vm0, %v11591_v30  ;;  %v11911_v19 = vpack.c.bf16 %v4832_v6, %v4829_v3  ;;  %v7538_v30 = vor.u32 %v8081_v28, %v7537_v59  ;;  %v4659_v39 = vpop.f32.mrf.mxu2 }
 0x466   : > { %5123 = vmatmul.bf16.gmra.mxu0 %v11911_v19  ;;  %v5100_v11 = vsel %vm5098_vm3, %v7538_v30, 0 }
 0x467   : > { %v4580_v5 = vpop.f32.mrf.mxu3  ;;  %5168 = vmatpush.bf16.msrb.mxu2 %v5100_v11 }
 0x468   : > { %v4581_v38 = vadd.f32 %v4580_v5, %v4552_v4  ;;  %v4634_v4 = vadd.f32 %v4633_v31, %v4605_v7  ;;  %v4610_v31 = vadd.f32 %v11961_v18, %v11941_v15 }
 0x46a   : > { %v4835_v26 = vmax.f32 %v4581_v38, 0.0  ;;  %v4635_v52 = vpop.f32.mrf.mxu1 }
 0x46b   : > { %v4710_v58 = vpop.f32.mrf.mxu0 }
 0x46c   : > { %v4662_v61 = vpop.f32.mrf.mxu2  ;;  %v4711_v2 = vadd.f32 %v4710_v58, %v11996_v13 }
 0x46f   : > { %v4582_v1 = vpop.f32.mrf.mxu3 }
 0x470   : > { %v4583_v23 = vadd.f32 %v4582_v1, %v4554_v43  ;;  %v4636_v1 = vadd.f32 %v4635_v52, %v4607_v42 }
 0x472   : > { %v4838_v20 = vmax.f32 %v4583_v23, 0.0  ;;  %v4638_v28 = vpop.f32.mrf.mxu1  ;;  %v4663_v23 = vadd.f32 %v4662_v61, %v4634_v4 }
 0x473   : > { %v4639_v62 = vadd.f32 %v4638_v28, %v4610_v31 }
 0x474   : > { %5200 = vmatmul.bf16.vlgmr.msrb.gmra.mxu3 %v11763_v60  ;;  %v11944_v63 = vpack.c.bf16 %v4838_v20, %v4835_v26  ;;  %v8079_v60 = vld [vmem:[%s12174_s7 + $0x114] sm:$0xf0]  ;;  %v4664_v3 = vpop.f32.mrf.mxu2 }
 0x475   : > { %v7530_v21 = vor.u32 %v8079_v60, %v7529_v53  ;;  %v4665_v26 = vadd.f32 %v4664_v3, %v4636_v1 }
 0x476   : > { %5128 = vmatmul.bf16.gmra.mxu0 %v11944_v63 }
 0x477   : > { %v4681_v49 = vpop.f32.mrf.mxu3  ;;  %5169 = vmatpush.bf16.msrb.mxu2 %v7530_v21  ;;  %v4612_v21 = vadd.f32 %v4611_v33, %v11941_v15 }
 0x478   : > { %v4682_v10 = vadd.f32 %v4681_v49, %v4653_v44 }
 0x47a   : > { %v4818_v25 = vmax.f32 %v4682_v10, 0.0  ;;  %v4640_v16 = vpop.f32.mrf.mxu1 }
 0x47b   : > { %v4641_v44 = vadd.f32 %v4640_v16, %v4612_v21 }
 0x47c   : > { %v4667_v47 = vpop.f32.mrf.mxu2 }
 0x47d   : > { %v4668_v61 = vadd.f32 %v4667_v47, %v4639_v62 }
 0x47f   : > { %v4683_v37 = vpop.f32.mrf.mxu3 }
 0x480   : > { %v4684_v51 = vadd.f32 %v4683_v37, %v4655_v34 }
 0x482   : > { %v4821_v35 = vmax.f32 %v4684_v51, 0.0  ;;  %v4739_v27 = vpop.f32.mrf.mxu1 }
 0x483   : > { %v4740_v17 = vadd.f32 %v4739_v27, %v4711_v2 }
 0x484   : > { %v4842_v48 = vpack.c.bf16 %v4821_v35, %v4818_v25  ;;  %5205 = vmatmul.bf16.gmra.mxu3 %v11846_v29  ;;  %v4602_v29 = vadd.f32 %v11895_v57, %v11941_v15  ;;  %v8077_v57 = vld [vmem:[%s12174_s7 + $0x104] sm:$0xf0]  ;;  %v4669_v43 = vpop.f32.mrf.mxu2 }
 0x485   : > { %v7522_v50 = vor.u32 %v8077_v57, %v7521_v40  ;;  %v4670_v10 = vadd.f32 %v4669_v43, %v4641_v44 }
 0x486   : > { %5142 = vmatmul.bf16.vlgmr.msra.gmra.mxu1 %v4842_v48  ;;  %5229 = vmatmul.bf16.vlgmr.msrb.gmra.mxu0 %v4842_v48  ;;  %v4631_v32 = vadd.f32 %v4630_v14, %v4602_v29  ;;  %v4712_v14 = vpop.f32.mrf.mxu0 }
 0x487   : > { %v4686_v6 = vpop.f32.mrf.mxu3  ;;  %5170 = vmatpush.bf16.msrb.mxu2 %v7522_v50 }
 0x488   : > { %v4660_v8 = vadd.f32 %v4659_v39, %v4631_v32  ;;  %v4687_v59 = vadd.f32 %v4686_v6, %v4658_v46  ;;  %v4713_v6 = vadd.f32 %v4712_v14, %v11996_v13 }
 0x48a   : > { %v4824_v11 = vmax.f32 %v4687_v59, 0.0  ;;  %v4741_v34 = vpop.f32.mrf.mxu1 }
 0x48b   : > { %v4742_v29 = vadd.f32 %v4741_v34, %v4713_v6 }
 0x48c   : > { %v4768_v41 = vpop.f32.mrf.mxu2 }
 0x48d   : > { %v4769_v56 = vadd.f32 %v4768_v41, %v4740_v17 }
 0x48e   : > { %v4715_v53 = vpop.f32.mrf.mxu0 }
 0x48f   : > { %v4688_v5 = vpop.f32.mrf.mxu3  ;;  %v4716_v40 = vadd.f32 %v4715_v53, %v11996_v13 }
 0x490   : > { %v4689_v30 = vadd.f32 %v4688_v5, %v4660_v8 }
 0x492   : > { %v4827_v55 = vmax.f32 %v4689_v30, 0.0  ;;  %v4744_v18 = vpop.f32.mrf.mxu1 }
 0x493   : > { %v4745_v58 = vadd.f32 %v4744_v18, %v4716_v40  ;;  %v8087_v40 = vld [vmem:[%s12176_s9 + $0x28] sm:$0xff] }
 0x494   : > { %5210 = vmatmul.bf16.gmra.mxu3 %v11911_v19  ;;  %v4845_v12 = vpack.c.bf16 %v4827_v55, %v4824_v11  ;;  %v7523_v19 = vld [vmem:[%s12174_s7 + $0x108] sm:$0xf0]  ;;  %v4770_v51 = vpop.f32.mrf.mxu2 }
 0x495   : > { %v7526_v38 = vor.u32 %v8076_v45, %v7523_v19  ;;  %v4771_v32 = vadd.f32 %v4770_v51, %v4742_v29 }
 0x496   : > { %5147 = vmatmul.bf16.gmra.mxu1 %v4845_v12  ;;  %5234 = vmatmul.bf16.gmra.mxu0 %v4845_v12  ;;  %v4717_v35 = vpop.f32.mrf.mxu0 }
 0x497   : > { %v4691_v24 = vpop.f32.mrf.mxu3  ;;  %5257 = vmatpush.bf16.msrb.mxu1 %v7526_v38  ;;  %v4718_v57 = vadd.f32 %v4717_v35, %v11996_v13 }
 0x498   : > { %v4692_v36 = vadd.f32 %v4691_v24, %v4663_v23 }
 0x49a   : > { %v4830_v22 = vmax.f32 %v4692_v36, 0.0  ;;  %v4746_v9 = vpop.f32.mrf.mxu1 }
 0x49b   : > { %v4747_v12 = vadd.f32 %v4746_v9, %v4718_v57 }
 0x49c   : > { %v4773_v3 = vpop.f32.mrf.mxu2 }
 0x49d   : > { %v4774_v24 = vadd.f32 %v4773_v3, %v4745_v58 }
 0x49e   : > { %v4720_v33 = vpop.f32.mrf.mxu0 }
 0x49f   : > { %v4693_v20 = vpop.f32.mrf.mxu3  ;;  %v4721_v36 = vadd.f32 %v4720_v33, %v11996_v13 }
 0x4a0   : > { %v4694_v39 = vadd.f32 %v4693_v20, %v4665_v26 }
 0x4a2   : > { %v4833_v49 = vmax.f32 %v4694_v39, 0.0  ;;  %v4749_v50 = vpop.f32.mrf.mxu1 }
 0x4a4   : > { %5215 = vmatmul.bf16.gmra.mxu3 %v11944_v63  ;;  %v4848_v54 = vpack.c.bf16 %v4833_v49, %v4830_v22  ;;  %v4775_v30 = vpop.f32.mrf.mxu2  ;;  %v4750_v22 = vadd.f32 %v4749_v50, %v4721_v36 }
 0x4a5   : > { %v4776_v16 = vadd.f32 %v4775_v30, %v4747_v12 }
 0x4a6   : > { %5152 = vmatmul.bf16.gmra.mxu1 %v4848_v54  ;;  %5239 = vmatmul.bf16.gmra.mxu0 %v4848_v54  ;;  %v4722_v11 = vpop.f32.mrf.mxu0 }
 0x4a7   : > { %v4696_v60 = vpop.f32.mrf.mxu3  ;;  %v4723_v39 = vadd.f32 %v4722_v11, %v11996_v13 }
 0x4a8   : > { %v4697_v37 = vadd.f32 %v4696_v60, %v4668_v61 }
 0x4aa   : > { %v4836_v48 = vmax.f32 %v4697_v37, 0.0  ;;  %v4751_v23 = vpop.f32.mrf.mxu1 }
 0x4ab   : > { %v4752_v49 = vadd.f32 %v4751_v23, %v4723_v39  ;;  %v8084_v23 = vld [vmem:[%s12176_s9 + $0x10] sm:$0xff] }
 0x4ac   : > { %v4778_v7 = vpop.f32.mrf.mxu2 }
 0x4ad   : > { %v4779_v27 = vadd.f32 %v4778_v7, %v4750_v22  ;;  %v8083_v22 = vld [vmem:[%s12176_s9 + $0x8] sm:$0xff] }
 0x4ae   : > { %v4725_v4 = vpop.f32.mrf.mxu0 }
 0x4af   : > { %v4698_v25 = vpop.f32.mrf.mxu3  ;;  %v4726_v37 = vadd.f32 %v4725_v4, %v11996_v13 }
 0x4b0   : > { %v4699_v63 = vadd.f32 %v4698_v25, %v4670_v10 }
 0x4b2   : > { %v4839_v0 = vmax.f32 %v4699_v63, 0.0  ;;  %v4754_v53 = vpop.f32.mrf.mxu1 }
 0x4b3   : > { %v4755_v63 = vadd.f32 %v4754_v53, %v4726_v37 }
 0x4b4   : > { %v4851_v52 = vpack.c.bf16 %v4839_v0, %v4836_v48  ;;  %v4780_v14 = vpop.f32.mrf.mxu2 }
 0x4b5   : > { %v4781_v54 = vadd.f32 %v4780_v14, %v4752_v49  ;;  %v8091_v14 = vld [vmem:[%s12176_s9 + $0x48] sm:$0xff] }
 0x4b6   : > { %5157 = vmatmul.bf16.gmra.mxu1 %v4851_v52  ;;  %5244 = vmatmul.bf16.gmra.mxu0 %v4851_v52  ;;  %v4727_v20 = vpop.f32.mrf.mxu0 }
 0x4b7   : > { %v4797_v15 = vpop.f32.mrf.mxu3  ;;  %v4728_v25 = vadd.f32 %v4727_v20, %v11996_v13  ;;  %v8089_v13 = vld [vmem:[%s12176_s9 + $0x38] sm:$0xff] }
 0x4b8   : > { %v4798_v46 = vadd.f32 %v4797_v15, %v4769_v56  ;;  %v5327_v56 = vld [vmem:[%s12176_s9 + $0x60] sm:$0xf]  ;;  %5424 = vmatpush.bf16.msra.mxu2 %v8089_v13 }
 0x4ba   : > { %v4819_v28 = vmax.f32 %v4798_v46, 0.0  ;;  %v4756_v51 = vpop.f32.mrf.mxu1  ;;  %v4891_v46 = vld [vmem:[%s12175_s8] sm:$0x3] }
 0x4bb   : > { %v4757_v0 = vadd.f32 %v4756_v51, %v4728_v25  ;;  %v4893_v9 = vperm.slane %v4891_v46, 0 }
 0x4bc   : > { %v4783_v21 = vpop.f32.mrf.mxu2 }
 0x4bd   : > { %v4784_v52 = vadd.f32 %v4783_v21, %v4755_v63  ;;  %v12070_v63 = vperm.slane %v4891_v46, 1 }
 0x4bf   : > { %v4799_v8 = vpop.f32.mrf.mxu3 }
 0x4c0   : > { %v4800_v59 = vadd.f32 %v4799_v8, %v4771_v32  ;;  %v5381_v32 = vunpack.c.l.b16 %v5327_v56 }
 0x4c2   : > { %v4822_v5 = vmax.f32 %v4800_v59, 0.0  ;;  %v5394_v8 = vpack.c.b16 %v5381_v32, %v5381_v32 }
 0x4c3   : > { %v5114_v62 = vpop.f32.mrf.mxu0 }
 0x4c4   : > { %v4843_v47 = vpack.c.bf16 %v4822_v5, %v4819_v28  ;;  %v4785_v35 = vpop.f32.mrf.mxu2  ;;  %v5422_v59 = vsel %vm5420_vm5, %v5394_v8, 0  ;;  %v8088_v5 = vld [vmem:[%s12176_s9 + $0x30] sm:$0xff]  ;;  %v5115_v30 = vadd.f32 %v5114_v62, %v4893_v9 }
 0x4c5   : > { %v4786_v18 = vadd.f32 %v4785_v35, %v4757_v0  ;;  %5456 = vmatpush.bf16.msra.mxu3 %v5422_v59  ;;  %5425 = vmatpush.bf16.msra.mxu2 %v8088_v5 }
 0x4c6   : > { %7543 = vmatmul.msk.bf16.vlgmr.msrb.gmra.mxu2 %vm5085_vm4, %v4843_v47  ;;  %7547 = vmatmul.msk.bf16.vlgmr.msrb.gmra.mxu1 %vm5085_vm4, %v4843_v47 }
 0x4c7   : > { %v4802_v55 = vpop.f32.mrf.mxu3 }
 0x4c8   : > { %v4803_v42 = vadd.f32 %v4802_v55, %v4774_v24  ;;  %v8093_v55 = vld [vmem:[%s12176_s9 + $0x58] sm:$0xff]  ;;  %v8086_v24 = vld [vmem:[%s12176_s9 + $0x20] sm:$0xff] }
 0x4c9   : > { %5457 = vmatpush.bf16.msra.mxu3 %v8093_v55  ;;  %5426 = vmatpush.bf16.msra.mxu2 %v8087_v40 }
 0x4ca   : > { %v4825_v43 = vmax.f32 %v4803_v42, 0.0 }
 0x4cb   : > { %v5116_v48 = vpop.f32.mrf.mxu0 }
 0x4cc   : > { %v5117_v58 = vadd.f32 %v5116_v48, %v4893_v9 }
 0x4cd   : > { %5427 = vmatpush.bf16.msra.mxu2 %v8086_v24 }
 0x4cf   : > { %v4804_v45 = vpop.f32.mrf.mxu3 }
 0x4d0   : > { %v4805_v19 = vadd.f32 %v4804_v45, %v4776_v16  ;;  %v8092_v45 = vld [vmem:[%s12176_s9 + $0x50] sm:$0xff] }
 0x4d1   : > { %5458 = vmatpush.bf16.msra.mxu3 %v8092_v45 }
 0x4d2   : > { %v4828_v38 = vmax.f32 %v4805_v19, 0.0  ;;  %v8085_v19 = vld [vmem:[%s12176_s9 + $0x18] sm:$0xff] }
 0x4d3   : > { %v5119_v29 = vpop.f32.mrf.mxu0  ;;  %5428 = vmatpush.bf16.msra.mxu2 %v8085_v19 }
 0x4d4   : > { %v4846_v1 = vpack.c.bf16 %v4828_v38, %v4825_v43  ;;  %v5120_v7 = vadd.f32 %v5119_v29, %v4893_v9 }
 0x4d5   : > { %5459 = vmatpush.bf16.msra.mxu3 %v8091_v14 }
 0x4d6   : > { %7544 = vmatmul.msk.bf16.gmra.mxu2 %vm5085_vm4, %v4846_v1  ;;  %7548 = vmatmul.msk.bf16.gmra.mxu1 %vm5085_vm4, %v4846_v1 }
 0x4d7   : > { %v4807_v26 = vpop.f32.mrf.mxu3  ;;  %5429 = vmatpush.bf16.msra.mxu2 %v8084_v23 }
 0x4d8   : > { %v4808_v41 = vadd.f32 %v4807_v26, %v4779_v27 }
 0x4da   : > { %v4831_v44 = vmax.f32 %v4808_v41, 0.0 }
 0x4db   : > { %v5121_v28 = vpop.f32.mrf.mxu0  ;;  %5430 = vmatpush.bf16.msra.mxu2 %v8083_v22 }
 0x4dc   : > { %v5122_v43 = vadd.f32 %v5121_v28, %v4893_v9 }
 0x4df   : > { %v4809_v60 = vpop.f32.mrf.mxu3 }
 0x4e0   : > { %v4810_v31 = vadd.f32 %v4809_v60, %v4781_v54  ;;  %v8090_v60 = vld [vmem:[%s12176_s9 + $0x40] sm:$0xff] }
 0x4e1   : > { %5460 = vmatpush.bf16.msra.mxu3 %v8090_v60 }
 0x4e2   : > { %v4834_v61 = vmax.f32 %v4810_v31, 0.0  ;;  %v8082_v31 = vld [vmem:[%s12176_s9] sm:$0xff] }
 0x4e3   : > { %v5124_v57 = vpop.f32.mrf.mxu0  ;;  %5431 = vmatpush.bf16.msra.mxu2 %v8082_v31 }
 0x4e4   : > { %v4849_v34 = vpack.c.bf16 %v4834_v61, %v4831_v44  ;;  %v5125_v36 = vadd.f32 %v5124_v57, %v4893_v9 }
 0x4e6   : > { %7545 = vmatmul.msk.bf16.gmra.mxu2 %vm5085_vm4, %v4849_v34  ;;  %7549 = vmatmul.msk.bf16.gmra.mxu1 %vm5085_vm4, %v4849_v34 }
 0x4e7   : > { %v4812_v10 = vpop.f32.mrf.mxu3 }
 0x4e8   : > { %v4813_v15 = vadd.f32 %v4812_v10, %v4784_v52 }
 0x4ea   : > { %v4837_v6 = vmax.f32 %v4813_v15, 0.0 }
 0x4eb   : > { %v5126_v16 = vpop.f32.mrf.mxu0 }
 0x4ec   : > { %v5127_v27 = vadd.f32 %v5126_v16, %v4893_v9 }
 0x4ef   : > { %v4814_v2 = vpop.f32.mrf.mxu3 }
 0x4f0   : > { %v4815_v3 = vadd.f32 %v4814_v2, %v4786_v18 }
 0x4f2   : > { %v4840_v17 = vmax.f32 %v4815_v3, 0.0 }
 0x4f3   : > { %v5129_v26 = vpop.f32.mrf.mxu0 }
 0x4f4   : > { %v4852_v33 = vpack.c.bf16 %v4840_v17, %v4837_v6  ;;  %v5130_v62 = vadd.f32 %v5129_v26, %v4893_v9 }
 0x4f6   : > { %7546 = vmatmul.msk.bf16.gmra.mxu2 %vm5085_vm4, %v4852_v33  ;;  %7550 = vmatmul.msk.bf16.gmra.mxu1 %vm5085_vm4, %v4852_v33 }
 0x4f7   : > { %v5201_v53 = vpop.f32.mrf.mxu3 }
 0x4f8   : > { %v5202_v52 = vadd.f32 %v5201_v53, %v12070_v63 }
 0x4fb   : > { %v5131_v49 = vpop.f32.mrf.mxu0 }
 0x4fc   : > { %v5132_v10 = vadd.f32 %v5131_v49, %v4893_v9 }
 0x4ff   : > { %v5203_v34 = vpop.f32.mrf.mxu3 }
 0x500   : > { %v5204_v18 = vadd.f32 %v5203_v34, %v12070_v63 }
 0x503   : > { %v5143_v47 = vpop.f32.mrf.mxu1  ;;  %v5230_v21 = vpop.f32.mrf.mxu0 }
 0x504   : > { %v12026_v11 = vadd.f32 %v5143_v47, %v5115_v30  ;;  %v5231_v15 = vadd.f32 %v5230_v21, %v5202_v52 }
 0x507   : > { %v5206_v35 = vpop.f32.mrf.mxu3 }
 0x508   : > { %v5207_v47 = vadd.f32 %v5206_v35, %v12070_v63 }
 0x50b   : > { %v5145_v50 = vpop.f32.mrf.mxu1  ;;  %v5232_v37 = vpop.f32.mrf.mxu0 }
 0x50c   : > { %v5146_v12 = vadd.f32 %v5145_v50, %v5117_v58  ;;  %v5233_v3 = vadd.f32 %v5232_v37, %v5204_v18 }
 0x50f   : > { %v5208_v29 = vpop.f32.mrf.mxu3 }
 0x510   : > { %v5209_v57 = vadd.f32 %v5208_v29, %v12070_v63 }
 0x513   : > { %v5148_v42 = vpop.f32.mrf.mxu1  ;;  %v5235_v0 = vpop.f32.mrf.mxu0 }
 0x514   : > { %v12037_v4 = vadd.f32 %v5148_v42, %v5120_v7  ;;  %v5236_v58 = vadd.f32 %v5235_v0, %v5207_v47  ;;  %v8099_v0 = vld [vmem:[%s12178_s11 + $0x28] sm:$0xff] }
 0x517   : > { %v5211_v40 = vpop.f32.mrf.mxu3 }
 0x518   : > { %v5212_v49 = vadd.f32 %v5211_v40, %v12070_v63 }
 0x51b   : > { %v5150_v38 = vpop.f32.mrf.mxu1  ;;  %v5237_v32 = vpop.f32.mrf.mxu0 }
 0x51c   : > { %v12045_v1 = vadd.f32 %v5150_v38, %v5122_v43  ;;  %v5238_v7 = vadd.f32 %v5237_v32, %v5209_v57 }
 0x51f   : > { %v5213_v38 = vpop.f32.mrf.mxu3 }
 0x523   : > { %v5153_v20 = vpop.f32.mrf.mxu1  ;;  %v5240_v50 = vpop.f32.mrf.mxu0 }
 0x524   : > { %v12053_v39 = vadd.f32 %v5153_v20, %v5125_v36  ;;  %v5241_v53 = vadd.f32 %v5240_v50, %v5212_v49 }
 0x52b   : > { %v5155_v54 = vpop.f32.mrf.mxu1  ;;  %v5242_v26 = vpop.f32.mrf.mxu0 }
 0x52c   : > { %v12058_v41 = vadd.f32 %v5155_v54, %v5127_v27  ;;  %v5214_v54 = vadd.f32 %v5213_v38, %v12070_v63 }
 0x533   : > { %v5158_v44 = vpop.f32.mrf.mxu1  ;;  %v5245_v37 = vpop.f32.mrf.mxu0 }
 0x534   : > { %v12066_v61 = vadd.f32 %v5158_v44, %v5130_v62  ;;  %v5216_v62 = vpop.f32.mrf.mxu3 }
 0x53b   : > { %v5160_v51 = vpop.f32.mrf.mxu1 }
 0x53c   : > { %v12068_v25 = vadd.f32 %v5160_v51, %v5132_v10  ;;  %v5218_v29 = vpop.f32.mrf.mxu3 }
 0x53d   : > { %v5219_v32 = vadd.f32 %v5218_v29, %v12070_v63  ;;  %v8100_v29 = vld [vmem:[%s12180_s13] sm:$0xff] }
 0x543   : > { %v5259_v48 = vpop.f32.mrf.mxu1 }
 0x544   : > { %v5260_v6 = vadd.f32 %v5259_v48, %v5231_v15 }
 0x546   : > { %v5280_v13 = vmax.f32 %v5260_v6, 0.0 }
 0x549   : > { %v5172_v2 = vpop.f32.mrf.mxu2 }
 0x54a   : > { %v5173_v46 = vadd.f32 %v5172_v2, %v12026_v11 }
 0x54b   : > { %v5261_v17 = vpop.f32.mrf.mxu1 }
 0x54c   : > { %v5262_v33 = vadd.f32 %v5261_v17, %v5233_v3  ;;  %v5279_v5 = vmax.f32 %v5173_v46, 0.0  ;;  %v8098_v3 = vld [vmem:[%s12178_s11 + $0x20] sm:$0xff] }
 0x54e   : > { %v5282_v56 = vmax.f32 %v5262_v33, 0.0 }
 0x550   : > { %v5296_v8 = vpack.c.bf16 %v5282_v56, %v5280_v13  ;;  %v5217_v13 = vadd.f32 %v5216_v62, %v12070_v63 }
 0x551   : > { %v5174_v59 = vpop.f32.mrf.mxu2 }
 0x552   : > { %v5175_v9 = vadd.f32 %v5174_v59, %v5146_v12  ;;  %7599 = vmatmul.msk.bf16.vlgmr.msra.gmra.mxu3 %vm5407_vm6, %v5296_v8  ;;  %v5246_v46 = vadd.f32 %v5245_v37, %v5217_v13 }
 0x553   : > { %v5264_v28 = vpop.f32.mrf.mxu1 }
 0x554   : > { %v5281_v30 = vmax.f32 %v5175_v9, 0.0  ;;  %v5265_v11 = vadd.f32 %v5264_v28, %v5236_v58  ;;  %v8096_v28 = vld [vmem:[%s12178_s11 + $0x10] sm:$0xff] }
 0x556   : > { %v5295_v55 = vpack.c.bf16 %v5281_v30, %v5279_v5  ;;  %v5284_v12 = vmax.f32 %v5265_v11, 0.0  ;;  %v8095_v11 = vld [vmem:[%s12178_s11 + $0x8] sm:$0xff] }
 0x558   : > { %5432 = vmatmul.bf16.vlgmr.msra.gmra.mxu2 %v5295_v55 }
 0x559   : > { %v5177_v24 = vpop.f32.mrf.mxu2 }
 0x55a   : > { %v5178_v19 = vadd.f32 %v5177_v24, %v12037_v4  ;;  %v5506_v4 = vld [vmem:[%s12178_s11 + $0x30] sm:$0x3] }
 0x55b   : > { %v5266_v16 = vpop.f32.mrf.mxu1  ;;  %v5536_v31 = vunpack.c.l.b16 %v5506_v4 }
 0x55c   : > { %v5267_v42 = vadd.f32 %v5266_v16, %v5238_v7  ;;  %v5283_v20 = vmax.f32 %v5178_v19, 0.0  ;;  %v8094_v16 = vld [vmem:[%s12178_s11] sm:$0xff] }
 0x55d   : > { %v5543_v34 = vpack.c.b16 %v5536_v31, %v5536_v31 }
 0x55e   : > { %v5286_v45 = vmax.f32 %v5267_v42, 0.0 }
 0x55f   : > { %v5564_v51 = vsel %vm3424_vm1, %v5543_v34, 0  ;;  %v5613_v34 = vld [vmem:[%s12180_s13 + $0x18] sm:$0x1] }
 0x560   : > { %v5298_v43 = vpack.c.bf16 %v5286_v45, %v5284_v12  ;;  %5567 = vmatpush.bf16.msra.mxu0 %v5564_v51 }
 0x561   : > { %v5179_v23 = vpop.f32.mrf.mxu2 }
 0x562   : > { %v5180_v14 = vadd.f32 %v5179_v23, %v12045_v1  ;;  %7600 = vmatmul.msk.bf16.gmra.mxu3 %vm5407_vm6, %v5298_v43  ;;  %v5243_v1 = vadd.f32 %v5242_v26, %v5214_v54 }
 0x563   : > { %v5269_v36 = vpop.f32.mrf.mxu1 }
 0x564   : > { %v5285_v22 = vmax.f32 %v5180_v14, 0.0  ;;  %v5270_v21 = vadd.f32 %v5269_v36, %v5241_v53  ;;  %5568 = vmatpush.bf16.msra.mxu0 %v8099_v0  ;;  %v8102_v0 = vld [vmem:[%s12180_s13 + $0x10] sm:$0xff] }
 0x566   : > { %v5297_v27 = vpack.c.bf16 %v5285_v22, %v5283_v20  ;;  %v5288_v35 = vmax.f32 %v5270_v21, 0.0 }
 0x568   : > { %5437 = vmatmul.bf16.gmra.mxu2 %v5297_v27  ;;  %5569 = vmatpush.bf16.msra.mxu0 %v8098_v3  ;;  %v8101_v3 = vld [vmem:[%s12180_s13 + $0x8] sm:$0xff] }
 0x569   : > { %v5182_v60 = vpop.f32.mrf.mxu2 }
 0x56a   : > { %v5183_v52 = vadd.f32 %v5182_v60, %v12053_v39  ;;  %v8097_v39 = vld [vmem:[%s12178_s11 + $0x18] sm:$0xff] }
 0x56b   : > { %v5271_v44 = vpop.f32.mrf.mxu1 }
 0x56c   : > { %v5272_v10 = vadd.f32 %v5271_v44, %v5243_v1  ;;  %v5287_v17 = vmax.f32 %v5183_v52, 0.0  ;;  %5570 = vmatpush.bf16.msra.mxu0 %v8097_v39 }
 0x56e   : > { %v5290_v48 = vmax.f32 %v5272_v10, 0.0  ;;  %v5631_v10 = vunpack.c.l.b16 %v5613_v34 }
 0x570   : > { %v5300_v18 = vpack.c.bf16 %v5290_v48, %v5288_v35  ;;  %5571 = vmatpush.bf16.msra.mxu0 %v8096_v28  ;;  %v5635_v37 = vpack.c.b16 %v5631_v10, %v5631_v10 }
 0x571   : > { %v5184_v15 = vpop.f32.mrf.mxu2 }
 0x572   : > { %v5185_v2 = vadd.f32 %v5184_v15, %v12058_v41  ;;  %7601 = vmatmul.msk.bf16.gmra.mxu3 %vm5407_vm6, %v5300_v18  ;;  %v5247_v41 = vpop.f32.mrf.mxu0  ;;  %v5654_v48 = vsel %vm5652_vm8, %v5635_v37, 0 }
 0x573   : > { %v5274_v6 = vpop.f32.mrf.mxu1  ;;  %v5248_v59 = vadd.f32 %v5247_v41, %v5219_v32  ;;  %5660 = vmatpush.bf16.msra.mxu1 %v5654_v48 }
 0x574   : > { %v5289_v33 = vmax.f32 %v5185_v2, 0.0  ;;  %v5275_v9 = vadd.f32 %v5274_v6, %v5246_v46  ;;  %5572 = vmatpush.bf16.msra.mxu0 %v8095_v11 }
 0x576   : > { %v5299_v56 = vpack.c.bf16 %v5289_v33, %v5287_v17  ;;  %v5292_v47 = vmax.f32 %v5275_v9, 0.0 }
 0x577   : > { %5661 = vmatpush.bf16.msra.mxu1 %v8102_v0 }
 0x578   : > { %5442 = vmatmul.bf16.gmra.mxu2 %v5299_v56  ;;  %5573 = vmatpush.bf16.msra.mxu0 %v8094_v16 }
 0x579   : > { %v5187_v8 = vpop.f32.mrf.mxu2 }
 0x57a   : > { %v5188_v40 = vadd.f32 %v5187_v8, %v12066_v61 }
 0x57b   : > { %v5276_v5 = vpop.f32.mrf.mxu1  ;;  %5662 = vmatpush.bf16.msra.mxu1 %v8101_v3 }
 0x57c   : > { %v5277_v30 = vadd.f32 %v5276_v5, %v5248_v59  ;;  %v5291_v50 = vmax.f32 %v5188_v40, 0.0 }
 0x57e   : > { %v5294_v55 = vmax.f32 %v5277_v30, 0.0 }
 0x57f   : > { %5663 = vmatpush.bf16.msra.mxu1 %v8100_v29 }
 0x580   : > { %v5302_v57 = vpack.c.bf16 %v5294_v55, %v5292_v47  ;;  %v8129_v47 = vld [vmem:[%s12179_s12] ss:$0 sm:$0xff] }
 0x581   : > { %v5189_v58 = vpop.f32.mrf.mxu2 }
 0x582   : > { %v5190_v63 = vadd.f32 %v5189_v58, %v12068_v25  ;;  %7602 = vmatmul.msk.bf16.gmra.mxu3 %vm5407_vm6, %v5302_v57  ;;  %v8128_v25 = vld [vmem:[%s12177_s10] ss:$0 sm:$0xff] }
 0x584   : > { %v5293_v24 = vmax.f32 %v5190_v63, 0.0 }
 0x586   : > { %v5301_v7 = vpack.c.bf16 %v5293_v24, %v5291_v50 }
 0x588   : > { %5447 = vmatmul.bf16.gmra.mxu2 %v5301_v7 }
 0x5d5   : > { %v5462_v61 = vpop.f32.mrf.mxu3 }
 0x5db   : > { %v5433_v42 = vpop.f32.mrf.mxu2 }
 0x5dc   : > { %v5434_v45 = vadd.f32 %v8128_v25, %v5433_v42 }
 0x5dd   : > { %v5464_v12 = vpop.f32.mrf.mxu3 }
 0x5de   : > { %v5463_v43 = vadd.f32 %v5462_v61, %v5434_v45 }
 0x5e0   : > { %v5482_v26 = vmax.f32 %v5463_v43, 0.0 }
 0x5e3   : > { %v5435_v19 = vpop.f32.mrf.mxu2 }
 0x5e4   : > { %v5436_v38 = vadd.f32 %v8128_v25, %v5435_v19 }
 0x5e5   : > { %v5467_v23 = vpop.f32.mrf.mxu3 }
 0x5e6   : > { %v5465_v14 = vadd.f32 %v5464_v12, %v5436_v38 }
 0x5e8   : > { %v5483_v36 = vmax.f32 %v5465_v14, 0.0 }
 0x5ea   : > { %v5490_v20 = vpack.c.bf16 %v5483_v36, %v5482_v26 }
 0x5eb   : > { %v5438_v22 = vpop.f32.mrf.mxu2 }
 0x5ec   : > { %7627 = vmatmul.msk.bf16.vlgmr.msra.gmra.mxu0 %vm5550_vm7, %v5490_v20  ;;  %v5439_v27 = vadd.f32 %v8128_v25, %v5438_v22 }
 0x5ed   : > { %v5469_v49 = vpop.f32.mrf.mxu3 }
 0x5ee   : > { %v5468_v53 = vadd.f32 %v5467_v23, %v5439_v27 }
 0x5f0   : > { %v5484_v1 = vmax.f32 %v5468_v53, 0.0  ;;  %v8130_v53 = vld [vmem:[%s12181_s14] ss:$0 sm:$0xff] }
 0x5f3   : > { %v5440_v54 = vpop.f32.mrf.mxu2 }
 0x5f4   : > { %v5441_v4 = vadd.f32 %v8128_v25, %v5440_v54 }
 0x5f5   : > { %v5472_v31 = vpop.f32.mrf.mxu3 }
 0x5f6   : > { %v5470_v60 = vadd.f32 %v5469_v49, %v5441_v4 }
 0x5f8   : > { %v5485_v21 = vmax.f32 %v5470_v60, 0.0 }
 0x5fa   : > { %v5491_v62 = vpack.c.bf16 %v5485_v21, %v5484_v1 }
 0x5fb   : > { %v5443_v44 = vpop.f32.mrf.mxu2 }
 0x5fc   : > { %7628 = vmatmul.msk.bf16.gmra.mxu0 %vm5550_vm7, %v5491_v62  ;;  %v5444_v51 = vadd.f32 %v8128_v25, %v5443_v44 }
 0x5fd   : > { %v5474_v35 = vpop.f32.mrf.mxu3 }
 0x5fe   : > { %v5473_v18 = vadd.f32 %v5472_v31, %v5444_v51 }
 0x600   : > { %v5486_v6 = vmax.f32 %v5473_v18, 0.0 }
 0x603   : > { %v5445_v52 = vpop.f32.mrf.mxu2 }
 0x604   : > { %v5446_v15 = vadd.f32 %v8128_v25, %v5445_v52 }
 0x605   : > { %v5477_v13 = vpop.f32.mrf.mxu3 }
 0x606   : > { %v5475_v2 = vadd.f32 %v5474_v35, %v5446_v15 }
 0x608   : > { %v5487_v17 = vmax.f32 %v5475_v2, 0.0 }
 0x60a   : > { %v5492_v33 = vpack.c.bf16 %v5487_v17, %v5486_v6 }
 0x60b   : > { %v5448_v56 = vpop.f32.mrf.mxu2 }
 0x60c   : > { %7629 = vmatmul.msk.bf16.gmra.mxu0 %vm5550_vm7, %v5492_v33  ;;  %v5449_v39 = vadd.f32 %v8128_v25, %v5448_v56 }
 0x60d   : > { %v5479_v8 = vpop.f32.mrf.mxu3 }
 0x60e   : > { %v5478_v32 = vadd.f32 %v5477_v13, %v5449_v39 }
 0x610   : > { %v5488_v9 = vmax.f32 %v5478_v32, 0.0 }
 0x613   : > { %v5450_v41 = vpop.f32.mrf.mxu2 }
 0x614   : > { %v5451_v46 = vadd.f32 %v8128_v25, %v5450_v41 }
 0x616   : > { %v5480_v59 = vadd.f32 %v5479_v8, %v5451_v46 }
 0x618   : > { %v5489_v28 = vmax.f32 %v5480_v59, 0.0 }
 0x61a   : > { %v5493_v5 = vpack.c.bf16 %v5489_v28, %v5488_v9 }
 0x61c   : > { %7630 = vmatmul.msk.bf16.gmra.mxu0 %vm5550_vm7, %v5493_v5 }
 0x669   : > { %v5575_v30 = vpop.f32.mrf.mxu0 }
 0x66a   : > { %v5576_v55 = vadd.f32 %v8129_v47, %v5575_v30 }
 0x66c   : > { %v5595_v58 = vmax.f32 %v5576_v55, 0.0 }
 0x671   : > { %v5577_v40 = vpop.f32.mrf.mxu0 }
 0x672   : > { %v5578_v57 = vadd.f32 %v8129_v47, %v5577_v40 }
 0x674   : > { %v5596_v63 = vmax.f32 %v5578_v57, 0.0 }
 0x676   : > { %v5603_v50 = vpack.c.bf16 %v5596_v63, %v5595_v58 }
 0x678   : > { %7643 = vmatmul.msk.bf16.vlgmr.msra.gmra.mxu1 %vm5639_vm9, %v5603_v50 }
 0x679   : > { %v5580_v24 = vpop.f32.mrf.mxu0 }
 0x67a   : > { %v5581_v7 = vadd.f32 %v8129_v47, %v5580_v24 }
 0x67c   : > { %v5597_v61 = vmax.f32 %v5581_v7, 0.0 }
 0x681   : > { %v5582_v11 = vpop.f32.mrf.mxu0 }
 0x682   : > { %v5583_v16 = vadd.f32 %v8129_v47, %v5582_v11 }
 0x684   : > { %v5598_v42 = vmax.f32 %v5583_v16, 0.0 }
 0x686   : > { %v5604_v25 = vpack.c.bf16 %v5598_v42, %v5597_v61 }
 0x688   : > { %7644 = vmatmul.msk.bf16.gmra.mxu1 %vm5639_vm9, %v5604_v25 }
 0x689   : > { %v5585_v12 = vpop.f32.mrf.mxu0 }
 0x68a   : > { %v5586_v45 = vadd.f32 %v8129_v47, %v5585_v12 }
 0x68c   : > { %v5599_v38 = vmax.f32 %v5586_v45, 0.0 }
 0x691   : > { %v5587_v19 = vpop.f32.mrf.mxu0 }
 0x692   : > { %v5588_v43 = vadd.f32 %v8129_v47, %v5587_v19 }
 0x694   : > { %v5600_v23 = vmax.f32 %v5588_v43, 0.0 }
 0x696   : > { %v5605_v14 = vpack.c.bf16 %v5600_v23, %v5599_v38 }
 0x698   : > { %7645 = vmatmul.msk.bf16.gmra.mxu1 %vm5639_vm9, %v5605_v14 }
 0x699   : > { %v5590_v26 = vpop.f32.mrf.mxu0 }
 0x69a   : > { %v5591_v36 = vadd.f32 %v8129_v47, %v5590_v26 }
 0x69c   : > { %v5601_v49 = vmax.f32 %v5591_v36, 0.0 }
 0x6a1   : > { %v5592_v20 = vpop.f32.mrf.mxu0 }
 0x6a2   : > { %v5593_v22 = vadd.f32 %v8129_v47, %v5592_v20 }
 0x6a4   : > { %v5602_v27 = vmax.f32 %v5593_v22, 0.0 }
 0x6a6   : > { %v5606_v54 = vpack.c.bf16 %v5602_v27, %v5601_v49 }
 0x6a8   : > { %7646 = vmatmul.msk.bf16.gmra.mxu1 %vm5639_vm9, %v5606_v54 }
 0x6f5   : > { %v5665_v4 = vpop.f32.mrf.mxu1 }
 0x6f6   : > { %v5666_v60 = vadd.f32 %v8130_v53, %v5665_v4 }
 0x6f8   : > { %v5685_v31 = vmax.f32 %v5666_v60, 0.0 }
 0x6fa   : > { %5694 = vst.msk [vmem:[%s12146_s24] sm:$0xff] %vm5693_vm10, %v5685_v31 }
 0x6fd   : > { %v5667_v1 = vpop.f32.mrf.mxu1 }
 0x6fe   : > { %v5668_v21 = vadd.f32 %v8130_v53, %v5667_v1 }
 0x700   : > { %v5686_v62 = vmax.f32 %v5668_v21, 0.0 }
 0x702   : > { %5695 = vst.msk [vmem:[%s12146_s24 + $0x8] sm:$0xff] %vm5693_vm10, %v5686_v62 }
 0x705   : > { %v5670_v44 = vpop.f32.mrf.mxu1 }
 0x706   : > { %v5671_v34 = vadd.f32 %v8130_v53, %v5670_v44 }
 0x708   : > { %v5687_v10 = vmax.f32 %v5671_v34, 0.0 }
 0x70a   : > { %5696 = vst.msk [vmem:[%s12146_s24 + $0x10] sm:$0xff] %vm5693_vm10, %v5687_v10 }
 0x70d   : > { %v5672_v37 = vpop.f32.mrf.mxu1 }
 0x70e   : > { %v5673_v51 = vadd.f32 %v8130_v53, %v5672_v37 }
 0x710   : > { %v5688_v35 = vmax.f32 %v5673_v51, 0.0 }
 0x712   : > { %5697 = vst.msk [vmem:[%s12146_s24 + $0x18] sm:$0xff] %vm5693_vm10, %v5688_v35 }
 0x715   : > { %v5675_v48 = vpop.f32.mrf.mxu1 }
 0x716   : > { %v5676_v0 = vadd.f32 %v8130_v53, %v5675_v48 }
 0x718   : > { %v5689_v52 = vmax.f32 %v5676_v0, 0.0 }
 0x71a   : > { %5698 = vst.msk [vmem:[%s12146_s24 + $0x20] sm:$0xff] %vm5693_vm10, %v5689_v52 }
 0x71d   : > { %v5677_v18 = vpop.f32.mrf.mxu1 }
 0x71e   : > { %v5678_v15 = vadd.f32 %v8130_v53, %v5677_v18 }
 0x720   : > { %v5690_v2 = vmax.f32 %v5678_v15, 0.0 }
 0x722   : > { %5699 = vst.msk [vmem:[%s12146_s24 + $0x28] sm:$0xff] %vm5693_vm10, %v5690_v2 }
 0x725   : > { %v5680_v3 = vpop.f32.mrf.mxu1 }
 0x726   : > { %v5681_v6 = vadd.f32 %v8130_v53, %v5680_v3 }
 0x728   : > { %v5691_v17 = vmax.f32 %v5681_v6, 0.0 }
 0x72a   : > { %5700 = vst.msk [vmem:[%s12146_s24 + $0x30] sm:$0xff] %vm5693_vm10, %v5691_v17 }
 0x72d   : > { %v5682_v33 = vpop.f32.mrf.mxu1 }
 0x72e   : > { %v5683_v29 = vadd.f32 %v8130_v53, %v5682_v33 }
 0x730   : > { %v5692_v13 = vmax.f32 %v5683_v29, 0.0 }
 0x732   : > { %5701 = vst.msk [vmem:[%s12146_s24 + $0x38] sm:$0xff] %vm5693_vm10, %v5692_v13 }
 0x733 PF: > { %s25_s18 = sadd.s32 1, %s8139_s18  }
 0x734   : > { %p22_p4 = scmp.ge.s32.totalorder %s25_s18, 4  }
 0x736   :  { %24 = sbr.rel (!%p22_p4) target bundleno = 1 (0x1), region = 110 }

</bundles_post_ra>
